<compile_context>
chip_gen: v7x
topology: tpu7x:2x2x1
jax: 0.10.0
libtpu: 0.0.40
codegen_flags: <defaults>
</compile_context>

<pallas_src>
import functools

import jax
import jax.numpy as jnp
from jax.experimental import pallas as pl
from jax.experimental.pallas import tpu as pltpu

LN_EPS = 1e-5  # torch.nn.LayerNorm default


def _mlp_kernel(x_ref, gamma_ref, beta_ref, w1_ref, b1_ref, w2_ref, b2_ref,
                o_ref, xn_s, *, tb, L):
    inv_l = jnp.float32(1.0 / L)
    gamma = gamma_ref[...]          # (1, L) f32
    beta = beta_ref[...]            # (1, L) f32

    # ---- per-slab LayerNorm -> bf16 -> pack into one (C, tb*L) slab ---------
    # One (C, L) slab live at a time; 128-lane-aligned static-slice stores.
    for t in range(tb):
        x_t = x_ref[t]                                           # (C, L) f32
        mean = jnp.sum(x_t, axis=-1, keepdims=True) * inv_l
        ex2 = jnp.sum(x_t * x_t, axis=-1, keepdims=True) * inv_l
        var = jnp.maximum(ex2 - mean * mean, 0.0)   # clamp single-pass stats
        rstd = jax.lax.rsqrt(var + LN_EPS)
        xn_t = (x_t - mean) * rstd * gamma + beta
        xn_s[:, t * L:(t + 1) * L] = xn_t.astype(jnp.bfloat16)

    xn = xn_s[...]                                               # (C, tb*L) bf16

    # ---- Conv1d(C -> 2C, k=1): one wide bf16 MXU matmul, f32 accumulate -----
    y = jnp.dot(w1_ref[...], xn, preferred_element_type=jnp.float32) + b1_ref[...]
    # TODO(synk): Dropout(p=0.4) is identity here (eval / deterministic forward).
    y = jnp.maximum(y, 0.0).astype(jnp.bfloat16)                 # ReLU -> bf16

    # ---- Conv1d(2C -> C, k=1) ----
    z = jnp.dot(w2_ref[...], y, preferred_element_type=jnp.float32) + b2_ref[...]

    # ---- second Dropout (identity) + residual; lane-dense (C, L) stores -----
    for t in range(tb):
        o_ref[t] = (z[:, t * L:(t + 1) * L] + x_ref[t]).astype(o_ref.dtype)


def _vmem_capacity_bytes():
    try:
        info = pltpu.get_tpu_info()
        cap = int(getattr(info, "vmem_capacity_bytes", 0))
        if cap > 0:
            return cap
    except Exception:
        pass
    return 64 << 20   # conservative fallback (v7x per-TensorCore VMEM)


def _num_tensorcores_per_chip():
    try:
        kind = jax.devices()[0].device_kind.lower()
    except Exception:
        return 1
    # 2 TensorCores per chip: v4 / v5p megacore and v7x; v5e/v6e are single-TC.
    return 2 if ("v7" in kind or "v4" in kind or "v5p" in kind) else 1


def _auto_tb(B, C, C2, L, vmem_limit):
    # Resident (grid-invariant) operands, double-buffered by the pipeline.
    resident = 2 * (2 * C2 * C * 2)             # w1, w2 (bf16)
    resident += 2 * ((C2 + C) * 128 * 4)        # b1, b2 (lane-padded (.,1))
    resident += 2 * (2 * 8 * max(L, 128) * 4)   # gamma, beta (sublane-padded)
    # Per-batch-element VMEM cost per grid step.
    per_elem = (4 * C * L * 4                   # x & out blocks (f32, 2x buffered)
                + C * L * 2                     # packed bf16 slab
                + C2 * L * 4 + C2 * L * 2       # y f32 + bf16 copy
                + C * L * 4)                    # z f32
    per_elem = int(per_elem * 1.25)             # headroom for compiler temporaries
    budget = int(vmem_limit * 0.75) - resident
    tb = max(1, min(budget // per_elem, 64, B))
    # Keep >= 2 grid steps only where a second TensorCore can use them.
    if _num_tensorcores_per_chip() >= 2 and B >= 2:
        tb = min(tb, pl.cdiv(B, 2))
    return int(tb)


def mlp_forward(x, gamma, beta, w1, b1, w2, b2, *, tb=None):
    B, C, L = x.shape
    C2 = w1.shape[0]
    assert w1.shape == (C2, C) and w2.shape == (C, C2)
    assert b1.shape == (C2,) and b2.shape == (C,)
    assert gamma.shape == (L,) and beta.shape == (L,), \
        "LayerNorm(n_filters) requires the last axis of x to equal n_filters"

    vmem_cap = _vmem_capacity_bytes()
    vmem_limit = int(min(max(vmem_cap // 2, 32 << 20), 64 << 20, vmem_cap * 3 // 4))

    if tb is None:
        tb = _auto_tb(B, C, C2, L, vmem_limit)
    tb = max(1, min(int(tb), B))
    n_steps = pl.cdiv(B, tb)   # last block may be partial: OOB writes are masked

    gamma2 = gamma.reshape(1, L)
    beta2 = beta.reshape(1, L)
    b1_2 = b1.reshape(C2, 1)          # per-output-channel bias (sublane axis)
    b2_2 = b2.reshape(C, 1)
    w1_bf = w1.astype(jnp.bfloat16)   # MXU-native dtype; halves weight traffic
    w2_bf = w2.astype(jnp.bfloat16)

    kernel = functools.partial(_mlp_kernel, tb=tb, L=L)

    flops = 4 * B * C2 * C * L                         # two wide matmuls / elem
    bytes_accessed = (2 * B * C * L) * 4 + 2 * (C2 * C) * 2 + (C2 + C + 2 * L) * 4

    out = pl.pallas_call(
        kernel,
        out_shape=jax.ShapeDtypeStruct((B, C, L), x.dtype),
        grid_spec=pltpu.PrefetchScalarGridSpec(
            num_scalar_prefetch=0,
            grid=(n_steps,),
            in_specs=[
                pl.BlockSpec((tb, C, L), lambda n: (n, 0, 0)),   # x
                # Grid-invariant operands (constant index_map -> fetched once).
                # NOTE: pipeline_mode=pl.Buffered(1) would save ~0.5 MiB of
                # VMEM here; left at default buffering for portability.
                pl.BlockSpec((1, L), lambda n: (0, 0)),          # gamma
                pl.BlockSpec((1, L), lambda n: (0, 0)),          # beta
                pl.BlockSpec((C2, C), lambda n: (0, 0)),         # w1 (bf16)
                pl.BlockSpec((C2, 1), lambda n: (0, 0)),         # b1
                pl.BlockSpec((C, C2), lambda n: (0, 0)),         # w2 (bf16)
                pl.BlockSpec((C, 1), lambda n: (0, 0)),          # b2
            ],
            out_specs=pl.BlockSpec((tb, C, L), lambda n: (n, 0, 0)),
            scratch_shapes=[pltpu.VMEM((C, tb * L), jnp.bfloat16)],
        ),
        compiler_params=pltpu.CompilerParams(
            dimension_semantics=("parallel",),
            vmem_limit_bytes=vmem_limit),
        cost_estimate=pl.CostEstimate(
            flops=flops, transcendentals=B * C, bytes_accessed=bytes_accessed),
    )(x, gamma2, beta2, w1_bf, b1_2, w2_bf, b2_2)

    return out


def mlp_reference(x, gamma, beta, w1, b1, w2, b2):
    mean = jnp.mean(x, axis=-1, keepdims=True)
    var = jnp.mean((x - mean) ** 2, axis=-1, keepdims=True)
    xn = (x - mean) / jnp.sqrt(var + LN_EPS) * gamma + beta
    y = jnp.einsum("oc,bcl->bol", w1, xn) + b1[None, :, None]
    y = jnp.maximum(y, 0.0)
    z = jnp.einsum("oc,bcl->bol", w2, y) + b2[None, :, None]
    return z + x


if __name__ == "__main__":
    B = 5                    # odd batch: exercises the partial (OOB-masked) block
    n_filters = 128          # C = n_filters; L must equal n_filters for LayerNorm
    C, L = n_filters, n_filters
    C2 = 2 * n_filters

    key = jax.random.PRNGKey(0)
    kx, kg, kb, kw1, kb1, kw2, kb2 = jax.random.split(key, 7)

    x = jax.random.normal(kx, (B, C, L), dtype=jnp.float32)

    # LayerNorm params (PyTorch default is ones/zeros; perturb for a real test)
    gamma = 1.0 + 0.1 * jax.random.normal(kg, (L,), dtype=jnp.float32)
    beta = 0.1 * jax.random.normal(kb, (L,), dtype=jnp.float32)

    # Conv1d weights: PyTorch shape (out, in, 1) -> squeezed to (out, in)
    w1 = 0.05 * jax.random.normal(kw1, (C2, C), dtype=jnp.float32)
    b1 = 0.05 * jax.random.normal(kb1, (C2,), dtype=jnp.float32)
    w2 = 0.05 * jax.random.normal(kw2, (C, C2), dtype=jnp.float32)
    b2 = 0.05 * jax.random.normal(kb2, (C,), dtype=jnp.float32)

    ref = mlp_reference(x, gamma, beta, w1, b1, w2, b2)

    # Auto-selected batch tile (typically 1 step on single-TC chips).
    out = jax.block_until_ready(mlp_forward(x, gamma, beta, w1, b1, w2, b2))
    assert out.shape == (B, C, L)
    assert jnp.allclose(out, ref, atol=2e-2, rtol=2e-2), "mismatch vs reference (auto tb)"

    # Forced multi-step path with a partial last block (B=5, tb=2 -> 3 steps).
    out2 = jax.block_until_ready(mlp_forward(x, gamma, beta, w1, b1, w2, b2, tb=2))
    assert jnp.allclose(out2, ref, atol=2e-2, rtol=2e-2), "mismatch vs reference (tb=2)"

    print("KERNEL_OK")
</pallas_src>

<mosaic_0001>
module attributes {stable_mosaic.version = 11 : i64} {
  func.func @_mlp_kernel(%arg0: i32, %arg1: memref<5x128x128xf32, #tpu.memory_space<vmem>>, %arg2: memref<1x128xf32, #tpu.memory_space<vmem>>, %arg3: memref<1x128xf32, #tpu.memory_space<vmem>>, %arg4: memref<256x128xbf16, #tpu.memory_space<vmem>>, %arg5: memref<256x1xf32, #tpu.memory_space<vmem>>, %arg6: memref<128x256xbf16, #tpu.memory_space<vmem>>, %arg7: memref<128x1xf32, #tpu.memory_space<vmem>>, %arg8: memref<5x128x128xf32, #tpu.memory_space<vmem>>, %arg9: memref<128x640xbf16, #tpu.memory_space<vmem>>) attributes {dimension_semantics = [#tpu.dimension_semantics<parallel>], iteration_bounds = array<i64: 1>, scalar_prefetch = 0 : i64, scratch_operands = 1 : i64, tpu.core_type = #tpu.core_type<tc>, window_params = [{transform_indices = @transform_0, window_bounds = array<i64: 5, 128, 128>}, {pipeline_mode = #tpu.pipeline_mode<synchronous>, transform_indices = @transform_1, window_bounds = array<i64: 1, 128>}, {pipeline_mode = #tpu.pipeline_mode<synchronous>, transform_indices = @transform_2, window_bounds = array<i64: 1, 128>}, {pipeline_mode = #tpu.pipeline_mode<synchronous>, transform_indices = @transform_3, window_bounds = array<i64: 256, 128>}, {pipeline_mode = #tpu.pipeline_mode<synchronous>, transform_indices = @transform_4, window_bounds = array<i64: 256, 1>}, {pipeline_mode = #tpu.pipeline_mode<synchronous>, transform_indices = @transform_5, window_bounds = array<i64: 128, 256>}, {pipeline_mode = #tpu.pipeline_mode<synchronous>, transform_indices = @transform_6, window_bounds = array<i64: 128, 1>}, {transform_indices = @transform_7, window_bounds = array<i64: 5, 128, 128>}]} {
    %c0 = arith.constant 0 : index
    %c0_0 = arith.constant 0 : index
    %0 = vector.load %arg2[%c0, %c0_0] : memref<1x128xf32, #tpu.memory_space<vmem>>, vector<1x128xf32>
    %c0_1 = arith.constant 0 : index
    %c0_2 = arith.constant 0 : index
    %1 = vector.load %arg3[%c0_1, %c0_2] : memref<1x128xf32, #tpu.memory_space<vmem>>, vector<1x128xf32>
    %c0_3 = arith.constant 0 : index
    %c0_4 = arith.constant 0 : index
    %c0_5 = arith.constant 0 : index
    %2 = vector.load %arg1[%c0_3, %c0_4, %c0_5] : memref<5x128x128xf32, #tpu.memory_space<vmem>>, vector<1x128x128xf32>
    %3 = vector.shape_cast %2 : vector<1x128x128xf32> to vector<128x128xf32>
    %cst = arith.constant dense<0.000000e+00> : vector<128xf32>
    %4 = vector.multi_reduction <add>, %3, %cst [1] : vector<128x128xf32> to vector<128xf32>
    %5 = vector.shape_cast %4 : vector<128xf32> to vector<128x1xf32>
    %cst_6 = arith.constant 7.812500e-03 : f32
    %6 = vector.broadcast %cst_6 : f32 to vector<128x1xf32>
    %7 = arith.mulf %5, %6 : vector<128x1xf32>
    %8 = arith.mulf %3, %3 : vector<128x128xf32>
    %cst_7 = arith.constant dense<0.000000e+00> : vector<128xf32>
    %9 = vector.multi_reduction <add>, %8, %cst_7 [1] : vector<128x128xf32> to vector<128xf32>
    %10 = vector.shape_cast %9 : vector<128xf32> to vector<128x1xf32>
    %cst_8 = arith.constant 7.812500e-03 : f32
    %11 = vector.broadcast %cst_8 : f32 to vector<128x1xf32>
    %12 = arith.mulf %10, %11 : vector<128x1xf32>
    %13 = arith.mulf %7, %7 : vector<128x1xf32>
    %14 = arith.subf %12, %13 : vector<128x1xf32>
    %cst_9 = arith.constant 0.000000e+00 : f32
    %15 = vector.broadcast %cst_9 : f32 to vector<128x1xf32>
    %16 = arith.maximumf %14, %15 : vector<128x1xf32>
    %cst_10 = arith.constant 9.99999974E-6 : f32
    %17 = vector.broadcast %cst_10 : f32 to vector<128x1xf32>
    %18 = arith.addf %16, %17 : vector<128x1xf32>
    %19 = math.rsqrt %18 : vector<128x1xf32>
    %20 = vector.broadcast %7 : vector<128x1xf32> to vector<128x128xf32>
    %21 = arith.subf %3, %20 : vector<128x128xf32>
    %22 = vector.broadcast %19 : vector<128x1xf32> to vector<128x128xf32>
    %23 = arith.mulf %21, %22 : vector<128x128xf32>
    %24 = vector.broadcast %0 : vector<1x128xf32> to vector<128x128xf32>
    %25 = arith.mulf %23, %24 : vector<128x128xf32>
    %26 = vector.broadcast %1 : vector<1x128xf32> to vector<128x128xf32>
    %27 = arith.addf %25, %26 : vector<128x128xf32>
    %28 = arith.truncf %27 : vector<128x128xf32> to vector<128x128xbf16>
    %c0_11 = arith.constant 0 : index
    %c0_12 = arith.constant 0 : index
    %29 = vector.load %arg9[%c0_11, %c0_12] : memref<128x640xbf16, #tpu.memory_space<vmem>>, vector<128x128xbf16>
    tpu.vector_store %arg9[%c0_11, %c0_12], %28 {strides = array<i32>} : memref<128x640xbf16, #tpu.memory_space<vmem>>, vector<128x128xbf16>,
    %c1 = arith.constant 1 : index
    %c0_13 = arith.constant 0 : index
    %c0_14 = arith.constant 0 : index
    %30 = vector.load %arg1[%c1, %c0_13, %c0_14] : memref<5x128x128xf32, #tpu.memory_space<vmem>>, vector<1x128x128xf32>
    %31 = vector.shape_cast %30 : vector<1x128x128xf32> to vector<128x128xf32>
    %cst_15 = arith.constant dense<0.000000e+00> : vector<128xf32>
    %32 = vector.multi_reduction <add>, %31, %cst_15 [1] : vector<128x128xf32> to vector<128xf32>
    %33 = vector.shape_cast %32 : vector<128xf32> to vector<128x1xf32>
    %cst_16 = arith.constant 7.812500e-03 : f32
    %34 = vector.broadcast %cst_16 : f32 to vector<128x1xf32>
    %35 = arith.mulf %33, %34 : vector<128x1xf32>
    %36 = arith.mulf %31, %31 : vector<128x128xf32>
    %cst_17 = arith.constant dense<0.000000e+00> : vector<128xf32>
    %37 = vector.multi_reduction <add>, %36, %cst_17 [1] : vector<128x128xf32> to vector<128xf32>
    %38 = vector.shape_cast %37 : vector<128xf32> to vector<128x1xf32>
    %cst_18 = arith.constant 7.812500e-03 : f32
    %39 = vector.broadcast %cst_18 : f32 to vector<128x1xf32>
    %40 = arith.mulf %38, %39 : vector<128x1xf32>
    %41 = arith.mulf %35, %35 : vector<128x1xf32>
    %42 = arith.subf %40, %41 : vector<128x1xf32>
    %cst_19 = arith.constant 0.000000e+00 : f32
    %43 = vector.broadcast %cst_19 : f32 to vector<128x1xf32>
    %44 = arith.maximumf %42, %43 : vector<128x1xf32>
    %cst_20 = arith.constant 9.99999974E-6 : f32
    %45 = vector.broadcast %cst_20 : f32 to vector<128x1xf32>
    %46 = arith.addf %44, %45 : vector<128x1xf32>
    %47 = math.rsqrt %46 : vector<128x1xf32>
    %48 = vector.broadcast %35 : vector<128x1xf32> to vector<128x128xf32>
    %49 = arith.subf %31, %48 : vector<128x128xf32>
    %50 = vector.broadcast %47 : vector<128x1xf32> to vector<128x128xf32>
    %51 = arith.mulf %49, %50 : vector<128x128xf32>
    %52 = vector.broadcast %0 : vector<1x128xf32> to vector<128x128xf32>
    %53 = arith.mulf %51, %52 : vector<128x128xf32>
    %54 = vector.broadcast %1 : vector<1x128xf32> to vector<128x128xf32>
    %55 = arith.addf %53, %54 : vector<128x128xf32>
    %56 = arith.truncf %55 : vector<128x128xf32> to vector<128x128xbf16>
    %c0_21 = arith.constant 0 : index
    %c128 = arith.constant 128 : index
    %57 = vector.load %arg9[%c0_21, %c128] : memref<128x640xbf16, #tpu.memory_space<vmem>>, vector<128x128xbf16>
    tpu.vector_store %arg9[%c0_21, %c128], %56 {strides = array<i32>} : memref<128x640xbf16, #tpu.memory_space<vmem>>, vector<128x128xbf16>,
    %c2 = arith.constant 2 : index
    %c0_22 = arith.constant 0 : index
    %c0_23 = arith.constant 0 : index
    %58 = vector.load %arg1[%c2, %c0_22, %c0_23] : memref<5x128x128xf32, #tpu.memory_space<vmem>>, vector<1x128x128xf32>
    %59 = vector.shape_cast %58 : vector<1x128x128xf32> to vector<128x128xf32>
    %cst_24 = arith.constant dense<0.000000e+00> : vector<128xf32>
    %60 = vector.multi_reduction <add>, %59, %cst_24 [1] : vector<128x128xf32> to vector<128xf32>
    %61 = vector.shape_cast %60 : vector<128xf32> to vector<128x1xf32>
    %cst_25 = arith.constant 7.812500e-03 : f32
    %62 = vector.broadcast %cst_25 : f32 to vector<128x1xf32>
    %63 = arith.mulf %61, %62 : vector<128x1xf32>
    %64 = arith.mulf %59, %59 : vector<128x128xf32>
    %cst_26 = arith.constant dense<0.000000e+00> : vector<128xf32>
    %65 = vector.multi_reduction <add>, %64, %cst_26 [1] : vector<128x128xf32> to vector<128xf32>
    %66 = vector.shape_cast %65 : vector<128xf32> to vector<128x1xf32>
    %cst_27 = arith.constant 7.812500e-03 : f32
    %67 = vector.broadcast %cst_27 : f32 to vector<128x1xf32>
    %68 = arith.mulf %66, %67 : vector<128x1xf32>
    %69 = arith.mulf %63, %63 : vector<128x1xf32>
    %70 = arith.subf %68, %69 : vector<128x1xf32>
    %cst_28 = arith.constant 0.000000e+00 : f32
    %71 = vector.broadcast %cst_28 : f32 to vector<128x1xf32>
    %72 = arith.maximumf %70, %71 : vector<128x1xf32>
    %cst_29 = arith.constant 9.99999974E-6 : f32
    %73 = vector.broadcast %cst_29 : f32 to vector<128x1xf32>
    %74 = arith.addf %72, %73 : vector<128x1xf32>
    %75 = math.rsqrt %74 : vector<128x1xf32>
    %76 = vector.broadcast %63 : vector<128x1xf32> to vector<128x128xf32>
    %77 = arith.subf %59, %76 : vector<128x128xf32>
    %78 = vector.broadcast %75 : vector<128x1xf32> to vector<128x128xf32>
    %79 = arith.mulf %77, %78 : vector<128x128xf32>
    %80 = vector.broadcast %0 : vector<1x128xf32> to vector<128x128xf32>
    %81 = arith.mulf %79, %80 : vector<128x128xf32>
    %82 = vector.broadcast %1 : vector<1x128xf32> to vector<128x128xf32>
    %83 = arith.addf %81, %82 : vector<128x128xf32>
    %84 = arith.truncf %83 : vector<128x128xf32> to vector<128x128xbf16>
    %c0_30 = arith.constant 0 : index
    %c256 = arith.constant 256 : index
    %85 = vector.load %arg9[%c0_30, %c256] : memref<128x640xbf16, #tpu.memory_space<vmem>>, vector<128x128xbf16>
    tpu.vector_store %arg9[%c0_30, %c256], %84 {strides = array<i32>} : memref<128x640xbf16, #tpu.memory_space<vmem>>, vector<128x128xbf16>,
    %c3 = arith.constant 3 : index
    %c0_31 = arith.constant 0 : index
    %c0_32 = arith.constant 0 : index
    %86 = vector.load %arg1[%c3, %c0_31, %c0_32] : memref<5x128x128xf32, #tpu.memory_space<vmem>>, vector<1x128x128xf32>
    %87 = vector.shape_cast %86 : vector<1x128x128xf32> to vector<128x128xf32>
    %cst_33 = arith.constant dense<0.000000e+00> : vector<128xf32>
    %88 = vector.multi_reduction <add>, %87, %cst_33 [1] : vector<128x128xf32> to vector<128xf32>
    %89 = vector.shape_cast %88 : vector<128xf32> to vector<128x1xf32>
    %cst_34 = arith.constant 7.812500e-03 : f32
    %90 = vector.broadcast %cst_34 : f32 to vector<128x1xf32>
    %91 = arith.mulf %89, %90 : vector<128x1xf32>
    %92 = arith.mulf %87, %87 : vector<128x128xf32>
    %cst_35 = arith.constant dense<0.000000e+00> : vector<128xf32>
    %93 = vector.multi_reduction <add>, %92, %cst_35 [1] : vector<128x128xf32> to vector<128xf32>
    %94 = vector.shape_cast %93 : vector<128xf32> to vector<128x1xf32>
    %cst_36 = arith.constant 7.812500e-03 : f32
    %95 = vector.broadcast %cst_36 : f32 to vector<128x1xf32>
    %96 = arith.mulf %94, %95 : vector<128x1xf32>
    %97 = arith.mulf %91, %91 : vector<128x1xf32>
    %98 = arith.subf %96, %97 : vector<128x1xf32>
    %cst_37 = arith.constant 0.000000e+00 : f32
    %99 = vector.broadcast %cst_37 : f32 to vector<128x1xf32>
    %100 = arith.maximumf %98, %99 : vector<128x1xf32>
    %cst_38 = arith.constant 9.99999974E-6 : f32
    %101 = vector.broadcast %cst_38 : f32 to vector<128x1xf32>
    %102 = arith.addf %100, %101 : vector<128x1xf32>
    %103 = math.rsqrt %102 : vector<128x1xf32>
    %104 = vector.broadcast %91 : vector<128x1xf32> to vector<128x128xf32>
    %105 = arith.subf %87, %104 : vector<128x128xf32>
    %106 = vector.broadcast %103 : vector<128x1xf32> to vector<128x128xf32>
    %107 = arith.mulf %105, %106 : vector<128x128xf32>
    %108 = vector.broadcast %0 : vector<1x128xf32> to vector<128x128xf32>
    %109 = arith.mulf %107, %108 : vector<128x128xf32>
    %110 = vector.broadcast %1 : vector<1x128xf32> to vector<128x128xf32>
    %111 = arith.addf %109, %110 : vector<128x128xf32>
    %112 = arith.truncf %111 : vector<128x128xf32> to vector<128x128xbf16>
    %c0_39 = arith.constant 0 : index
    %c384 = arith.constant 384 : index
    %113 = vector.load %arg9[%c0_39, %c384] : memref<128x640xbf16, #tpu.memory_space<vmem>>, vector<128x128xbf16>
    tpu.vector_store %arg9[%c0_39, %c384], %112 {strides = array<i32>} : memref<128x640xbf16, #tpu.memory_space<vmem>>, vector<128x128xbf16>,
    %c4 = arith.constant 4 : index
    %c0_40 = arith.constant 0 : index
    %c0_41 = arith.constant 0 : index
    %114 = vector.load %arg1[%c4, %c0_40, %c0_41] : memref<5x128x128xf32, #tpu.memory_space<vmem>>, vector<1x128x128xf32>
    %115 = vector.shape_cast %114 : vector<1x128x128xf32> to vector<128x128xf32>
    %cst_42 = arith.constant dense<0.000000e+00> : vector<128xf32>
    %116 = vector.multi_reduction <add>, %115, %cst_42 [1] : vector<128x128xf32> to vector<128xf32>
    %117 = vector.shape_cast %116 : vector<128xf32> to vector<128x1xf32>
    %cst_43 = arith.constant 7.812500e-03 : f32
    %118 = vector.broadcast %cst_43 : f32 to vector<128x1xf32>
    %119 = arith.mulf %117, %118 : vector<128x1xf32>
    %120 = arith.mulf %115, %115 : vector<128x128xf32>
    %cst_44 = arith.constant dense<0.000000e+00> : vector<128xf32>
    %121 = vector.multi_reduction <add>, %120, %cst_44 [1] : vector<128x128xf32> to vector<128xf32>
    %122 = vector.shape_cast %121 : vector<128xf32> to vector<128x1xf32>
    %cst_45 = arith.constant 7.812500e-03 : f32
    %123 = vector.broadcast %cst_45 : f32 to vector<128x1xf32>
    %124 = arith.mulf %122, %123 : vector<128x1xf32>
    %125 = arith.mulf %119, %119 : vector<128x1xf32>
    %126 = arith.subf %124, %125 : vector<128x1xf32>
    %cst_46 = arith.constant 0.000000e+00 : f32
    %127 = vector.broadcast %cst_46 : f32 to vector<128x1xf32>
    %128 = arith.maximumf %126, %127 : vector<128x1xf32>
    %cst_47 = arith.constant 9.99999974E-6 : f32
    %129 = vector.broadcast %cst_47 : f32 to vector<128x1xf32>
    %130 = arith.addf %128, %129 : vector<128x1xf32>
    %131 = math.rsqrt %130 : vector<128x1xf32>
    %132 = vector.broadcast %119 : vector<128x1xf32> to vector<128x128xf32>
    %133 = arith.subf %115, %132 : vector<128x128xf32>
    %134 = vector.broadcast %131 : vector<128x1xf32> to vector<128x128xf32>
    %135 = arith.mulf %133, %134 : vector<128x128xf32>
    %136 = vector.broadcast %0 : vector<1x128xf32> to vector<128x128xf32>
    %137 = arith.mulf %135, %136 : vector<128x128xf32>
    %138 = vector.broadcast %1 : vector<1x128xf32> to vector<128x128xf32>
    %139 = arith.addf %137, %138 : vector<128x128xf32>
    %140 = arith.truncf %139 : vector<128x128xf32> to vector<128x128xbf16>
    %c0_48 = arith.constant 0 : index
    %c512 = arith.constant 512 : index
    %141 = vector.load %arg9[%c0_48, %c512] : memref<128x640xbf16, #tpu.memory_space<vmem>>, vector<128x128xbf16>
    tpu.vector_store %arg9[%c0_48, %c512], %140 {strides = array<i32>} : memref<128x640xbf16, #tpu.memory_space<vmem>>, vector<128x128xbf16>,
    %c0_49 = arith.constant 0 : index
    %c0_50 = arith.constant 0 : index
    %142 = vector.load %arg9[%c0_49, %c0_50] : memref<128x640xbf16, #tpu.memory_space<vmem>>, vector<128x640xbf16>
    %c0_51 = arith.constant 0 : index
    %c0_52 = arith.constant 0 : index
    %143 = vector.load %arg4[%c0_51, %c0_52] : memref<256x128xbf16, #tpu.memory_space<vmem>>, vector<256x128xbf16>
    %cst_53 = arith.constant dense<0.000000e+00> : vector<256x640xf32>
    %144 = tpu.matmul %143, %142, %cst_53 {dimension_numbers = #tpu.dot_dimension_numbers<[1], [0], [0], [1], [0, 0, 1, 1], [], []>} : vector<256x128xbf16>, vector<128x640xbf16>, vector<256x640xf32> -> vector<256x640xf32>
    %c0_54 = arith.constant 0 : index
    %c0_55 = arith.constant 0 : index
    %145 = vector.load %arg5[%c0_54, %c0_55] : memref<256x1xf32, #tpu.memory_space<vmem>>, vector<256x1xf32>
    %146 = vector.broadcast %145 : vector<256x1xf32> to vector<256x640xf32>
    %147 = arith.addf %144, %146 : vector<256x640xf32>
    %cst_56 = arith.constant 0.000000e+00 : f32
    %148 = vector.broadcast %cst_56 : f32 to vector<256x640xf32>
    %149 = arith.maximumf %147, %148 : vector<256x640xf32>
    %150 = arith.truncf %149 : vector<256x640xf32> to vector<256x640xbf16>
    %c0_57 = arith.constant 0 : index
    %c0_58 = arith.constant 0 : index
    %151 = vector.load %arg6[%c0_57, %c0_58] : memref<128x256xbf16, #tpu.memory_space<vmem>>, vector<128x256xbf16>
    %cst_59 = arith.constant dense<0.000000e+00> : vector<128x640xf32>
    %152 = tpu.matmul %151, %150, %cst_59 {dimension_numbers = #tpu.dot_dimension_numbers<[1], [0], [0], [1], [0, 0, 1, 1], [], []>} : vector<128x256xbf16>, vector<256x640xbf16>, vector<128x640xf32> -> vector<128x640xf32>
    %c0_60 = arith.constant 0 : index
    %c0_61 = arith.constant 0 : index
    %153 = vector.load %arg7[%c0_60, %c0_61] : memref<128x1xf32, #tpu.memory_space<vmem>>, vector<128x1xf32>
    %154 = vector.broadcast %153 : vector<128x1xf32> to vector<128x640xf32>
    %155 = arith.addf %152, %154 : vector<128x640xf32>
    %156 = vector.extract_strided_slice %155 {offsets = [0, 0], sizes = [128, 128], strides = [1, 1]} : vector<128x640xf32> to vector<128x128xf32>
    %c0_62 = arith.constant 0 : index
    %c0_63 = arith.constant 0 : index
    %c0_64 = arith.constant 0 : index
    %157 = vector.load %arg1[%c0_62, %c0_63, %c0_64] : memref<5x128x128xf32, #tpu.memory_space<vmem>>, vector<1x128x128xf32>
    %158 = vector.shape_cast %157 : vector<1x128x128xf32> to vector<128x128xf32>
    %159 = arith.addf %156, %158 : vector<128x128xf32>
    %c0_65 = arith.constant 0 : index
    %c0_66 = arith.constant 0 : index
    %c0_67 = arith.constant 0 : index
    %160 = vector.load %arg8[%c0_65, %c0_66, %c0_67] : memref<5x128x128xf32, #tpu.memory_space<vmem>>, vector<1x128x128xf32>
    %161 = vector.shape_cast %160 : vector<1x128x128xf32> to vector<128x128xf32>
    %162 = vector.shape_cast %159 : vector<128x128xf32> to vector<1x128x128xf32>
    tpu.vector_store %arg8[%c0_65, %c0_66, %c0_67], %162 {strides = array<i32>} : memref<5x128x128xf32, #tpu.memory_space<vmem>>, vector<1x128x128xf32>,
    %163 = vector.extract_strided_slice %155 {offsets = [0, 128], sizes = [128, 128], strides = [1, 1]} : vector<128x640xf32> to vector<128x128xf32>
    %c1_68 = arith.constant 1 : index
    %c0_69 = arith.constant 0 : index
    %c0_70 = arith.constant 0 : index
    %164 = vector.load %arg1[%c1_68, %c0_69, %c0_70] : memref<5x128x128xf32, #tpu.memory_space<vmem>>, vector<1x128x128xf32>
    %165 = vector.shape_cast %164 : vector<1x128x128xf32> to vector<128x128xf32>
    %166 = arith.addf %163, %165 : vector<128x128xf32>
    %c1_71 = arith.constant 1 : index
    %c0_72 = arith.constant 0 : index
    %c0_73 = arith.constant 0 : index
    %167 = vector.load %arg8[%c1_71, %c0_72, %c0_73] : memref<5x128x128xf32, #tpu.memory_space<vmem>>, vector<1x128x128xf32>
    %168 = vector.shape_cast %167 : vector<1x128x128xf32> to vector<128x128xf32>
    %169 = vector.shape_cast %166 : vector<128x128xf32> to vector<1x128x128xf32>
    tpu.vector_store %arg8[%c1_71, %c0_72, %c0_73], %169 {strides = array<i32>} : memref<5x128x128xf32, #tpu.memory_space<vmem>>, vector<1x128x128xf32>,
    %170 = vector.extract_strided_slice %155 {offsets = [0, 256], sizes = [128, 128], strides = [1, 1]} : vector<128x640xf32> to vector<128x128xf32>
    %c2_74 = arith.constant 2 : index
    %c0_75 = arith.constant 0 : index
    %c0_76 = arith.constant 0 : index
    %171 = vector.load %arg1[%c2_74, %c0_75, %c0_76] : memref<5x128x128xf32, #tpu.memory_space<vmem>>, vector<1x128x128xf32>
    %172 = vector.shape_cast %171 : vector<1x128x128xf32> to vector<128x128xf32>
    %173 = arith.addf %170, %172 : vector<128x128xf32>
    %c2_77 = arith.constant 2 : index
    %c0_78 = arith.constant 0 : index
    %c0_79 = arith.constant 0 : index
    %174 = vector.load %arg8[%c2_77, %c0_78, %c0_79] : memref<5x128x128xf32, #tpu.memory_space<vmem>>, vector<1x128x128xf32>
    %175 = vector.shape_cast %174 : vector<1x128x128xf32> to vector<128x128xf32>
    %176 = vector.shape_cast %173 : vector<128x128xf32> to vector<1x128x128xf32>
    tpu.vector_store %arg8[%c2_77, %c0_78, %c0_79], %176 {strides = array<i32>} : memref<5x128x128xf32, #tpu.memory_space<vmem>>, vector<1x128x128xf32>,
    %177 = vector.extract_strided_slice %155 {offsets = [0, 384], sizes = [128, 128], strides = [1, 1]} : vector<128x640xf32> to vector<128x128xf32>
    %c3_80 = arith.constant 3 : index
    %c0_81 = arith.constant 0 : index
    %c0_82 = arith.constant 0 : index
    %178 = vector.load %arg1[%c3_80, %c0_81, %c0_82] : memref<5x128x128xf32, #tpu.memory_space<vmem>>, vector<1x128x128xf32>
    %179 = vector.shape_cast %178 : vector<1x128x128xf32> to vector<128x128xf32>
    %180 = arith.addf %177, %179 : vector<128x128xf32>
    %c3_83 = arith.constant 3 : index
    %c0_84 = arith.constant 0 : index
    %c0_85 = arith.constant 0 : index
    %181 = vector.load %arg8[%c3_83, %c0_84, %c0_85] : memref<5x128x128xf32, #tpu.memory_space<vmem>>, vector<1x128x128xf32>
    %182 = vector.shape_cast %181 : vector<1x128x128xf32> to vector<128x128xf32>
    %183 = vector.shape_cast %180 : vector<128x128xf32> to vector<1x128x128xf32>
    tpu.vector_store %arg8[%c3_83, %c0_84, %c0_85], %183 {strides = array<i32>} : memref<5x128x128xf32, #tpu.memory_space<vmem>>, vector<1x128x128xf32>,
    %184 = vector.extract_strided_slice %155 {offsets = [0, 512], sizes = [128, 128], strides = [1, 1]} : vector<128x640xf32> to vector<128x128xf32>
    %c4_86 = arith.constant 4 : index
    %c0_87 = arith.constant 0 : index
    %c0_88 = arith.constant 0 : index
    %185 = vector.load %arg1[%c4_86, %c0_87, %c0_88] : memref<5x128x128xf32, #tpu.memory_space<vmem>>, vector<1x128x128xf32>
    %186 = vector.shape_cast %185 : vector<1x128x128xf32> to vector<128x128xf32>
    %187 = arith.addf %184, %186 : vector<128x128xf32>
    %c4_89 = arith.constant 4 : index
    %c0_90 = arith.constant 0 : index
    %c0_91 = arith.constant 0 : index
    %188 = vector.load %arg8[%c4_89, %c0_90, %c0_91] : memref<5x128x128xf32, #tpu.memory_space<vmem>>, vector<1x128x128xf32>
    %189 = vector.shape_cast %188 : vector<1x128x128xf32> to vector<128x128xf32>
    %190 = vector.shape_cast %187 : vector<128x128xf32> to vector<1x128x128xf32>
    tpu.vector_store %arg8[%c4_89, %c0_90, %c0_91], %190 {strides = array<i32>} : memref<5x128x128xf32, #tpu.memory_space<vmem>>, vector<1x128x128xf32>,
    return
  }
  func.func @transform_0(%arg0: i32) -> (i32, i32, i32) {
    %c0_i32 = arith.constant 0 : i32
    %c0_i32_0 = arith.constant 0 : i32
    %c0_i32_1 = arith.constant 0 : i32
    return %arg0, %c0_i32, %c0_i32_0 : i32, i32, i32
  }
  func.func @transform_1(%arg0: i32) -> (i32, i32) {
    %c0_i32 = arith.constant 0 : i32
    %c0_i32_0 = arith.constant 0 : i32
    %c0_i32_1 = arith.constant 0 : i32
    return %c0_i32, %c0_i32_0 : i32, i32
  }
  func.func @transform_2(%arg0: i32) -> (i32, i32) {
    %c0_i32 = arith.constant 0 : i32
    %c0_i32_0 = arith.constant 0 : i32
    %c0_i32_1 = arith.constant 0 : i32
    return %c0_i32, %c0_i32_0 : i32, i32
  }
  func.func @transform_3(%arg0: i32) -> (i32, i32) {
    %c0_i32 = arith.constant 0 : i32
    %c0_i32_0 = arith.constant 0 : i32
    %c0_i32_1 = arith.constant 0 : i32
    return %c0_i32, %c0_i32_0 : i32, i32
  }
  func.func @transform_4(%arg0: i32) -> (i32, i32) {
    %c0_i32 = arith.constant 0 : i32
    %c0_i32_0 = arith.constant 0 : i32
    %c0_i32_1 = arith.constant 0 : i32
    return %c0_i32, %c0_i32_0 : i32, i32
  }
  func.func @transform_5(%arg0: i32) -> (i32, i32) {
    %c0_i32 = arith.constant 0 : i32
    %c0_i32_0 = arith.constant 0 : i32
    %c0_i32_1 = arith.constant 0 : i32
    return %c0_i32, %c0_i32_0 : i32, i32
  }
  func.func @transform_6(%arg0: i32) -> (i32, i32) {
    %c0_i32 = arith.constant 0 : i32
    %c0_i32_0 = arith.constant 0 : i32
    %c0_i32_1 = arith.constant 0 : i32
    return %c0_i32, %c0_i32_0 : i32, i32
  }
  func.func @transform_7(%arg0: i32) -> (i32, i32, i32) {
    %c0_i32 = arith.constant 0 : i32
    %c0_i32_0 = arith.constant 0 : i32
    %c0_i32_1 = arith.constant 0 : i32
    return %arg0, %c0_i32, %c0_i32_0 : i32, i32, i32
  }
}

</mosaic_0001>

<bundles_post_ra>
// kernel: tpu_custom_call.1
= control target key start
LH: loop header
LB: loop body
LE: loop exit
PB: predicated region body
PF: predicated region fallthrough
CT: control target
= control target key end

     0   :  { %12 = vsyncpa [#allocation4], 0  ;;  %s5504_s0 = inlined_call_operand.hbm [shape: f32[5,128,128], index: 0, kind: input, shape index: {}]   ;;  %s5505_s1 = inlined_call_operand.vmem [shape: f32[1,128], index: 1, kind: input, shape index: {}]   ;;  %s5506_s2 = inlined_call_operand.vmem [shape: f32[1,128], index: 2, kind: input, shape index: {}]   ;;  %s5507_s3 = inlined_call_operand.vmem [shape: bf16[256,128], index: 3, kind: input, shape index: {}]   ;;  %s5508_s4 = inlined_call_operand.vmem [shape: f32[256,1], index: 4, kind: input, shape index: {}]   ;;  %s5509_s5 = inlined_call_operand.vmem [shape: bf16[128,256], index: 5, kind: input, shape index: {}]   ;;  %s5510_s6 = inlined_call_operand.vmem [shape: f32[128,1], index: 6, kind: input, shape index: {}]   ;;  %s5511_s7 = inlined_call_operand.hbm [shape: f32[5,128,128], index: 7, kind: output, shape index: {}]  }
   0x1   :  { %13 = vsyncpa [#allocation5], 0  ;;  %s3923_s24 = smov [#allocation3]   ;;  %s3875_s28 = scalar_lea.hbm %s5504_s0, 10240 }
   0x2   :  { %s19_s25 = sshll.u32 %s3923_s24, 4  ;;  %p3876_p0 = scmp.ne.s32.totalorder %s5504_s0, %s3875_s28  ;;  %s20_s25 = int_to_ptr.vmem [resolvable:$true] %s19_s25 }
   0x3   :  { %p3879_p1 = scmp.lt.u32.totalorder %s3875_s28, %s5504_s0 }
   0x5   :  { %p3881_p2 = pnand %p3879_p1, %p3876_p0 }
   0x7   :  { %3884 = shalt.err (!%p3881_p2)
}
   0x8   :  { %s3885_s10 = scalar_lea.vmem %s20_s25, 10240  ;;  %p3890_p4 = scmp.lt.s32.totalorder %s20_s25, %s20_s25 }
   0x9   :  { %p3886_p3 = scmp.ne.s32.totalorder %s20_s25, %s3885_s10  ;;  %p3891_p5 = scmp.lt.s32.totalorder %s3885_s10, %s3885_s10 }
   0xb   :  { %p3892_p6 = por %p3891_p5, %p3890_p4 }
   0xd   :  { %p3893_p7 = pnand %p3892_p6, %p3886_p3 }
   0xf   :  { %3896 = shalt.err (!%p3893_p7)
}
  0x10   :  { %s3924_s11 = smov 128   ;;  %s3925_s12 = smov 8  }
  0x11   :  { %25 = dma.hbm_to_vmem [thread:$0]  %s5504_s0, 10240, %s20_s25, [#allocation4], %s3924_s11, %s3924_s11, %s3925_s12  }
  0x12   :  { %3919 = dma.done.wait [#allocation4], 10240  }
  0x13   :  { %3920 = vsyncadd [#allocation4], 4294957056  ;;  %v3983_v0 = vld [vmem:[#allocation3 + $0x80] sm:$0xff]  ;;  %v3989_v2 = vld [vmem:[#allocation3 + $0x88] sm:$0xff] }
  0x14   :  { %v3985_v1 = vld [vmem:[#allocation3] sm:$0xff]  ;;  %361 = vadd.xlane.f32.xlu0 %v3983_v0  ;;  %v3991_v3 = vld [vmem:[#allocation3 + $0x8] sm:$0xff]  ;;  %v409_v4 = vmul.f32 %v3983_v0, %v3983_v0  ;;  %v410_v5 = vmul.f32 %v3989_v2, %v3989_v2  ;;  %v4003_v8 = vld [vmem:[#allocation3 + $0x98] sm:$0xff] }
  0x15   :  { %60 = vadd.xlane.f32.xlu1 %v3985_v1  ;;  %v109_v6 = vmul.f32 %v3991_v3, %v3991_v3  ;;  %v108_v7 = vmul.f32 %v3985_v1, %v3985_v1  ;;  %v4005_v9 = vld [vmem:[#allocation3 + $0x90] sm:$0xff]  ;;  %v4007_v10 = vld [vmem:[#allocation3 + $0x18] sm:$0xff]  ;;  %v412_v12 = vmul.f32 %v4003_v8, %v4003_v8  ;;  %v4023_v16 = vld [vmem:[#allocation3 + $0xa8] sm:$0xff] }
  0x16   :  { %v4009_v11 = vld [vmem:[#allocation3 + $0x10] sm:$0xff]  ;;  %v411_v13 = vmul.f32 %v4005_v9, %v4005_v9  ;;  %v111_v14 = vmul.f32 %v4007_v10, %v4007_v10  ;;  %v4025_v17 = vld [vmem:[#allocation3 + $0xa0] sm:$0xff]  ;;  %v4029_v18 = vld [vmem:[#allocation3 + $0x28] sm:$0xff]  ;;  %v414_v20 = vmul.f32 %v4023_v16, %v4023_v16 }
  0x17   :  { %v110_v15 = vmul.f32 %v4009_v11, %v4009_v11  ;;  %v4031_v19 = vld [vmem:[#allocation3 + $0x20] sm:$0xff]  ;;  %v413_v21 = vmul.f32 %v4025_v17, %v4025_v17  ;;  %v113_v22 = vmul.f32 %v4029_v18, %v4029_v18  ;;  %v4043_v24 = vld [vmem:[#allocation3 + $0xb8] sm:$0xff]  ;;  %v4045_v25 = vld [vmem:[#allocation3 + $0xb0] sm:$0xff] }
  0x18   :  { %363 = vadd.xlane.f32.xlu0 %v3989_v2  ;;  %v112_v23 = vmul.f32 %v4031_v19, %v4031_v19  ;;  %v4049_v26 = vld [vmem:[#allocation3 + $0x38] sm:$0xff]  ;;  %v4051_v27 = vld [vmem:[#allocation3 + $0x30] sm:$0xff]  ;;  %v416_v28 = vmul.f32 %v4043_v24, %v4043_v24  ;;  %v415_v29 = vmul.f32 %v4045_v25, %v4045_v25  ;;  %v4063_v32 = vld [vmem:[#allocation3 + $0xc8] sm:$0xff] }
  0x19   :  { %62 = vadd.xlane.f32.xlu1 %v3991_v3  ;;  %v115_v30 = vmul.f32 %v4049_v26, %v4049_v26  ;;  %v114_v31 = vmul.f32 %v4051_v27, %v4051_v27  ;;  %v4065_v33 = vld [vmem:[#allocation3 + $0xc0] sm:$0xff]  ;;  %v4069_v34 = vld [vmem:[#allocation3 + $0x48] sm:$0xff]  ;;  %v418_v36 = vmul.f32 %v4063_v32, %v4063_v32  ;;  %v356_v40 = vld [vmem:[#allocation3 + $0xd8] sm:$0xff] }
  0x1a   :  { %v4071_v35 = vld [vmem:[#allocation3 + $0x40] sm:$0xff]  ;;  %v417_v37 = vmul.f32 %v4065_v33, %v4065_v33  ;;  %v117_v38 = vmul.f32 %v4069_v34, %v4069_v34  ;;  %v355_v41 = vld [vmem:[#allocation3 + $0xd0] sm:$0xff]  ;;  %v55_v42 = vld [vmem:[#allocation3 + $0x58] sm:$0xff]  ;;  %v420_v44 = vmul.f32 %v356_v40, %v356_v40 }
  0x1b   :  { %v116_v39 = vmul.f32 %v4071_v35, %v4071_v35  ;;  %v54_v43 = vld [vmem:[#allocation3 + $0x50] sm:$0xff]  ;;  %v419_v45 = vmul.f32 %v355_v41, %v355_v41  ;;  %v119_v46 = vmul.f32 %v55_v42, %v55_v42  ;;  %v358_v48 = vld [vmem:[#allocation3 + $0xe8] sm:$0xff]  ;;  %v357_v49 = vld [vmem:[#allocation3 + $0xe0] sm:$0xff] }
  0x1c   :  { %425 = vadd.xlane.f32.xlu0 %v409_v4  ;;  %v118_v47 = vmul.f32 %v54_v43, %v54_v43  ;;  %v57_v50 = vld [vmem:[#allocation3 + $0x68] sm:$0xff]  ;;  %v56_v51 = vld [vmem:[#allocation3 + $0x60] sm:$0xff]  ;;  %v422_v52 = vmul.f32 %v358_v48, %v358_v48  ;;  %v421_v53 = vmul.f32 %v357_v49, %v357_v49  ;;  %v360_v56 = vld [vmem:[#allocation3 + $0xf8] sm:$0xff] }
  0x1d   :  { %427 = vadd.xlane.f32.xlu1 %v410_v5  ;;  %v121_v54 = vmul.f32 %v57_v50, %v57_v50  ;;  %v120_v55 = vmul.f32 %v56_v51, %v56_v51  ;;  %v359_v57 = vld [vmem:[#allocation3 + $0xf0] sm:$0xff]  ;;  %v59_v58 = vld [vmem:[#allocation3 + $0x78] sm:$0xff]  ;;  %v424_v60 = vmul.f32 %v360_v56, %v360_v56  ;;  %v924_v4 = vld [vmem:[#allocation3 + $0x188] sm:$0xff] }
  0x1e   :  { %v58_v59 = vld [vmem:[#allocation3 + $0x70] sm:$0xff]  ;;  %v423_v61 = vmul.f32 %v359_v57, %v359_v57  ;;  %v123_v62 = vmul.f32 %v59_v58, %v59_v58  ;;  %v923_v5 = vld [vmem:[#allocation3 + $0x180] sm:$0xff] }
  0x1f   :  { %v122_v63 = vmul.f32 %v58_v59, %v58_v59 }
  0x20   :  { %124 = vadd.xlane.f32.xlu0 %v108_v7  ;;  %v634_v7 = vld [vmem:[#allocation3 + $0x100] sm:$0xff] }
  0x21   :  { %126 = vadd.xlane.f32.xlu1 %v109_v6  ;;  %v635_v6 = vld [vmem:[#allocation3 + $0x108] sm:$0xff] }
  0x24   :  { %365 = vadd.xlane.f32.xlu0 %v4005_v9 }
  0x25   :  { %367 = vadd.xlane.f32.xlu1 %v4003_v8 }
  0x28   :  { %64 = vadd.xlane.f32.xlu0 %v4009_v11 }
  0x29   :  { %66 = vadd.xlane.f32.xlu1 %v4007_v10 }
  0x2c   :  { %429 = vadd.xlane.f32.xlu0 %v411_v13  ;;  %v987_v13 = vmul.f32 %v923_v5, %v923_v5 }
  0x2d   :  { %431 = vadd.xlane.f32.xlu1 %v412_v12  ;;  %v988_v12 = vmul.f32 %v924_v4, %v924_v4 }
  0x30   :  { %128 = vadd.xlane.f32.xlu0 %v110_v15  ;;  %v698_v15 = vmul.f32 %v634_v7, %v634_v7 }
  0x31   :  { %130 = vadd.xlane.f32.xlu1 %v111_v14  ;;  %v699_v14 = vmul.f32 %v635_v6, %v635_v6 }
  0x34   :  { %369 = vadd.xlane.f32.xlu0 %v4025_v17 }
  0x35   :  { %371 = vadd.xlane.f32.xlu1 %v4023_v16 }
  0x38   :  { %68 = vadd.xlane.f32.xlu0 %v4031_v19 }
  0x39   :  { %70 = vadd.xlane.f32.xlu1 %v4029_v18 }
  0x3c   :  { %433 = vadd.xlane.f32.xlu0 %v413_v21 }
  0x3d   :  { %435 = vadd.xlane.f32.xlu1 %v414_v20 }
  0x40   :  { %132 = vadd.xlane.f32.xlu0 %v112_v23  ;;  %v925_v23 = vld [vmem:[#allocation3 + $0x190] sm:$0xff] }
  0x41   :  { %134 = vadd.xlane.f32.xlu1 %v113_v22  ;;  %v926_v22 = vld [vmem:[#allocation3 + $0x198] sm:$0xff] }
  0x44   :  { %373 = vadd.xlane.f32.xlu0 %v4045_v25 }
  0x45   :  { %375 = vadd.xlane.f32.xlu1 %v4043_v24 }
  0x48   :  { %72 = vadd.xlane.f32.xlu0 %v4051_v27 }
  0x49   :  { %74 = vadd.xlane.f32.xlu1 %v4049_v26 }
  0x4c   :  { %437 = vadd.xlane.f32.xlu0 %v415_v29 }
  0x4d   :  { %439 = vadd.xlane.f32.xlu1 %v416_v28 }
  0x50   :  { %136 = vadd.xlane.f32.xlu0 %v114_v31 }
  0x51   :  { %138 = vadd.xlane.f32.xlu1 %v115_v30  ;;  %v637_v30 = vld [vmem:[#allocation3 + $0x118] sm:$0xff] }
  0x54   :  { %377 = vadd.xlane.f32.xlu0 %v4065_v33 }
  0x55   :  { %379 = vadd.xlane.f32.xlu1 %v4063_v32 }
  0x58   :  { %76 = vadd.xlane.f32.xlu0 %v4071_v35 }
  0x59   :  { %78 = vadd.xlane.f32.xlu1 %v4069_v34 }
  0x5c   :  { %441 = vadd.xlane.f32.xlu0 %v417_v37  ;;  %v636_v37 = vld [vmem:[#allocation3 + $0x110] sm:$0xff] }
  0x5d   :  { %443 = vadd.xlane.f32.xlu1 %v418_v36 }
  0x60   :  { %140 = vadd.xlane.f32.xlu0 %v116_v39 }
  0x61   :  { %142 = vadd.xlane.f32.xlu1 %v117_v38  ;;  %v990_v38 = vmul.f32 %v926_v22, %v926_v22 }
  0x64   :  { %381 = vadd.xlane.f32.xlu0 %v355_v41 }
  0x65   :  { %383 = vadd.xlane.f32.xlu1 %v356_v40 }
  0x68   :  { %80 = vadd.xlane.f32.xlu0 %v54_v43  ;;  %v989_v43 = vmul.f32 %v925_v23, %v925_v23 }
  0x69   :  { %82 = vadd.xlane.f32.xlu1 %v55_v42 }
  0x6c   :  { %445 = vadd.xlane.f32.xlu0 %v419_v45 }
  0x6d   :  { %447 = vadd.xlane.f32.xlu1 %v420_v44 }
  0x70   :  { %144 = vadd.xlane.f32.xlu0 %v118_v47 }
  0x71   :  { %146 = vadd.xlane.f32.xlu1 %v119_v46 }
  0x74   :  { %385 = vadd.xlane.f32.xlu0 %v357_v49 }
  0x75   :  { %387 = vadd.xlane.f32.xlu1 %v358_v48 }
  0x78   :  { %84 = vadd.xlane.f32.xlu0 %v56_v51 }
  0x79   :  { %86 = vadd.xlane.f32.xlu1 %v57_v50  ;;  %v701_v50 = vmul.f32 %v637_v30, %v637_v30 }
  0x7c   :  { %449 = vadd.xlane.f32.xlu0 %v421_v53 }
  0x7d   :  { %451 = vadd.xlane.f32.xlu1 %v422_v52 }
  0x80   :  { %148 = vadd.xlane.f32.xlu0 %v120_v55  ;;  %v700_v55 = vmul.f32 %v636_v37, %v636_v37 }
  0x81   :  { %150 = vadd.xlane.f32.xlu1 %v121_v54 }
  0x84   :  { %389 = vadd.xlane.f32.xlu0 %v359_v57 }
  0x85   :  { %391 = vadd.xlane.f32.xlu1 %v360_v56 }
  0x88   :  { %88 = vadd.xlane.f32.xlu0 %v58_v59 }
  0x89   :  { %90 = vadd.xlane.f32.xlu1 %v59_v58 }
  0x8c   :  { %453 = vadd.xlane.f32.xlu0 %v423_v61 }
  0x8d   :  { %455 = vadd.xlane.f32.xlu1 %v424_v60 }
  0x90   :  { %152 = vadd.xlane.f32.xlu0 %v122_v63 }
  0x91   :  { %154 = vadd.xlane.f32.xlu1 %v123_v62 }
  0x94   :  { %939 = vadd.xlane.f32.xlu0 %v923_v5 }
  0x95   :  { %941 = vadd.xlane.f32.xlu1 %v924_v4 }
  0x98   :  { %650 = vadd.xlane.f32.xlu0 %v634_v7 }
  0x99   :  { %652 = vadd.xlane.f32.xlu1 %v635_v6  ;;  %v928_v6 = vld [vmem:[#allocation3 + $0x1a8] sm:$0xff] }
  0x9c   :  { %1003 = vadd.xlane.f32.xlu0 %v987_v13  ;;  %v927_v13 = vld [vmem:[#allocation3 + $0x1a0] sm:$0xff] }
  0x9d   :  { %1005 = vadd.xlane.f32.xlu1 %v988_v12 }
  0xa0   :  { %714 = vadd.xlane.f32.xlu0 %v698_v15 }
  0xa1   :  { %716 = vadd.xlane.f32.xlu1 %v699_v14  ;;  %v362_v20 = vpop.xlane.xlu0 %361 }
  0xa2   :  { %v61_v21 = vpop.xlane.xlu1 %60  ;;  %v4083_v31 = vmul.f32 0.0078125, %v362_v20 }
  0xa3   :  { %v4087_v39 = vmul.f32 0.0078125, %v61_v21 }
  0xa4   :  { %943 = vadd.xlane.f32.xlu0 %v925_v23  ;;  %v473_v44 = vmul.f32 %v4083_v31, %v4083_v31 }
  0xa5   :  { %945 = vadd.xlane.f32.xlu1 %v926_v22  ;;  %v364_v28 = vpop.xlane.xlu0 %363  ;;  %v172_v51 = vmul.f32 %v4087_v39, %v4087_v39  ;;  %v639_v22 = vld [vmem:[#allocation3 + $0x128] sm:$0xff] }
  0xa6   :  { %v63_v29 = vpop.xlane.xlu1 %62  ;;  %v4085_v36 = vmul.f32 0.0078125, %v364_v28 }
  0xa7   :  { %v4089_v40 = vmul.f32 0.0078125, %v63_v29  ;;  %v638_v29 = vld [vmem:[#allocation3 + $0x120] sm:$0xff] }
  0xa8   :  { %654 = vadd.xlane.f32.xlu0 %v636_v37  ;;  %v474_v45 = vmul.f32 %v4085_v36, %v4085_v36 }
  0xa9   :  { %656 = vadd.xlane.f32.xlu1 %v637_v30  ;;  %v426_v41 = vpop.xlane.xlu0 %425  ;;  %v173_v52 = vmul.f32 %v4089_v40, %v4089_v40  ;;  %v992_v30 = vmul.f32 %v928_v6, %v928_v6 }
  0xaa   :  { %v428_v42 = vpop.xlane.xlu1 %427  ;;  %v457_v46 = vmul.f32 0.0078125, %v426_v41 }
  0xab   :  { %v458_v47 = vmul.f32 0.0078125, %v428_v42 }
  0xac   :  { %v489_v48 = vsub.f32 %v457_v46, %v473_v44  ;;  %1007 = vadd.xlane.f32.xlu0 %v989_v43  ;;  %v991_v43 = vmul.f32 %v927_v13, %v927_v13 }
  0xad   :  { %v490_v49 = vsub.f32 %v458_v47, %v474_v45  ;;  %1009 = vadd.xlane.f32.xlu1 %v990_v38  ;;  %v125_v54 = vpop.xlane.xlu0 %124 }
  0xae   :  { %v127_v53 = vpop.xlane.xlu1 %126  ;;  %v505_v56 = vmax.f32 %v489_v48, 0.0  ;;  %v156_v59 = vmul.f32 0.0078125, %v125_v54  ;;  %v553_v48 = vsub.f32 %v3983_v0, %v4083_v31  ;;  %v4116_v54 = vld [vmem:[%s5505_s1] ss:$0 sm:$0xff] }
  0xaf   :  { %v506_v57 = vmax.f32 %v490_v49, 0.0  ;;  %v157_v58 = vmul.f32 0.0078125, %v127_v53  ;;  %v702_v53 = vmul.f32 %v638_v29, %v638_v29 }
  0xb0   :  { %v521_v60 = vadd.f32 1e-05, %v505_v56  ;;  %v188_v63 = vsub.f32 %v156_v59, %v172_v51  ;;  %718 = vadd.xlane.f32.xlu0 %v700_v55  ;;  %v554_v56 = vsub.f32 %v3989_v2, %v4085_v36  ;;  %v253_v2 = vsub.f32 %v3991_v3, %v4089_v40  ;;  %v930_v3 = vld [vmem:[#allocation3 + $0x1b8] sm:$0xff] }
  0xb1   :  { %v522_v61 = vadd.f32 1e-05, %v506_v57  ;;  %v189_v62 = vsub.f32 %v157_v58, %v173_v52  ;;  %720 = vadd.xlane.f32.xlu1 %v701_v50  ;;  %v366_v5 = vpop.xlane.xlu0 %365  ;;  %v703_v52 = vmul.f32 %v639_v22, %v639_v22 }
  0xb2   :  { %v368_v4 = vpop.xlane.xlu1 %367  ;;  %3640 = vrsqrt.f32 %v521_v60  ;;  %v204_v12 = vmax.f32 %v188_v63, 0.0  ;;  %v4101_v28 = vmul.f32 0.0078125, %v366_v5 }
  0xb3   :  { %v205_v7 = vmax.f32 %v189_v62, 0.0  ;;  %3642 = vrsqrt.f32 %v522_v61  ;;  %v4099_v23 = vmul.f32 0.0078125, %v368_v4  ;;  %v4127_v4 = vld [vmem:[%s5506_s2] ss:$0 sm:$0xff] }
  0xb4   :  { %v220_v15 = vadd.f32 1e-05, %v204_v12  ;;  %947 = vadd.xlane.f32.xlu0 %v927_v13  ;;  %v475_v45 = vmul.f32 %v4101_v28, %v4101_v28 }
  0xb5   :  { %v221_v14 = vadd.f32 1e-05, %v205_v7  ;;  %949 = vadd.xlane.f32.xlu1 %v928_v6  ;;  %v65_v21 = vpop.xlane.xlu0 %64  ;;  %v476_v44 = vmul.f32 %v4099_v23, %v4099_v23 }
  0xb6   :  { %v67_v20 = vpop.xlane.xlu1 %66  ;;  %v4105_v38 = vmul.f32 0.0078125, %v65_v21  ;;  %v252_v21 = vsub.f32 %v3985_v1, %v4087_v39 }
  0xb7   :  { %3644 = vrsqrt.f32 %v221_v14  ;;  %v4103_v37 = vmul.f32 0.0078125, %v67_v20 }
  0xb8   :  { %3646 = vrsqrt.f32 %v220_v15  ;;  %658 = vadd.xlane.f32.xlu0 %v638_v29  ;;  %v174_v0 = vmul.f32 %v4105_v38, %v4105_v38  ;;  %v3926_v15 = vmov 0  }
  0xb9   :  { %660 = vadd.xlane.f32.xlu1 %v639_v22  ;;  %v430_v42 = vpop.xlane.xlu0 %429  ;;  %v175_v57 = vmul.f32 %v4103_v37, %v4103_v37  ;;  %1892 = vmatprep.mubr.bf16.mxu0 %v3926_v15 }
  0xba   :  { %v432_v41 = vpop.xlane.xlu1 %431  ;;  %v459_v47 = vmul.f32 0.0078125, %v430_v42  ;;  %3599 = vset.pattern.permute.xlu1 %v3926_v15  ;;  %2085 = vmatprep.mubr.bf16.mxu1 %v3926_v15 }
  0xbb   :  { %v460_v46 = vmul.f32 0.0078125, %v432_v41  ;;  %3598 = vset.pattern.permute.xlu0 %v3926_v15 }
  0xbc   :  { %v3641_v49 = vpop.eup %3640  ;;  %v491_v51 = vsub.f32 %v459_v47, %v475_v45  ;;  %1011 = vadd.xlane.f32.xlu0 %v991_v43  ;;  %v929_v43 = vld [vmem:[#allocation3 + $0x1b0] sm:$0xff] }
  0xbd   :  { %v492_v50 = vsub.f32 %v460_v46, %v476_v44  ;;  %1013 = vadd.xlane.f32.xlu1 %v992_v30  ;;  %v3643_v55 = vpop.eup %3642  ;;  %v129_v58 = vpop.xlane.xlu0 %128  ;;  %v569_v59 = vmul.f32 %v3641_v49, %v553_v48 }
  0xbe   :  { %v131_v31 = vpop.xlane.xlu1 %130  ;;  %v507_v61 = vmax.f32 %v491_v51, 0.0  ;;  %v158_v63 = vmul.f32 0.0078125, %v129_v58  ;;  %v570_v36 = vmul.f32 %v3643_v55, %v554_v56  ;;  %v640_v55 = vld [vmem:[#allocation3 + $0x130] sm:$0xff] }
  0xbf   :  { %v508_v60 = vmax.f32 %v492_v50, 0.0  ;;  %v159_v62 = vmul.f32 0.0078125, %v131_v31  ;;  %v585_v5 = vmul.f32 %v4116_v54, %v569_v59  ;;  %v641_v50 = vld [vmem:[#allocation3 + $0x138] sm:$0xff] }
  0xc0   :  { %v523_v12 = vadd.f32 1e-05, %v507_v61  ;;  %v190_v14 = vsub.f32 %v158_v63, %v174_v0  ;;  %722 = vadd.xlane.f32.xlu0 %v702_v53  ;;  %v586_v40 = vmul.f32 %v4116_v54, %v570_v36  ;;  %v994_v0 = vmul.f32 %v930_v3, %v930_v3 }
  0xc1   :  { %v3645_v6 = vpop.eup %3644  ;;  %v524_v7 = vadd.f32 1e-05, %v508_v60  ;;  %v191_v13 = vsub.f32 %v159_v62, %v175_v57  ;;  %724 = vadd.xlane.f32.xlu1 %v703_v52  ;;  %v370_v29 = vpop.xlane.xlu0 %369  ;;  %v601_v30 = vadd.f32 %v4127_v4, %v585_v5  ;;  %v993_v62 = vmul.f32 %v929_v43, %v929_v43 }
  0xc2   :  { %v3647_v20 = vpop.eup %3646  ;;  %v372_v22 = vpop.xlane.xlu1 %371  ;;  %v206_v42 = vmax.f32 %v190_v14, 0.0  ;;  %v269_v44 = vmul.f32 %v3645_v6, %v253_v2  ;;  %v602_v1 = vadd.f32 %v4127_v4, %v586_v40  ;;  %v4144_v53 = vmul.f32 0.0078125, %v370_v29 }
  0xc3   :  { %3648 = vrsqrt.f32 %v524_v7  ;;  %v207_v41 = vmax.f32 %v191_v13, 0.0  ;;  %v268_v39 = vmul.f32 %v3647_v20, %v252_v21  ;;  %v4142_v52 = vmul.f32 0.0078125, %v372_v22 }
  0xc4   :  { %3650 = vrsqrt.f32 %v523_v12  ;;  %v222_v46 = vadd.f32 1e-05, %v206_v42  ;;  %951 = vadd.xlane.f32.xlu0 %v929_v43  ;;  %v617_v49 = vpack.c.bf16 %v602_v1, %v601_v30  ;;  %v291_v56 = vmul.f32 %v4116_v54, %v269_v44 }
  0xc5   :  { %v223_v45 = vadd.f32 1e-05, %v207_v41  ;;  %953 = vadd.xlane.f32.xlu1 %v930_v3  ;;  %v69_v48 = vpop.xlane.xlu0 %68  ;;  %v290_v51 = vmul.f32 %v4116_v54, %v268_v39  ;;  %v478_v63 = vmul.f32 %v4142_v52, %v4142_v52  ;;  %v477_v2 = vmul.f32 %v4144_v53, %v4144_v53 }
  0xc6   :  { %v71_v47 = vpop.xlane.xlu1 %70  ;;  %1860 = vmatprep.subr.bf16.mxu0 %v617_v49  ;;  %v4150_v58 = vmul.f32 0.0078125, %v69_v48  ;;  %v313_v61 = vadd.f32 %v4127_v4, %v291_v56  ;;  %v556_v6 = vsub.f32 %v4003_v8, %v4099_v23  ;;  %v705_v12 = vmul.f32 %v641_v50, %v641_v50  ;;  %v932_v56 = vld [vmem:[#allocation3 + $0x1c8] sm:$0xff] }
  0xc7   :  { %3652 = vrsqrt.f32 %v223_v45  ;;  %v312_v57 = vadd.f32 %v4127_v4, %v290_v51  ;;  %v4148_v31 = vmul.f32 0.0078125, %v71_v47  ;;  %v555_v14 = vsub.f32 %v4005_v9, %v4101_v28 }
  0xc8   :  { %3654 = vrsqrt.f32 %v222_v46  ;;  %662 = vadd.xlane.f32.xlu0 %v640_v55  ;;  %v704_v22 = vmul.f32 %v640_v55, %v640_v55  ;;  %v176_v40 = vmul.f32 %v4150_v58, %v4150_v58  ;;  %v255_v28 = vsub.f32 %v4007_v10, %v4103_v37 }
  0xc9   :  { %664 = vadd.xlane.f32.xlu1 %v641_v50  ;;  %v434_v60 = vpop.xlane.xlu0 %433  ;;  %v328_v7 = vpack.c.bf16 %v313_v61, %v312_v57  ;;  %v177_v3 = vmul.f32 %v4148_v31, %v4148_v31  ;;  %v254_v50 = vsub.f32 %v4009_v11, %v4105_v38 }
  0xca   :  { %v436_v59 = vpop.xlane.xlu1 %435  ;;  %v461_v5 = vmul.f32 0.0078125, %v434_v60 }
  0xcb   :  { %v462_v36 = vmul.f32 0.0078125, %v436_v59  ;;  %1861 = vmatpush1.bf16.msra.mxu0 %v328_v7  ;;  %v931_v59 = vld [vmem:[#allocation3 + $0x1c0] sm:$0xff] }
  0xcc   :  { %v493_v21 = vsub.f32 %v461_v5, %v477_v2  ;;  %1015 = vadd.xlane.f32.xlu0 %v993_v62  ;;  %v643_v5 = vld [vmem:[#allocation3 + $0x148] sm:$0xff] }
  0xcd   :  { %v3649_v13 = vpop.eup %3648  ;;  %v494_v20 = vsub.f32 %v462_v36, %v478_v63  ;;  %1017 = vadd.xlane.f32.xlu1 %v994_v0  ;;  %v133_v23 = vpop.xlane.xlu0 %132 }
  0xce   :  { %v3651_v29 = vpop.eup %3650  ;;  %v135_v8 = vpop.xlane.xlu1 %134  ;;  %v572_v30 = vmul.f32 %v3649_v13, %v556_v6  ;;  %v509_v42 = vmax.f32 %v493_v21, 0.0  ;;  %v160_v9 = vmul.f32 0.0078125, %v133_v23  ;;  %v642_v13 = vld [vmem:[#allocation3 + $0x140] sm:$0xff]  ;;  %v996_v21 = vmul.f32 %v932_v56, %v932_v56 }
  0xcf   :  { %v510_v41 = vmax.f32 %v494_v20, 0.0  ;;  %v161_v43 = vmul.f32 0.0078125, %v135_v8  ;;  %v571_v44 = vmul.f32 %v3651_v29, %v555_v14  ;;  %v995_v23 = vmul.f32 %v931_v59, %v931_v59 }
  0xd0   :  { %v588_v1 = vmul.f32 %v4116_v54, %v572_v30  ;;  %v525_v46 = vadd.f32 1e-05, %v509_v42  ;;  %v192_v48 = vsub.f32 %v160_v9, %v176_v40  ;;  %726 = vadd.xlane.f32.xlu0 %v704_v22  ;;  %v558_v9 = vsub.f32 %v4023_v16, %v4142_v52 }
  0xd1   :  { %v3653_v39 = vpop.eup %3652  ;;  %v526_v45 = vadd.f32 1e-05, %v510_v41  ;;  %v193_v47 = vsub.f32 %v161_v43, %v177_v3  ;;  %728 = vadd.xlane.f32.xlu1 %v705_v12  ;;  %v374_v55 = vpop.xlane.xlu0 %373  ;;  %v587_v57 = vmul.f32 %v4116_v54, %v571_v44  ;;  %v707_v44 = vmul.f32 %v643_v5, %v643_v5 }
  0xd2   :  { %v3655_v49 = vpop.eup %3654  ;;  %v376_v51 = vpop.xlane.xlu1 %375  ;;  %v604_v10 = vadd.f32 %v4127_v4, %v588_v1  ;;  %v208_v0 = vmax.f32 %v192_v48, 0.0  ;;  %v271_v60 = vmul.f32 %v3653_v39, %v255_v28  ;;  %v4176_v12 = vmul.f32 0.0078125, %v374_v55 }
  0xd3   :  { %3656 = vrsqrt.f32 %v526_v45  ;;  %v209_v37 = vmax.f32 %v193_v47, 0.0  ;;  %v603_v61 = vadd.f32 %v4127_v4, %v587_v57  ;;  %v270_v62 = vmul.f32 %v3655_v49, %v254_v50 }
  0xd4   :  { %3658 = vrsqrt.f32 %v525_v46  ;;  %v224_v2 = vadd.f32 1e-05, %v208_v0  ;;  %955 = vadd.xlane.f32.xlu0 %v931_v59  ;;  %v4174_v7 = vmul.f32 0.0078125, %v376_v51  ;;  %v293_v14 = vmul.f32 %v4116_v54, %v271_v60 }
  0xd5   :  { %v225_v63 = vadd.f32 1e-05, %v209_v37  ;;  %957 = vadd.xlane.f32.xlu1 %v932_v56  ;;  %v73_v38 = vpop.xlane.xlu0 %72  ;;  %v618_v36 = vpack.c.bf16 %v604_v10, %v603_v61  ;;  %v292_v6 = vmul.f32 %v4116_v54, %v270_v62  ;;  %v479_v41 = vmul.f32 %v4176_v12, %v4176_v12 }
  0xd6   :  { %v75_v11 = vpop.xlane.xlu1 %74  ;;  %v4182_v29 = vmul.f32 0.0078125, %v73_v38  ;;  %v315_v8 = vadd.f32 %v4127_v4, %v293_v14  ;;  %v480_v30 = vmul.f32 %v4174_v7, %v4174_v7  ;;  %v557_v39 = vsub.f32 %v4025_v17, %v4144_v53 }
  0xd7   :  { %3660 = vrsqrt.f32 %v225_v63  ;;  %1862 = vmatprep.subr.bf16.mxu0 %v618_v36  ;;  %v314_v20 = vadd.f32 %v4127_v4, %v292_v6  ;;  %v4180_v22 = vmul.f32 0.0078125, %v75_v11  ;;  %v706_v47 = vmul.f32 %v642_v13, %v642_v13  ;;  %v934_v36 = vld [vmem:[#allocation3 + $0x1d8] sm:$0xff] }
  0xd8   :  { %3662 = vrsqrt.f32 %v224_v2  ;;  %666 = vadd.xlane.f32.xlu0 %v642_v13  ;;  %v178_v50 = vmul.f32 %v4182_v29, %v4182_v29  ;;  %v257_v53 = vsub.f32 %v4029_v18, %v4148_v31  ;;  %v256_v2 = vsub.f32 %v4031_v19, %v4150_v58  ;;  %v933_v13 = vld [vmem:[#allocation3 + $0x1d0] sm:$0xff] }
  0xd9   :  { %668 = vadd.xlane.f32.xlu1 %v643_v5  ;;  %v438_v40 = vpop.xlane.xlu0 %437  ;;  %v329_v28 = vpack.c.bf16 %v315_v8, %v314_v20  ;;  %v179_v49 = vmul.f32 %v4180_v22, %v4180_v22 }
  0xda   :  { %v440_v3 = vpop.xlane.xlu1 %439  ;;  %v463_v43 = vmul.f32 0.0078125, %v438_v40 }
  0xdb   :  { %v464_v42 = vmul.f32 0.0078125, %v440_v3  ;;  %1863 = vmatpush1.bf16.msra.mxu0 %v329_v28 }
  0xdc   :  { %v495_v46 = vsub.f32 %v463_v43, %v479_v41  ;;  %1019 = vadd.xlane.f32.xlu0 %v995_v23  ;;  %v645_v23 = vld [vmem:[#allocation3 + $0x158] sm:$0xff]  ;;  %v644_v43 = vld [vmem:[#allocation3 + $0x150] sm:$0xff] }
  0xdd   :  { %v3657_v1 = vpop.eup %3656  ;;  %v496_v45 = vsub.f32 %v464_v42, %v480_v30  ;;  %1021 = vadd.xlane.f32.xlu1 %v996_v21  ;;  %v137_v52 = vpop.xlane.xlu0 %136 }
  0xde   :  { %v3659_v48 = vpop.eup %3658  ;;  %v139_v16 = vpop.xlane.xlu1 %138  ;;  %v574_v51 = vmul.f32 %v3657_v1, %v558_v9  ;;  %v511_v56 = vmax.f32 %v495_v46, 0.0  ;;  %v162_v17 = vmul.f32 0.0078125, %v137_v52 }
  0xdf   :  { %v512_v55 = vmax.f32 %v496_v45, 0.0  ;;  %v163_v57 = vmul.f32 0.0078125, %v139_v16  ;;  %v573_v10 = vmul.f32 %v3659_v48, %v557_v39  ;;  %v997_v48 = vmul.f32 %v933_v13, %v933_v13 }
  0xe0   :  { %v590_v37 = vmul.f32 %v4116_v54, %v574_v51  ;;  %v527_v60 = vadd.f32 1e-05, %v511_v56  ;;  %v194_v62 = vsub.f32 %v162_v17, %v178_v50  ;;  %730 = vadd.xlane.f32.xlu0 %v706_v47  ;;  %v560_v51 = vsub.f32 %v4043_v24, %v4174_v7 }
  0xe1   :  { %v3661_v0 = vpop.eup %3660  ;;  %v528_v59 = vadd.f32 1e-05, %v512_v55  ;;  %v195_v61 = vsub.f32 %v163_v57, %v179_v49  ;;  %732 = vadd.xlane.f32.xlu1 %v707_v44  ;;  %v378_v38 = vpop.xlane.xlu0 %377  ;;  %v589_v5 = vmul.f32 %v4116_v54, %v573_v10  ;;  %v998_v44 = vmul.f32 %v934_v36, %v934_v36 }
  0xe2   :  { %v3663_v63 = vpop.eup %3662  ;;  %v380_v11 = vpop.xlane.xlu1 %379  ;;  %v606_v18 = vadd.f32 %v4127_v4, %v590_v37  ;;  %v210_v6 = vmax.f32 %v194_v62, 0.0  ;;  %v273_v14 = vmul.f32 %v3661_v0, %v257_v53  ;;  %v4208_v42 = vmul.f32 0.0078125, %v378_v38 }
  0xe3   :  { %3664 = vrsqrt.f32 %v528_v59  ;;  %v211_v31 = vmax.f32 %v195_v61, 0.0  ;;  %v605_v20 = vadd.f32 %v4127_v4, %v589_v5  ;;  %v272_v21 = vmul.f32 %v3663_v63, %v256_v2 }
  0xe4   :  { %3666 = vrsqrt.f32 %v527_v60  ;;  %v226_v40 = vadd.f32 1e-05, %v210_v6  ;;  %959 = vadd.xlane.f32.xlu0 %v933_v13  ;;  %v4206_v41 = vmul.f32 0.0078125, %v380_v11  ;;  %v295_v9 = vmul.f32 %v4116_v54, %v273_v14 }
  0xe5   :  { %v227_v3 = vadd.f32 1e-05, %v211_v31  ;;  %961 = vadd.xlane.f32.xlu1 %v934_v36  ;;  %v77_v58 = vpop.xlane.xlu0 %76  ;;  %v619_v8 = vpack.c.bf16 %v606_v18, %v605_v20  ;;  %v294_v30 = vmul.f32 %v4116_v54, %v272_v21  ;;  %v481_v50 = vmul.f32 %v4208_v42, %v4208_v42 }
  0xe6   :  { %v79_v19 = vpop.xlane.xlu1 %78  ;;  %v4214_v39 = vmul.f32 0.0078125, %v77_v58  ;;  %v317_v47 = vadd.f32 %v4127_v4, %v295_v9  ;;  %v482_v49 = vmul.f32 %v4206_v41, %v4206_v41  ;;  %v709_v56 = vmul.f32 %v645_v23, %v645_v23  ;;  %v935_v58 = vld [vmem:[#allocation3 + $0x1e0] sm:$0xff] }
  0xe7   :  { %3668 = vrsqrt.f32 %v227_v3  ;;  %1864 = vmatprep.subr.bf16.mxu0 %v619_v8  ;;  %v316_v28 = vadd.f32 %v4127_v4, %v294_v30  ;;  %v4212_v1 = vmul.f32 0.0078125, %v79_v19  ;;  %v559_v17 = vsub.f32 %v4045_v25, %v4176_v12  ;;  %v936_v3 = vld [vmem:[#allocation3 + $0x1e8] sm:$0xff] }
  0xe8   :  { %3670 = vrsqrt.f32 %v226_v40  ;;  %670 = vadd.xlane.f32.xlu0 %v644_v43  ;;  %v708_v37 = vmul.f32 %v644_v43, %v644_v43  ;;  %v180_v60 = vmul.f32 %v4214_v39, %v4214_v39  ;;  %v259_v12 = vsub.f32 %v4049_v26, %v4180_v22 }
  0xe9   :  { %672 = vadd.xlane.f32.xlu1 %v645_v23  ;;  %v442_v46 = vpop.xlane.xlu0 %441  ;;  %v330_v55 = vpack.c.bf16 %v317_v47, %v316_v28  ;;  %v181_v59 = vmul.f32 %v4212_v1, %v4212_v1  ;;  %v258_v14 = vsub.f32 %v4051_v27, %v4182_v29 }
  0xea   :  { %v444_v45 = vpop.xlane.xlu1 %443  ;;  %v465_v52 = vmul.f32 0.0078125, %v442_v46 }
  0xeb   :  { %v466_v16 = vmul.f32 0.0078125, %v444_v45  ;;  %1865 = vmatpush1.bf16.msra.mxu0 %v330_v55 }
  0xec   :  { %v497_v10 = vsub.f32 %v465_v52, %v481_v50  ;;  %1023 = vadd.xlane.f32.xlu0 %v997_v48  ;;  %v646_v48 = vld [vmem:[#allocation3 + $0x160] sm:$0xff] }
  0xed   :  { %v3665_v57 = vpop.eup %3664  ;;  %v498_v53 = vsub.f32 %v466_v16, %v482_v49  ;;  %1025 = vadd.xlane.f32.xlu1 %v998_v44  ;;  %v141_v7 = vpop.xlane.xlu0 %140  ;;  %v647_v44 = vld [vmem:[#allocation3 + $0x168] sm:$0xff]  ;;  %v1000_v16 = vmul.f32 %v936_v3, %v936_v3 }
  0xee   :  { %v3667_v0 = vpop.eup %3666  ;;  %v143_v24 = vpop.xlane.xlu1 %142  ;;  %v576_v61 = vmul.f32 %v3665_v57, %v560_v51  ;;  %v513_v63 = vmax.f32 %v497_v10, 0.0  ;;  %v164_v25 = vmul.f32 0.0078125, %v141_v7 }
  0xef   :  { %v514_v62 = vmax.f32 %v498_v53, 0.0  ;;  %v165_v2 = vmul.f32 0.0078125, %v143_v24  ;;  %v575_v11 = vmul.f32 %v3667_v0, %v559_v17  ;;  %v999_v17 = vmul.f32 %v935_v58, %v935_v58 }
  0xf0   :  { %v592_v38 = vmul.f32 %v4116_v54, %v576_v61  ;;  %v529_v18 = vadd.f32 1e-05, %v513_v63  ;;  %v196_v6 = vsub.f32 %v164_v25, %v180_v60  ;;  %734 = vadd.xlane.f32.xlu0 %v708_v37  ;;  %v711_v24 = vmul.f32 %v647_v44, %v647_v44 }
  0xf1   :  { %v3669_v36 = vpop.eup %3668  ;;  %v530_v5 = vadd.f32 1e-05, %v514_v62  ;;  %v197_v31 = vsub.f32 %v165_v2, %v181_v59  ;;  %736 = vadd.xlane.f32.xlu1 %v709_v56  ;;  %v382_v21 = vpop.xlane.xlu0 %381  ;;  %v591_v40 = vmul.f32 %v4116_v54, %v575_v11  ;;  %v562_v59 = vsub.f32 %v4063_v32, %v4206_v41 }
  0xf2   :  { %v3671_v13 = vpop.eup %3670  ;;  %v384_v20 = vpop.xlane.xlu1 %383  ;;  %v608_v26 = vadd.f32 %v4127_v4, %v592_v38  ;;  %v212_v19 = vmax.f32 %v196_v6, 0.0  ;;  %v275_v8 = vmul.f32 %v3669_v36, %v259_v12  ;;  %v4240_v47 = vmul.f32 0.0078125, %v382_v21 }
  0xf3   :  { %3672 = vrsqrt.f32 %v530_v5  ;;  %v213_v22 = vmax.f32 %v197_v31, 0.0  ;;  %v607_v23 = vadd.f32 %v4127_v4, %v591_v40  ;;  %v274_v30 = vmul.f32 %v3671_v13, %v258_v14 }
  0xf4   :  { %3674 = vrsqrt.f32 %v529_v18  ;;  %v228_v9 = vadd.f32 1e-05, %v212_v19  ;;  %963 = vadd.xlane.f32.xlu0 %v935_v58  ;;  %v4238_v46 = vmul.f32 0.0078125, %v384_v20  ;;  %v297_v49 = vmul.f32 %v4116_v54, %v275_v8  ;;  %v938_v58 = vld [vmem:[#allocation3 + $0x1f8] sm:$0xff] }
  0xf5   :  { %v229_v43 = vadd.f32 1e-05, %v213_v22  ;;  %965 = vadd.xlane.f32.xlu1 %v936_v3  ;;  %v81_v29 = vpop.xlane.xlu0 %80  ;;  %v620_v28 = vpack.c.bf16 %v608_v26, %v607_v23  ;;  %v296_v45 = vmul.f32 %v4116_v54, %v274_v30  ;;  %v483_v10 = vmul.f32 %v4240_v47, %v4240_v47  ;;  %v937_v30 = vld [vmem:[#allocation3 + $0x1f0] sm:$0xff] }
  0xf6   :  { %v83_v27 = vpop.xlane.xlu1 %82  ;;  %v4246_v51 = vmul.f32 0.0078125, %v81_v29  ;;  %v319_v57 = vadd.f32 %v4127_v4, %v297_v49  ;;  %v484_v53 = vmul.f32 %v4238_v46, %v4238_v46  ;;  %v561_v61 = vsub.f32 %v4065_v33, %v4208_v42 }
  0xf7   :  { %3676 = vrsqrt.f32 %v229_v43  ;;  %1866 = vmatprep.subr.bf16.mxu0 %v620_v28  ;;  %v318_v50 = vadd.f32 %v4127_v4, %v296_v45  ;;  %v4244_v52 = vmul.f32 0.0078125, %v83_v27  ;;  %v710_v2 = vmul.f32 %v646_v48, %v646_v48  ;;  %v649_v45 = vld [vmem:[#allocation3 + $0x178] sm:$0xff] }
  0xf8   :  { %3678 = vrsqrt.f32 %v228_v9  ;;  %674 = vadd.xlane.f32.xlu0 %v646_v48  ;;  %v182_v11 = vmul.f32 %v4246_v51, %v4246_v51  ;;  %v261_v42 = vsub.f32 %v4069_v34, %v4212_v1  ;;  %v260_v26 = vsub.f32 %v4071_v35, %v4214_v39 }
  0xf9   :  { %676 = vadd.xlane.f32.xlu1 %v647_v44  ;;  %v446_v56 = vpop.xlane.xlu0 %445  ;;  %v331_v60 = vpack.c.bf16 %v319_v57, %v318_v50  ;;  %v183_v12 = vmul.f32 %v4244_v52, %v4244_v52  ;;  %v1002_v57 = vmul.f32 %v938_v58, %v938_v58 }
  0xfa   :  { %v448_v55 = vpop.xlane.xlu1 %447  ;;  %v467_v0 = vmul.f32 0.0078125, %v446_v56 }
  0xfb   :  { %v468_v37 = vmul.f32 0.0078125, %v448_v55  ;;  %1867 = vmatpush1.bf16.msra.mxu0 %v331_v60 }
  0xfc   :  { %v499_v63 = vsub.f32 %v467_v0, %v483_v10  ;;  %1027 = vadd.xlane.f32.xlu0 %v999_v17 }
  0xfd   :  { %v3673_v7 = vpop.eup %3672  ;;  %v500_v62 = vsub.f32 %v468_v37, %v484_v53  ;;  %1029 = vadd.xlane.f32.xlu1 %v1000_v16  ;;  %v145_v41 = vpop.xlane.xlu0 %144  ;;  %v648_v16 = vld [vmem:[#allocation3 + $0x170] sm:$0xff] }
  0xfe   :  { %v3675_v25 = vpop.eup %3674  ;;  %v147_v32 = vpop.xlane.xlu1 %146  ;;  %v578_v38 = vmul.f32 %v3673_v7, %v562_v59  ;;  %v515_v5 = vmax.f32 %v499_v63, 0.0  ;;  %v166_v33 = vmul.f32 0.0078125, %v145_v41  ;;  %v1001_v59 = vmul.f32 %v937_v30, %v937_v30 }
  0xff   :  { %v516_v36 = vmax.f32 %v500_v62, 0.0  ;;  %v167_v18 = vmul.f32 0.0078125, %v147_v32  ;;  %v577_v31 = vmul.f32 %v3675_v25, %v561_v61  ;;  %v3800_v62 = vld [vmem:[#allocation3 + $0xd8] sm:$0xff]  ;;  %v713_v25 = vmul.f32 %v649_v45, %v649_v45 }
 0x100   :  { %v594_v6 = vmul.f32 %v4116_v54, %v578_v38  ;;  %v531_v20 = vadd.f32 1e-05, %v515_v5  ;;  %v198_v3 = vsub.f32 %v166_v33, %v182_v11  ;;  %738 = vadd.xlane.f32.xlu0 %v710_v2  ;;  %v564_v63 = vsub.f32 %v3800_v62, %v4238_v46  ;;  %v3801_v11 = vld [vmem:[#allocation3 + $0xd0] sm:$0xff] }
 0x101   :  { %v3677_v13 = vpop.eup %3676  ;;  %v532_v14 = vadd.f32 1e-05, %v516_v36  ;;  %v199_v21 = vsub.f32 %v167_v18, %v183_v12  ;;  %740 = vadd.xlane.f32.xlu1 %v711_v24  ;;  %v386_v19 = vpop.xlane.xlu0 %385  ;;  %v593_v8 = vmul.f32 %v4116_v54, %v577_v31  ;;  %v563_v32 = vsub.f32 %v3801_v11, %v4240_v47 }
 0x102   :  { %v3679_v40 = vpop.eup %3678  ;;  %v388_v22 = vpop.xlane.xlu1 %387  ;;  %v610_v34 = vadd.f32 %v4127_v4, %v594_v6  ;;  %v214_v23 = vmax.f32 %v198_v3, 0.0  ;;  %v277_v43 = vmul.f32 %v3677_v13, %v261_v42  ;;  %v4272_v50 = vmul.f32 0.0078125, %v386_v19 }
 0x103   :  { %3680 = vrsqrt.f32 %v532_v14  ;;  %v215_v1 = vmax.f32 %v199_v21, 0.0  ;;  %v609_v9 = vadd.f32 %v4127_v4, %v593_v8  ;;  %v276_v27 = vmul.f32 %v3679_v40, %v260_v26 }
 0x104   :  { %3682 = vrsqrt.f32 %v531_v20  ;;  %v230_v28 = vadd.f32 1e-05, %v214_v23  ;;  %967 = vadd.xlane.f32.xlu0 %v937_v30  ;;  %v4270_v49 = vmul.f32 0.0078125, %v388_v22  ;;  %v299_v55 = vmul.f32 %v4116_v54, %v277_v43  ;;  %v3802_v20 = vld [vmem:[#allocation3 + $0x58] sm:$0xff] }
 0x105   :  { %v231_v29 = vadd.f32 1e-05, %v215_v1  ;;  %969 = vadd.xlane.f32.xlu1 %v938_v58  ;;  %v85_v39 = vpop.xlane.xlu0 %84  ;;  %v621_v44 = vpack.c.bf16 %v610_v34, %v609_v9  ;;  %v298_v48 = vmul.f32 %v4116_v54, %v276_v27  ;;  %v485_v24 = vmul.f32 %v4272_v50, %v4272_v50  ;;  %v3803_v1 = vld [vmem:[#allocation3 + $0x50] sm:$0xff]  ;;  %v1213_v9 = vld [vmem:[#allocation3 + $0x208] sm:$0xff] }
 0x106   :  { %v87_v35 = vpop.xlane.xlu1 %86  ;;  %v4278_v53 = vmul.f32 0.0078125, %v85_v39  ;;  %v321_v0 = vadd.f32 %v4127_v4, %v299_v55  ;;  %v486_v60 = vmul.f32 %v4270_v49, %v4270_v49  ;;  %v712_v36 = vmul.f32 %v648_v16, %v648_v16 }
 0x107   :  { %3684 = vrsqrt.f32 %v231_v29  ;;  %1868 = vmatprep.subr.bf16.mxu0 %v621_v44  ;;  %v320_v56 = vadd.f32 %v4127_v4, %v298_v48  ;;  %v4276_v17 = vmul.f32 0.0078125, %v87_v35  ;;  %v263_v21 = vsub.f32 %v3802_v20, %v4244_v52  ;;  %v1212_v35 = vld [vmem:[#allocation3 + $0x200] sm:$0xff] }
 0x108   :  { %3686 = vrsqrt.f32 %v230_v28  ;;  %678 = vadd.xlane.f32.xlu0 %v648_v16  ;;  %v184_v33 = vmul.f32 %v4278_v53, %v4278_v53  ;;  %v262_v23 = vsub.f32 %v3803_v1, %v4246_v51  ;;  %v1277_v51 = vmul.f32 %v1213_v9, %v1213_v9 }
 0x109   :  { %680 = vadd.xlane.f32.xlu1 %v649_v45  ;;  %v450_v37 = vpop.xlane.xlu0 %449  ;;  %v332_v2 = vpack.c.bf16 %v321_v0, %v320_v56  ;;  %v185_v18 = vmul.f32 %v4276_v17, %v4276_v17 }
 0x10a   :  { %v452_v10 = vpop.xlane.xlu1 %451  ;;  %v469_v61 = vmul.f32 0.0078125, %v450_v37 }
 0x10b   :  { %v470_v7 = vmul.f32 0.0078125, %v452_v10  ;;  %1869 = vmatpush1.bf16.msra.mxu0 %v332_v2  ;;  %v1276_v10 = vmul.f32 %v1212_v35, %v1212_v35 }
 0x10c   :  { %v501_v38 = vsub.f32 %v469_v61, %v485_v24  ;;  %1031 = vadd.xlane.f32.xlu0 %v1001_v59 }
 0x10d   :  { %v3681_v12 = vpop.eup %3680  ;;  %v502_v41 = vsub.f32 %v470_v7, %v486_v60  ;;  %1033 = vadd.xlane.f32.xlu1 %v1002_v57  ;;  %v149_v42 = vpop.xlane.xlu0 %148 }
 0x10e   :  { %v3683_v5 = vpop.eup %3682  ;;  %v151_v46 = vpop.xlane.xlu1 %150  ;;  %v580_v31 = vmul.f32 %v3681_v12, %v564_v63  ;;  %v517_v13 = vmax.f32 %v501_v38, 0.0  ;;  %v168_v47 = vmul.f32 0.0078125, %v149_v42  ;;  %v1214_v38 = vld [vmem:[#allocation3 + $0x210] sm:$0xff]  ;;  %v3805_v42 = vld [vmem:[#allocation3 + $0xe0] sm:$0xff] }
 0x10f   :  { %v518_v6 = vmax.f32 %v502_v41, 0.0  ;;  %v169_v14 = vmul.f32 0.0078125, %v151_v46  ;;  %v579_v3 = vmul.f32 %v3683_v5, %v563_v32 }
 0x110   :  { %v596_v40 = vmul.f32 %v4116_v54, %v580_v31  ;;  %v533_v19 = vadd.f32 1e-05, %v517_v13  ;;  %v200_v8 = vsub.f32 %v168_v47, %v184_v33  ;;  %742 = vadd.xlane.f32.xlu0 %v712_v36  ;;  %v3804_v36 = vld [vmem:[#allocation3 + $0xe8] sm:$0xff]  ;;  %v565_v31 = vsub.f32 %v3805_v42, %v4272_v50 }
 0x111   :  { %v3685_v26 = vpop.eup %3684  ;;  %v534_v22 = vadd.f32 1e-05, %v518_v6  ;;  %v201_v58 = vsub.f32 %v169_v14, %v185_v18  ;;  %744 = vadd.xlane.f32.xlu1 %v713_v25  ;;  %v390_v43 = vpop.xlane.xlu0 %389  ;;  %v595_v27 = vmul.f32 %v4116_v54, %v579_v3  ;;  %v1215_v25 = vld [vmem:[#allocation3 + $0x218] sm:$0xff]  ;;  %v566_v5 = vsub.f32 %v3804_v36, %v4270_v49 }
 0x112   :  { %v3687_v34 = vpop.eup %3686  ;;  %v392_v30 = vpop.xlane.xlu1 %391  ;;  %v612_v52 = vadd.f32 %v4127_v4, %v596_v40  ;;  %v216_v28 = vmax.f32 %v200_v8, 0.0  ;;  %v279_v39 = vmul.f32 %v3685_v26, %v263_v21  ;;  %v4300_v59 = vmul.f32 0.0078125, %v390_v43 }
 0x113   :  { %3688 = vrsqrt.f32 %v534_v22  ;;  %v217_v29 = vmax.f32 %v201_v58, 0.0  ;;  %v611_v44 = vadd.f32 %v4127_v4, %v595_v27  ;;  %v278_v45 = vmul.f32 %v3687_v34, %v262_v23  ;;  %v3806_v58 = vld [vmem:[#allocation3 + $0x68] sm:$0xff] }
 0x114   :  { %3690 = vrsqrt.f32 %v533_v19  ;;  %v232_v16 = vadd.f32 1e-05, %v216_v28  ;;  %1228 = vadd.xlane.f32.xlu0 %v1212_v35  ;;  %v4298_v0 = vmul.f32 0.0078125, %v392_v30  ;;  %v301_v60 = vmul.f32 %v4116_v54, %v279_v39 }
 0x115   :  { %v233_v48 = vadd.f32 1e-05, %v217_v29  ;;  %1230 = vadd.xlane.f32.xlu1 %v1213_v9  ;;  %v89_v56 = vpop.xlane.xlu0 %88  ;;  %v622_v57 = vpack.c.bf16 %v612_v52, %v611_v44  ;;  %v300_v37 = vmul.f32 %v4116_v54, %v278_v45  ;;  %v487_v11 = vmul.f32 %v4300_v59, %v4300_v59  ;;  %v3807_v29 = vld [vmem:[#allocation3 + $0x60] sm:$0xff]  ;;  %v1217_v44 = vld [vmem:[#allocation3 + $0x228] sm:$0xff] }
 0x116   :  { %v91_v55 = vpop.xlane.xlu1 %90  ;;  %v4306_v61 = vmul.f32 0.0078125, %v89_v56  ;;  %v323_v2 = vadd.f32 %v4127_v4, %v301_v60  ;;  %v488_v12 = vmul.f32 %v4298_v0, %v4298_v0  ;;  %v1279_v33 = vmul.f32 %v1215_v25, %v1215_v25 }
 0x117   :  { %3692 = vrsqrt.f32 %v233_v48  ;;  %1870 = vmatprep.subr.bf16.mxu0 %v622_v57  ;;  %v322_v24 = vadd.f32 %v4127_v4, %v300_v37  ;;  %v4304_v7 = vmul.f32 0.0078125, %v91_v55  ;;  %v1278_v14 = vmul.f32 %v1214_v38, %v1214_v38 }
 0x118   :  { %3694 = vrsqrt.f32 %v232_v16  ;;  %1292 = vadd.xlane.f32.xlu0 %v1276_v10  ;;  %v186_v21 = vmul.f32 %v4306_v61, %v4306_v61  ;;  %v265_v8 = vsub.f32 %v3806_v58, %v4276_v17  ;;  %v264_v28 = vsub.f32 %v3807_v29, %v4278_v53 }
 0x119   :  { %1294 = vadd.xlane.f32.xlu1 %v1277_v51  ;;  %v454_v63 = vpop.xlane.xlu0 %453  ;;  %v333_v18 = vpack.c.bf16 %v323_v2, %v322_v24  ;;  %v187_v20 = vmul.f32 %v4304_v7, %v4304_v7  ;;  %v1216_v51 = vld [vmem:[#allocation3 + $0x220] sm:$0xff]  ;;  %v1281_v53 = vmul.f32 %v1217_v44, %v1217_v44 }
 0x11a   :  { %v456_v62 = vpop.xlane.xlu1 %455  ;;  %v471_v41 = vmul.f32 0.0078125, %v454_v63  ;;  %v1280_v63 = vmul.f32 %v1216_v51, %v1216_v51 }
 0x11b   :  { %v472_v32 = vmul.f32 0.0078125, %v456_v62  ;;  %1871 = vmatpush1.bf16.msra.mxu0 %v333_v18 }
 0x11c   :  { %v503_v13 = vsub.f32 %v471_v41, %v487_v11  ;;  %1232 = vadd.xlane.f32.xlu0 %v1214_v38  ;;  %v4333_v11 = vld [vmem:[%s5505_s1] ss:$0 sm:$0xff] }
 0x11d   :  { %v3689_v46 = vpop.eup %3688  ;;  %v504_v6 = vsub.f32 %v472_v32, %v488_v12  ;;  %1234 = vadd.xlane.f32.xlu1 %v1215_v25  ;;  %v153_v3 = vpop.xlane.xlu0 %152 }
 0x11e   :  { %v3691_v47 = vpop.eup %3690  ;;  %v155_v49 = vpop.xlane.xlu1 %154  ;;  %v582_v40 = vmul.f32 %v3689_v46, %v566_v5  ;;  %v519_v22 = vmax.f32 %v503_v13, 0.0  ;;  %v170_v50 = vmul.f32 0.0078125, %v153_v3  ;;  %v1218_v13 = vld [vmem:[#allocation3 + $0x230] sm:$0xff] }
 0x11f   :  { %v520_v26 = vmax.f32 %v504_v6, 0.0  ;;  %v171_v19 = vmul.f32 0.0078125, %v155_v49  ;;  %v581_v34 = vmul.f32 %v3691_v47, %v565_v31  ;;  %v3810_v3 = vld [vmem:[#allocation3 + $0xf0] sm:$0xff] }
 0x120   :  { %v598_v1 = vmul.f32 %v4116_v54, %v582_v40  ;;  %v535_v43 = vadd.f32 1e-05, %v519_v22  ;;  %v202_v27 = vsub.f32 %v170_v50, %v186_v21  ;;  %1296 = vadd.xlane.f32.xlu0 %v1278_v14  ;;  %v3809_v14 = vld [vmem:[#allocation3 + $0xf8] sm:$0xff]  ;;  %v567_v40 = vsub.f32 %v3810_v3, %v4300_v59 }
 0x121   :  { %v3693_v23 = vpop.eup %3692  ;;  %v536_v30 = vadd.f32 1e-05, %v520_v26  ;;  %v203_v9 = vsub.f32 %v171_v19, %v187_v20  ;;  %1298 = vadd.xlane.f32.xlu1 %v1279_v33  ;;  %v940_v39 = vpop.xlane.xlu0 %939  ;;  %v597_v45 = vmul.f32 %v4116_v54, %v581_v34  ;;  %v1219_v33 = vld [vmem:[#allocation3 + $0x238] sm:$0xff]  ;;  %v568_v47 = vsub.f32 %v3809_v14, %v4298_v0 }
 0x122   :  { %v3695_v52 = vpop.eup %3694  ;;  %v942_v35 = vpop.xlane.xlu1 %941  ;;  %v614_v17 = vadd.f32 %v4127_v4, %v598_v1  ;;  %v218_v16 = vmax.f32 %v202_v27, 0.0  ;;  %v281_v55 = vmul.f32 %v3693_v23, %v265_v8  ;;  %v4328_v12 = vmul.f32 0.0078125, %v940_v39  ;;  %v1223_v14 = vld [vmem:[#allocation3 + $0x258] sm:$0xff] }
 0x123   :  { %3696 = vrsqrt.f32 %v536_v30  ;;  %v219_v48 = vmax.f32 %v203_v9, 0.0  ;;  %v613_v56 = vadd.f32 %v4127_v4, %v597_v45  ;;  %v280_v57 = vmul.f32 %v3695_v52, %v264_v28 }
 0x124   :  { %3698 = vrsqrt.f32 %v535_v43  ;;  %v234_v37 = vadd.f32 1e-05, %v218_v16  ;;  %1236 = vadd.xlane.f32.xlu0 %v1216_v51  ;;  %v4326_v25 = vmul.f32 0.0078125, %v942_v35  ;;  %v303_v32 = vmul.f32 %v4333_v11, %v281_v55  ;;  %v3811_v43 = vld [vmem:[#allocation3 + $0x78] sm:$0xff]  ;;  %v1221_v51 = vld [vmem:[#allocation3 + $0x248] sm:$0xff] }
 0x125   :  { %v235_v10 = vadd.f32 1e-05, %v219_v48  ;;  %1238 = vadd.xlane.f32.xlu1 %v1217_v44  ;;  %v651_v24 = vpop.xlane.xlu0 %650  ;;  %v623_v62 = vpack.c.bf16 %v614_v17, %v613_v56  ;;  %v302_v2 = vmul.f32 %v4116_v54, %v280_v57  ;;  %v1051_v42 = vmul.f32 %v4328_v12, %v4328_v12  ;;  %v3812_v17 = vld [vmem:[#allocation3 + $0x70] sm:$0xff] }
 0x126   :  { %v653_v60 = vpop.xlane.xlu1 %652  ;;  %v4339_v54 = vmul.f32 0.0078125, %v651_v24  ;;  %v325_v18 = vadd.f32 %v4127_v4, %v303_v32  ;;  %v1052_v46 = vmul.f32 %v4326_v25, %v4326_v25  ;;  %v1283_v21 = vmul.f32 %v1219_v33, %v1219_v33 }
 0x127   :  { %3700 = vrsqrt.f32 %v235_v10  ;;  %1872 = vmatprep.subr.bf16.mxu0 %v623_v62  ;;  %v324_v41 = vadd.f32 %v4127_v4, %v302_v2  ;;  %v4337_v38 = vmul.f32 0.0078125, %v653_v60  ;;  %v1282_v22 = vmul.f32 %v1218_v13, %v1218_v13 }
 0x128   :  { %3702 = vrsqrt.f32 %v234_v37  ;;  %1300 = vadd.xlane.f32.xlu0 %v1280_v63  ;;  %v762_v58 = vmul.f32 %v4339_v54, %v4339_v54  ;;  %v267_v9 = vsub.f32 %v3811_v43, %v4304_v7  ;;  %v266_v48 = vsub.f32 %v3812_v17, %v4306_v61  ;;  %v4359_v7 = vld [vmem:[%s5506_s2] ss:$0 sm:$0xff] }
 0x129   :  { %1302 = vadd.xlane.f32.xlu1 %v1281_v53  ;;  %v1004_v5 = vpop.xlane.xlu0 %1003  ;;  %v334_v20 = vpack.c.bf16 %v325_v18, %v324_v41  ;;  %v763_v50 = vmul.f32 %v4337_v38, %v4337_v38  ;;  %v1220_v53 = vld [vmem:[#allocation3 + $0x240] sm:$0xff]  ;;  %v1285_v2 = vmul.f32 %v1221_v51, %v1221_v51 }
 0x12a   :  { %v1006_v36 = vpop.xlane.xlu1 %1005  ;;  %v1035_v6 = vmul.f32 0.0078125, %v1004_v5 }
 0x12b   :  { %v1036_v31 = vmul.f32 0.0078125, %v1006_v36  ;;  %1873 = vmatpush1.bf16.msra.mxu0 %v334_v20  ;;  %v1284_v36 = vmul.f32 %v1220_v53, %v1220_v53 }
 0x12c   :  { %v1067_v26 = vsub.f32 %v1035_v6, %v1051_v42  ;;  %1240 = vadd.xlane.f32.xlu0 %v1218_v13 }
 0x12d   :  { %v3697_v49 = vpop.eup %3696  ;;  %v1068_v4 = vsub.f32 %v1036_v31, %v1052_v46  ;;  %1242 = vadd.xlane.f32.xlu1 %v1219_v33  ;;  %v715_v8 = vpop.xlane.xlu0 %714 }
 0x12e   :  { %v3699_v19 = vpop.eup %3698  ;;  %v717_v0 = vpop.xlane.xlu1 %716  ;;  %v584_v34 = vmul.f32 %v3697_v49, %v568_v47  ;;  %v1083_v23 = vmax.f32 %v1067_v26, 0.0  ;;  %v746_v59 = vmul.f32 0.0078125, %v715_v8  ;;  %v3815_v8 = vld [vmem:[#allocation3 + $0x180] sm:$0xff] }
 0x12f   :  { %v1084_v1 = vmax.f32 %v1068_v4, 0.0  ;;  %v747_v30 = vmul.f32 0.0078125, %v717_v0  ;;  %v583_v27 = vmul.f32 %v3699_v19, %v567_v40  ;;  %v1222_v40 = vld [vmem:[#allocation3 + $0x250] sm:$0xff]  ;;  %v3814_v4 = vld [vmem:[#allocation3 + $0x188] sm:$0xff] }
 0x130   :  { %v600_v52 = vmul.f32 %v4333_v11, %v584_v34  ;;  %v1099_v35 = vadd.f32 1e-05, %v1083_v23  ;;  %v778_v44 = vsub.f32 %v746_v59, %v762_v58  ;;  %1304 = vadd.xlane.f32.xlu0 %v1282_v22  ;;  %v1132_v26 = vsub.f32 %v3814_v4, %v4326_v25  ;;  %v3600_v58 = vld [vmem:[%s5507_s3] sm:$0xff]  }
 0x131   :  { %v3701_v29 = vpop.eup %3700  ;;  %v1100_v28 = vadd.f32 1e-05, %v1084_v1  ;;  %v779_v39 = vsub.f32 %v747_v30, %v763_v50  ;;  %1306 = vadd.xlane.f32.xlu1 %v1283_v21  ;;  %v599_v55 = vmul.f32 %v4333_v11, %v583_v27  ;;  %v944_v37 = vpop.xlane.xlu0 %943  ;;  %v1131_v34 = vsub.f32 %v3815_v8, %v4328_v12 }
 0x132   :  { %v3703_v45 = vpop.eup %3702  ;;  %v946_v16 = vpop.xlane.xlu1 %945  ;;  %v616_v56 = vadd.f32 %v4359_v7, %v600_v52  ;;  %v794_v10 = vmax.f32 %v778_v44, 0.0  ;;  %v283_v60 = vmul.f32 %v3701_v29, %v267_v9  ;;  %v4367_v42 = vmul.f32 0.0078125, %v944_v37 }
 0x133   :  { %3704 = vrsqrt.f32 %v1100_v28  ;;  %v795_v57 = vmax.f32 %v779_v39, 0.0  ;;  %v615_v61 = vadd.f32 %v4359_v7, %v599_v55  ;;  %v282_v24 = vmul.f32 %v3703_v45, %v266_v48  ;;  %v3816_v48 = vld [vmem:[#allocation3 + $0x108] sm:$0xff] }
 0x134   :  { %3706 = vrsqrt.f32 %v1099_v35  ;;  %v810_v63 = vadd.f32 1e-05, %v794_v10  ;;  %1244 = vadd.xlane.f32.xlu0 %v1220_v53  ;;  %v4364_v18 = vmul.f32 0.0078125, %v946_v16  ;;  %v305_v46 = vmul.f32 %v4333_v11, %v283_v60  ;;  %v3817_v10 = vld [vmem:[#allocation3 + $0x100] sm:$0xff] }
 0x135   :  { %v811_v62 = vadd.f32 1e-05, %v795_v57  ;;  %1246 = vadd.xlane.f32.xlu1 %v1221_v51  ;;  %v624_v41 = vpack.c.bf16 %v616_v56, %v615_v61  ;;  %v304_v5 = vmul.f32 %v4333_v11, %v282_v24  ;;  %v655_v33 = vpop.xlane.xlu0 %654  ;;  %v1053_v22 = vmul.f32 %v4367_v42, %v4367_v42  ;;  %v1225_v24 = vld [vmem:[#allocation3 + $0x268] sm:$0xff] }
 0x136   :  { %v657_v32 = vpop.xlane.xlu1 %656  ;;  %v327_v6 = vadd.f32 %v4359_v7, %v305_v46  ;;  %v1054_v47 = vmul.f32 %v4364_v18, %v4364_v18  ;;  %v4378_v19 = vmul.f32 0.0078125, %v655_v33  ;;  %v1287_v23 = vmul.f32 %v1223_v14, %v1223_v14 }
 0x137   :  { %3708 = vrsqrt.f32 %v811_v62  ;;  %1874 = vmatprep.subr.bf16.mxu0 %v624_v41  ;;  %v326_v31 = vadd.f32 %v4359_v7, %v304_v5  ;;  %v4373_v20 = vmul.f32 0.0078125, %v657_v32  ;;  %v1286_v43 = vmul.f32 %v1222_v40, %v1222_v40 }
 0x138   :  { %3710 = vrsqrt.f32 %v810_v63  ;;  %1308 = vadd.xlane.f32.xlu0 %v1284_v36  ;;  %v764_v12 = vmul.f32 %v4378_v19, %v4378_v19  ;;  %v843_v16 = vsub.f32 %v3816_v48, %v4337_v38  ;;  %v842_v37 = vsub.f32 %v3817_v10, %v4339_v54  ;;  %v3601_v54 = vld [vmem:[%s5507_s3 + $0x8] sm:$0xff]  }
 0x139   :  { %1310 = vadd.xlane.f32.xlu1 %v1285_v2  ;;  %v1008_v49 = vpop.xlane.xlu0 %1007  ;;  %v335_v3 = vpack.c.bf16 %v327_v6, %v326_v31  ;;  %v765_v27 = vmul.f32 %v4373_v20, %v4373_v20  ;;  %v1224_v2 = vld [vmem:[#allocation3 + $0x260] sm:$0xff]  ;;  %v1289_v31 = vmul.f32 %v1225_v24, %v1225_v24 }
 0x13a   :  { %v1010_v13 = vpop.xlane.xlu1 %1009  ;;  %v1037_v50 = vmul.f32 0.0078125, %v1008_v49 }
 0x13b   :  { %v1038_v21 = vmul.f32 0.0078125, %v1010_v13  ;;  %1875 = vmatpush1.bf16.msra.mxu0 %v335_v3 }
 0x13c   :  { %v1069_v25 = vsub.f32 %v1037_v50, %v1053_v22  ;;  %1248 = vadd.xlane.f32.xlu0 %v1222_v40  ;;  %v1227_v50 = vld [vmem:[#allocation3 + $0x278] sm:$0xff] }
 0x13d   :  { %v3705_v0 = vpop.eup %3704  ;;  %v1070_v1 = vsub.f32 %v1038_v21, %v1054_v47  ;;  %1250 = vadd.xlane.f32.xlu1 %v1223_v14  ;;  %v719_v28 = vpop.xlane.xlu0 %718  ;;  %v1288_v14 = vmul.f32 %v1224_v2, %v1224_v2 }
 0x13e   :  { %v3707_v30 = vpop.eup %3706  ;;  %v721_v59 = vpop.xlane.xlu1 %720  ;;  %v1148_v9 = vmul.f32 %v3705_v0, %v1132_v26  ;;  %v1085_v39 = vmax.f32 %v1069_v25, 0.0  ;;  %1893 = vmatmul.mubr.bf16.vlgmr.msra.gmra.mrb[0].mxu0 %v3600_v58  ;;  %v748_v44 = vmul.f32 0.0078125, %v719_v28 }
 0x13f   :  { %v1086_v52 = vmax.f32 %v1070_v1, 0.0  ;;  %v749_v29 = vmul.f32 0.0078125, %v721_v59  ;;  %v1147_v35 = vmul.f32 %v3707_v30, %v1131_v34  ;;  %1902 = vmatprep.mubr.bf16.mxu0 %v3926_v15  ;;  %v3818_v30 = vld [vmem:[#allocation3 + $0x198] sm:$0xff] }
 0x140   :  { %v1164_v45 = vmul.f32 %v4333_v11, %v1148_v9  ;;  %v1101_v53 = vadd.f32 1e-05, %v1085_v39  ;;  %v780_v60 = vsub.f32 %v748_v44, %v764_v12  ;;  %1312 = vadd.xlane.f32.xlu0 %v1286_v43  ;;  %v1134_v25 = vsub.f32 %v3818_v30, %v4364_v18 }
 0x141   :  { %v3709_v17 = vpop.eup %3708  ;;  %v1102_v51 = vadd.f32 1e-05, %v1086_v52  ;;  %v781_v55 = vsub.f32 %v749_v29, %v765_v27  ;;  %1314 = vadd.xlane.f32.xlu1 %v1287_v23  ;;  %v1163_v56 = vmul.f32 %v4333_v11, %v1147_v35  ;;  %v948_v63 = vpop.xlane.xlu0 %947  ;;  %v1226_v23 = vld [vmem:[#allocation3 + $0x270] sm:$0xff]  ;;  %v1291_v12 = vmul.f32 %v1227_v50, %v1227_v50 }
 0x142   :  { %v3711_v57 = vpop.eup %3710  ;;  %v950_v61 = vpop.xlane.xlu1 %949  ;;  %v1180_v62 = vadd.f32 %v4359_v7, %v1164_v45  ;;  %v859_v41 = vmul.f32 %v3709_v17, %v843_v16  ;;  %v796_v36 = vmax.f32 %v780_v60, 0.0  ;;  %v4402_v40 = vmul.f32 0.0078125, %v948_v63  ;;  %v3602_v27 = vld [vmem:[%s5507_s3 + $0x10] sm:$0xff]   ;;  %v3820_v60 = vld [vmem:[#allocation3 + $0x118] sm:$0xff] }
 0x143   :  { %3712 = vrsqrt.f32 %v1102_v51  ;;  %v797_v38 = vmax.f32 %v781_v55, 0.0  ;;  %v1179_v32 = vadd.f32 %v4359_v7, %v1163_v56  ;;  %v858_v5 = vmul.f32 %v3711_v57, %v842_v37  ;;  %v3819_v29 = vld [vmem:[#allocation3 + $0x190] sm:$0xff] }
 0x144   :  { %3714 = vrsqrt.f32 %v1101_v53  ;;  %v812_v6 = vadd.f32 1e-05, %v796_v36  ;;  %1252 = vadd.xlane.f32.xlu0 %v1224_v2  ;;  %v4399_v21 = vmul.f32 0.0078125, %v950_v61  ;;  %v875_v3 = vmul.f32 %v4333_v11, %v859_v41  ;;  %v3821_v2 = vld [vmem:[#allocation3 + $0x110] sm:$0xff] }
 0x145   :  { %v813_v33 = vadd.f32 1e-05, %v797_v38  ;;  %1254 = vadd.xlane.f32.xlu1 %v1225_v24  ;;  %v1195_v46 = vpack.c.bf16 %v1180_v62, %v1179_v32  ;;  %v874_v47 = vmul.f32 %v4333_v11, %v858_v5  ;;  %v659_v49 = vpop.xlane.xlu0 %658  ;;  %v1055_v59 = vmul.f32 %v4402_v40, %v4402_v40 }
 0x146   :  { %v661_v13 = vpop.xlane.xlu1 %660  ;;  %1903 = vmatmul.mubr.bf16.gmra.mrb[4].mxu0 %v3601_v54  ;;  %v891_v26 = vadd.f32 %v4359_v7, %v875_v3  ;;  %v1056_v58 = vmul.f32 %v4399_v21, %v4399_v21  ;;  %v4414_v43 = vmul.f32 0.0078125, %v659_v49  ;;  %v1133_v28 = vsub.f32 %v3819_v29, %v4367_v42 }
 0x147   :  { %3716 = vrsqrt.f32 %v813_v33  ;;  %2053 = vmatprep.subr.bf16.mxu1 %v1195_v46  ;;  %v890_v4 = vadd.f32 %v4359_v7, %v874_v47  ;;  %1912 = vmatprep.mubr.bf16.mxu0 %v3926_v15  ;;  %v4409_v0 = vmul.f32 0.0078125, %v661_v13  ;;  %v1290_v45 = vmul.f32 %v1226_v23, %v1226_v23  ;;  %v3603_v13 = vld [vmem:[%s5507_s3 + $0x18] sm:$0xff]  }
 0x148   :  { %3718 = vrsqrt.f32 %v812_v6  ;;  %1316 = vadd.xlane.f32.xlu0 %v1288_v14  ;;  %v766_v42 = vmul.f32 %v4414_v43, %v4414_v43  ;;  %v845_v61 = vsub.f32 %v3820_v60, %v4373_v20  ;;  %v844_v32 = vsub.f32 %v3821_v2, %v4378_v19 }
 0x149   :  { %1318 = vadd.xlane.f32.xlu1 %v1289_v31  ;;  %v1012_v34 = vpop.xlane.xlu0 %1011  ;;  %v906_v1 = vpack.c.bf16 %v891_v26, %v890_v4  ;;  %v767_v48 = vmul.f32 %v4409_v0, %v4409_v0 }
 0x14a   :  { %v1014_v22 = vpop.xlane.xlu1 %1013  ;;  %v1039_v9 = vmul.f32 0.0078125, %v1012_v34 }
 0x14b   :  { %v1040_v8 = vmul.f32 0.0078125, %v1014_v22  ;;  %2054 = vmatpush1.bf16.msra.mxu1 %v906_v1 }
 0x14c   :  { %v1071_v18 = vsub.f32 %v1039_v9, %v1055_v59  ;;  %1256 = vadd.xlane.f32.xlu0 %v1226_v23 }
 0x14d   :  { %v3713_v52 = vpop.eup %3712  ;;  %v1072_v35 = vsub.f32 %v1040_v8, %v1056_v58  ;;  %1258 = vadd.xlane.f32.xlu1 %v1227_v50  ;;  %v723_v55 = vpop.xlane.xlu0 %722 }
 0x14e   :  { %v3715_v39 = vpop.eup %3714  ;;  %v725_v44 = vpop.xlane.xlu1 %724  ;;  %v1150_v17 = vmul.f32 %v3713_v52, %v1134_v25  ;;  %v1087_v57 = vmax.f32 %v1071_v18, 0.0  ;;  %1913 = vmatmul.mubr.bf16.gmra.mrb[8].mxu0 %v3602_v27  ;;  %v750_v10 = vmul.f32 0.0078125, %v723_v55  ;;  %v3822_v27 = vld [vmem:[#allocation3 + $0x1a8] sm:$0xff]  ;;  %v3823_v18 = vld [vmem:[#allocation3 + $0x1a0] sm:$0xff] }
 0x14f   :  { %v1088_v16 = vmax.f32 %v1072_v35, 0.0  ;;  %v751_v51 = vmul.f32 0.0078125, %v725_v44  ;;  %v1149_v56 = vmul.f32 %v3715_v39, %v1133_v28  ;;  %1922 = vmatprep.mubr.bf16.mxu0 %v3926_v15  ;;  %v1136_v52 = vsub.f32 %v3822_v27, %v4399_v21  ;;  %v1581_v27 = vld [vmem:[%s5508_s4 + $0x48] sm:$0xff] }
 0x150   :  { %v1166_v37 = vmul.f32 %v4333_v11, %v1150_v17  ;;  %v1103_v41 = vadd.f32 1e-05, %v1087_v57  ;;  %v782_v36 = vsub.f32 %v750_v10, %v766_v42  ;;  %1320 = vadd.xlane.f32.xlu0 %v1290_v45  ;;  %v1135_v44 = vsub.f32 %v3823_v18, %v4402_v40  ;;  %v1573_v10 = vld [vmem:[%s5508_s4 + $0x8] sm:$0xff] }
 0x151   :  { %v3717_v53 = vpop.eup %3716  ;;  %v1104_v24 = vadd.f32 1e-05, %v1088_v16  ;;  %v783_v62 = vsub.f32 %v751_v51, %v767_v48  ;;  %1322 = vadd.xlane.f32.xlu1 %v1291_v12  ;;  %v1165_v38 = vmul.f32 %v4333_v11, %v1149_v56  ;;  %v952_v20 = vpop.xlane.xlu0 %951  ;;  %v3604_v12 = vld [vmem:[%s5507_s3 + $0x20] sm:$0xff]  }
 0x152   :  { %v3719_v63 = vpop.eup %3718  ;;  %v954_v54 = vpop.xlane.xlu1 %953  ;;  %v1182_v5 = vadd.f32 %v4359_v7, %v1166_v37  ;;  %v861_v31 = vmul.f32 %v3717_v53, %v845_v61  ;;  %v798_v6 = vmax.f32 %v782_v36, 0.0  ;;  %v4438_v58 = vmul.f32 0.0078125, %v952_v20 }
 0x153   :  { %3720 = vrsqrt.f32 %v1104_v24  ;;  %v799_v33 = vmax.f32 %v783_v62, 0.0  ;;  %v1181_v46 = vadd.f32 %v4359_v7, %v1165_v38  ;;  %v860_v14 = vmul.f32 %v3719_v63, %v844_v32  ;;  %v3824_v24 = vld [vmem:[#allocation3 + $0x128] sm:$0xff] }
 0x154   :  { %3722 = vrsqrt.f32 %v1103_v41  ;;  %v814_v49 = vadd.f32 1e-05, %v798_v6  ;;  %v4435_v26 = vmul.f32 0.0078125, %v954_v54  ;;  %v877_v50 = vmul.f32 %v4333_v11, %v861_v31  ;;  %v3825_v41 = vld [vmem:[#allocation3 + $0x120] sm:$0xff] }
 0x155   :  { %v815_v19 = vadd.f32 1e-05, %v799_v33  ;;  %v1196_v47 = vpack.c.bf16 %v1182_v5, %v1181_v46  ;;  %v876_v4 = vmul.f32 %v4333_v11, %v860_v14  ;;  %v663_v22 = vpop.xlane.xlu0 %662  ;;  %v1057_v29 = vmul.f32 %v4438_v58, %v4438_v58 }
 0x156   :  { %v665_v3 = vpop.xlane.xlu1 %664  ;;  %1923 = vmatmul.mubr.bf16.gmra.mrb[12].mxu0 %v3603_v13  ;;  %v893_v34 = vadd.f32 %v4359_v7, %v877_v50  ;;  %v1058_v23 = vmul.f32 %v4435_v26, %v4435_v26  ;;  %v4450_v28 = vmul.f32 0.0078125, %v663_v22  ;;  %v847_v62 = vsub.f32 %v3824_v24, %v4409_v0  ;;  %v1574_v13 = vld [vmem:[%s5508_s4 + $0x10] sm:$0xff] }
 0x157   :  { %3724 = vrsqrt.f32 %v815_v19  ;;  %2055 = vmatprep.subr.bf16.mxu1 %v1196_v47  ;;  %v892_v8 = vadd.f32 %v4359_v7, %v876_v4  ;;  %1932 = vmatprep.mubr.bf16.mxu0 %v3926_v15  ;;  %v4445_v30 = vmul.f32 0.0078125, %v665_v3  ;;  %v846_v36 = vsub.f32 %v3825_v41, %v4414_v43  ;;  %v3605_v43 = vld [vmem:[%s5507_s3 + $0x28] sm:$0xff]   ;;  %v1572_v3 = vld [vmem:[%s5508_s4] sm:$0xff] }
 0x158   :  { %3726 = vrsqrt.f32 %v814_v49  ;;  %v768_v40 = vmul.f32 %v4450_v28, %v4450_v28 }
 0x159   :  { %v1016_v59 = vpop.xlane.xlu0 %1015  ;;  %v907_v9 = vpack.c.bf16 %v893_v34, %v892_v8  ;;  %v769_v51 = vmul.f32 %v4445_v30, %v4445_v30 }
 0x15a   :  { %v1018_v1 = vpop.xlane.xlu1 %1017  ;;  %v1041_v35 = vmul.f32 0.0078125, %v1016_v59 }
 0x15b   :  { %v1042_v25 = vmul.f32 0.0078125, %v1018_v1  ;;  %2056 = vmatpush1.bf16.msra.mxu1 %v907_v9 }
 0x15c   :  { %v1073_v48 = vsub.f32 %v1041_v35, %v1057_v29 }
 0x15d   :  { %v3721_v39 = vpop.eup %3720  ;;  %v1074_v45 = vsub.f32 %v1042_v25, %v1058_v23  ;;  %v727_v42 = vpop.xlane.xlu0 %726  ;;  %v1575_v23 = vld [vmem:[%s5508_s4 + $0x18] sm:$0xff] }
 0x15e   :  { %v3723_v17 = vpop.eup %3722  ;;  %v729_v16 = vpop.xlane.xlu1 %728  ;;  %v1152_v21 = vmul.f32 %v3721_v39, %v1136_v52  ;;  %v1089_v37 = vmax.f32 %v1073_v48, 0.0  ;;  %1933 = vmatmul.mubr.bf16.gmra.mrb[16].mxu0 %v3604_v12  ;;  %v752_v53 = vmul.f32 0.0078125, %v727_v42 }
 0x15f   :  { %v1090_v55 = vmax.f32 %v1074_v45, 0.0  ;;  %v753_v56 = vmul.f32 0.0078125, %v729_v16  ;;  %v1151_v57 = vmul.f32 %v3723_v17, %v1135_v44  ;;  %1942 = vmatprep.mubr.bf16.mxu0 %v3926_v15  ;;  %v1576_v44 = vld [vmem:[%s5508_s4 + $0x20] sm:$0xff]  ;;  %v3826_v45 = vld [vmem:[#allocation3 + $0x1b8] sm:$0xff] }
 0x160   :  { %v1168_v60 = vmul.f32 %v4333_v11, %v1152_v21  ;;  %v1105_v54 = vadd.f32 1e-05, %v1089_v37  ;;  %v784_v5 = vsub.f32 %v752_v53, %v768_v40  ;;  %v1138_v17 = vsub.f32 %v3826_v45, %v4435_v26  ;;  %v1583_v26 = vld [vmem:[%s5508_s4 + $0x58] sm:$0xff] }
 0x161   :  { %v3725_v61 = vpop.eup %3724  ;;  %v1106_v38 = vadd.f32 1e-05, %v1090_v55  ;;  %v785_v63 = vsub.f32 %v753_v56, %v769_v51  ;;  %v1167_v2 = vmul.f32 %v4333_v11, %v1151_v57  ;;  %v956_v31 = vpop.xlane.xlu0 %955  ;;  %v3606_v51 = vld [vmem:[%s5507_s3 + $0x30] sm:$0xff]  }
 0x162   :  { %v3727_v32 = vpop.eup %3726  ;;  %v958_v33 = vpop.xlane.xlu1 %957  ;;  %v1184_v20 = vadd.f32 %v4359_v7, %v1168_v60  ;;  %1611 = vperm.xlu1 %3599, %v1573_v10   ;;  %v863_v6 = vmul.f32 %v3725_v61, %v847_v62  ;;  %v800_v14 = vmax.f32 %v784_v5, 0.0  ;;  %v4486_v25 = vmul.f32 0.0078125, %v956_v31  ;;  %v3827_v56 = vld [vmem:[#allocation3 + $0x1b0] sm:$0xff]  ;;  %v1585_v31 = vld [vmem:[%s5508_s4 + $0x68] sm:$0xff] }
 0x163   :  { %3728 = vrsqrt.f32 %v1106_v38  ;;  %v801_v46 = vmax.f32 %v785_v63, 0.0  ;;  %v1183_v0 = vadd.f32 %v4359_v7, %v1167_v2  ;;  %v862_v19 = vmul.f32 %v3727_v32, %v846_v36 }
 0x164   :  { %3730 = vrsqrt.f32 %v1105_v54  ;;  %v816_v4 = vadd.f32 1e-05, %v800_v14  ;;  %v4480_v8 = vmul.f32 0.0078125, %v958_v33  ;;  %v879_v1 = vmul.f32 %v4333_v11, %v863_v6  ;;  %v3828_v54 = vld [vmem:[#allocation3 + $0x138] sm:$0xff]  ;;  %v3829_v6 = vld [vmem:[#allocation3 + $0x130] sm:$0xff] }
 0x165   :  { %v817_v47 = vadd.f32 1e-05, %v801_v46  ;;  %v1197_v49 = vpack.c.bf16 %v1184_v20, %v1183_v0  ;;  %v878_v50 = vmul.f32 %v4333_v11, %v862_v19  ;;  %v667_v34 = vpop.xlane.xlu0 %666  ;;  %v1059_v48 = vmul.f32 %v4486_v25, %v4486_v25 }
 0x166   :  { %v669_v22 = vpop.xlane.xlu1 %668  ;;  %1616 = vperm.xlu1 %3599, %v1574_v13   ;;  %1943 = vmatmul.mubr.bf16.gmra.mrb[20].mxu0 %v3605_v43  ;;  %v895_v9 = vadd.f32 %v4359_v7, %v879_v1  ;;  %v1060_v29 = vmul.f32 %v4480_v8, %v4480_v8  ;;  %v4504_v16 = vmul.f32 0.0078125, %v667_v34  ;;  %v1137_v42 = vsub.f32 %v3827_v56, %v4438_v58  ;;  %v1577_v58 = vld [vmem:[%s5508_s4 + $0x28] sm:$0xff] }
 0x167   :  { %3732 = vrsqrt.f32 %v817_v47  ;;  %2057 = vmatprep.subr.bf16.mxu1 %v1197_v49  ;;  %v894_v59 = vadd.f32 %v4359_v7, %v878_v50  ;;  %1606 = vperm.xlu0 %3598, %v1572_v3   ;;  %v4496_v35 = vmul.f32 0.0078125, %v669_v22  ;;  %v849_v5 = vsub.f32 %v3828_v54, %v4445_v30  ;;  %v1578_v22 = vld [vmem:[%s5508_s4 + $0x30] sm:$0xff] }
 0x168   :  { %3734 = vrsqrt.f32 %v816_v4  ;;  %1952 = vmatprep.mubr.bf16.mxu0 %v3926_v15  ;;  %v770_v63 = vmul.f32 %v4504_v16, %v4504_v16  ;;  %v848_v13 = vsub.f32 %v3829_v6, %v4450_v28  ;;  %v3607_v28 = vld [vmem:[%s5507_s3 + $0x38] sm:$0xff]  }
 0x169   :  { %v1020_v39 = vpop.xlane.xlu0 %1019  ;;  %v908_v18 = vpack.c.bf16 %v895_v9, %v894_v59  ;;  %v771_v60 = vmul.f32 %v4496_v35, %v4496_v35  ;;  %v1587_v59 = vld [vmem:[%s5508_s4 + $0x78] sm:$0xff] }
 0x16a   :  { %v1022_v52 = vpop.xlane.xlu1 %1021  ;;  %1621 = vperm.xlu1 %3599, %v1575_v23   ;;  %v1043_v21 = vmul.f32 0.0078125, %v1020_v39 }
 0x16b   :  { %v1044_v12 = vmul.f32 0.0078125, %v1022_v52  ;;  %1651 = vperm.xlu0 %3598, %v1581_v27   ;;  %2058 = vmatpush1.bf16.msra.mxu1 %v908_v18  ;;  %v1579_v18 = vld [vmem:[%s5508_s4 + $0x38] sm:$0xff] }
 0x16c   :  { %v1075_v40 = vsub.f32 %v1043_v21, %v1059_v48  ;;  %v1589_v48 = vld [vmem:[%s5508_s4 + $0x88] sm:$0xff] }
 0x16d   :  { %v3729_v55 = vpop.eup %3728  ;;  %v1076_v57 = vsub.f32 %v1044_v12, %v1060_v29  ;;  %v731_v62 = vpop.xlane.xlu0 %730 }
 0x16e   :  { %v3731_v10 = vpop.eup %3730  ;;  %v733_v37 = vpop.xlane.xlu1 %732  ;;  %v1154_v53 = vmul.f32 %v3729_v55, %v1138_v17  ;;  %1626 = vperm.xlu1 %3599, %v1576_v44   ;;  %v1091_v2 = vmax.f32 %v1075_v40, 0.0  ;;  %1953 = vmatmul.mubr.bf16.gmra.mrb[24].mxu0 %v3606_v51  ;;  %v754_v32 = vmul.f32 0.0078125, %v731_v62  ;;  %v3831_v62 = vld [vmem:[#allocation3 + $0x1c0] sm:$0xff] }
 0x16f   :  { %v1092_v61 = vmax.f32 %v1076_v57, 0.0  ;;  %v755_v24 = vmul.f32 0.0078125, %v733_v37  ;;  %v1153_v38 = vmul.f32 %v3731_v10, %v1137_v42  ;;  %1661 = vperm.xlu0 %3598, %v1583_v26   ;;  %1962 = vmatprep.mubr.bf16.mxu0 %v3926_v15  ;;  %v1580_v26 = vld [vmem:[%s5508_s4 + $0x40] sm:$0xff]  ;;  %v3830_v10 = vld [vmem:[#allocation3 + $0x1c8] sm:$0xff] }
 0x170   :  { %v1170_v41 = vmul.f32 %v4333_v11, %v1154_v53  ;;  %v1107_v14 = vadd.f32 1e-05, %v1091_v2  ;;  %v786_v43 = vsub.f32 %v754_v32, %v770_v63  ;;  %v1140_v40 = vsub.f32 %v3830_v10, %v4480_v8  ;;  %v1591_v8 = vld [vmem:[%s5508_s4 + $0x98] sm:$0xff] }
 0x171   :  { %v3733_v36 = vpop.eup %3732  ;;  %v1108_v33 = vadd.f32 1e-05, %v1092_v61  ;;  %v787_v20 = vsub.f32 %v755_v24, %v771_v60  ;;  %v1169_v46 = vmul.f32 %v4333_v11, %v1153_v38  ;;  %v960_v49 = vpop.xlane.xlu0 %959  ;;  %v3608_v61 = vld [vmem:[%s5507_s3 + $0x40] sm:$0xff]   ;;  %v1139_v38 = vsub.f32 %v3831_v62, %v4486_v25  ;;  %v1582_v25 = vld [vmem:[%s5508_s4 + $0x50] sm:$0xff] }
 0x172   :  { %v3735_v0 = vpop.eup %3734  ;;  %v962_v19 = vpop.xlane.xlu1 %961  ;;  %v1186_v47 = vadd.f32 %v4359_v7, %v1170_v41  ;;  %1631 = vperm.xlu1 %3599, %v1577_v58   ;;  %v865_v4 = vmul.f32 %v3733_v36, %v849_v5  ;;  %v802_v50 = vmax.f32 %v786_v43, 0.0  ;;  %v4546_v44 = vmul.f32 0.0078125, %v960_v49  ;;  %v1593_v49 = vld [vmem:[%s5508_s4 + $0xa8] sm:$0xff] }
 0x173   :  { %3736 = vrsqrt.f32 %v1108_v33  ;;  %v803_v30 = vmax.f32 %v787_v20, 0.0  ;;  %v1185_v3 = vadd.f32 %v4359_v7, %v1169_v46  ;;  %v864_v34 = vmul.f32 %v3735_v0, %v848_v13  ;;  %1671 = vperm.xlu0 %3598, %v1585_v31  }
 0x174   :  { %3738 = vrsqrt.f32 %v1107_v14  ;;  %v818_v9 = vadd.f32 1e-05, %v802_v50  ;;  %v4540_v29 = vmul.f32 0.0078125, %v962_v19  ;;  %v881_v39 = vmul.f32 %v4333_v11, %v865_v4  ;;  %v3832_v14 = vld [vmem:[#allocation3 + $0x148] sm:$0xff]  ;;  %v3833_v4 = vld [vmem:[#allocation3 + $0x140] sm:$0xff] }
 0x175   :  { %v819_v1 = vadd.f32 1e-05, %v803_v30  ;;  %v1198_v23 = vpack.c.bf16 %v1186_v47, %v1185_v3  ;;  %v880_v52 = vmul.f32 %v4333_v11, %v864_v34  ;;  %v671_v12 = vpop.xlane.xlu0 %670  ;;  %v1061_v37 = vmul.f32 %v4546_v44, %v4546_v44 }
 0x176   :  { %v673_v27 = vpop.xlane.xlu1 %672  ;;  %1636 = vperm.xlu1 %3599, %v1578_v22   ;;  %1963 = vmatmul.mubr.bf16.gmra.mrb[28].mxu0 %v3607_v28  ;;  %v897_v17 = vadd.f32 %v4359_v7, %v881_v39  ;;  %v1062_v51 = vmul.f32 %v4540_v29, %v4540_v29  ;;  %v4564_v53 = vmul.f32 0.0078125, %v671_v12  ;;  %v851_v43 = vsub.f32 %v3832_v14, %v4496_v35 }
 0x177   :  { %3740 = vrsqrt.f32 %v819_v1  ;;  %2059 = vmatprep.subr.bf16.mxu1 %v1198_v23  ;;  %v896_v45 = vadd.f32 %v4359_v7, %v880_v52  ;;  %1681 = vperm.xlu0 %3598, %v1587_v59   ;;  %v4556_v55 = vmul.f32 0.0078125, %v673_v27  ;;  %v850_v22 = vsub.f32 %v3833_v4, %v4504_v16  ;;  %v1584_v27 = vld [vmem:[%s5508_s4 + $0x60] sm:$0xff]  ;;  %v4596_v16 = vld [vmem:[%s5507_s3 + $0x48] sm:$0xff]  }
 0x178   :  { %3742 = vrsqrt.f32 %v818_v9  ;;  %1972 = vmatprep.mubr.bf16.mxu0 %v3926_v15  ;;  %v772_v46 = vmul.f32 %v4564_v53, %v4564_v53 }
 0x179   :  { %v1024_v42 = vpop.xlane.xlu0 %1023  ;;  %v909_v57 = vpack.c.bf16 %v897_v17, %v896_v45  ;;  %v773_v36 = vmul.f32 %v4556_v55, %v4556_v55  ;;  %v1595_v45 = vld [vmem:[%s5508_s4 + $0xb8] sm:$0xff] }
 0x17a   :  { %v1026_v21 = vpop.xlane.xlu1 %1025  ;;  %1641 = vperm.xlu1 %3599, %v1579_v18   ;;  %v1045_v60 = vmul.f32 0.0078125, %v1024_v42 }
 0x17b   :  { %v1046_v56 = vmul.f32 0.0078125, %v1026_v21  ;;  %1691 = vperm.xlu0 %3598, %v1589_v48   ;;  %2060 = vmatpush1.bf16.msra.mxu1 %v909_v57  ;;  %v1586_v57 = vld [vmem:[%s5508_s4 + $0x70] sm:$0xff] }
 0x17c   :  { %v1077_v2 = vsub.f32 %v1045_v60, %v1061_v37  ;;  %v1597_v37 = vld [vmem:[%s5508_s4 + $0xc8] sm:$0xff] }
 0x17d   :  { %v3737_v24 = vpop.eup %3736  ;;  %v1078_v58 = vsub.f32 %v1046_v56, %v1062_v51  ;;  %v735_v33 = vpop.xlane.xlu0 %734 }
 0x17e   :  { %v3739_v63 = vpop.eup %3738  ;;  %v737_v32 = vpop.xlane.xlu1 %736  ;;  %v1156_v41 = vmul.f32 %v3737_v24, %v1140_v40  ;;  %1646 = vperm.xlu1 %3599, %v1580_v26   ;;  %v1093_v31 = vmax.f32 %v1077_v2, 0.0  ;;  %1973 = vmatmul.mubr.bf16.gmra.mrb[32].mxu0 %v3608_v61  ;;  %v756_v0 = vmul.f32 0.0078125, %v735_v33  ;;  %v3835_v33 = vld [vmem:[#allocation3 + $0x1d0] sm:$0xff] }
 0x17f   :  { %v1094_v54 = vmax.f32 %v1078_v58, 0.0  ;;  %v757_v5 = vmul.f32 0.0078125, %v737_v32  ;;  %v1155_v20 = vmul.f32 %v3739_v63, %v1139_v38  ;;  %1701 = vperm.xlu0 %3598, %v1591_v8   ;;  %1982 = vmatprep.mubr.bf16.mxu0 %v3926_v15  ;;  %v1588_v8 = vld [vmem:[%s5508_s4 + $0x80] sm:$0xff]  ;;  %v3834_v63 = vld [vmem:[#allocation3 + $0x1d8] sm:$0xff] }
 0x180   :  { %v1172_v6 = vmul.f32 %v4333_v11, %v1156_v41  ;;  %v1109_v50 = vadd.f32 1e-05, %v1093_v31  ;;  %v788_v28 = vsub.f32 %v756_v0, %v772_v46  ;;  %v1142_v2 = vsub.f32 %v3834_v63, %v4540_v29  ;;  %v1599_v29 = vld [vmem:[%s5508_s4 + $0xd8] sm:$0xff] }
 0x181   :  { %v3741_v13 = vpop.eup %3740  ;;  %v1110_v19 = vadd.f32 1e-05, %v1094_v54  ;;  %v789_v47 = vsub.f32 %v757_v5, %v773_v36  ;;  %v1171_v30 = vmul.f32 %v4333_v11, %v1155_v20  ;;  %v964_v23 = vpop.xlane.xlu0 %963  ;;  %v4632_v54 = vld [vmem:[%s5507_s3 + $0x50] sm:$0xff]   ;;  %v1141_v20 = vsub.f32 %v3835_v33, %v4546_v44 }
 0x182   :  { %v3743_v3 = vpop.eup %3742  ;;  %v966_v34 = vpop.xlane.xlu1 %965  ;;  %v1188_v1 = vadd.f32 %v4359_v7, %v1172_v6  ;;  %1656 = vperm.xlu1 %3599, %v1582_v25   ;;  %v867_v9 = vmul.f32 %v3741_v13, %v851_v43  ;;  %v804_v52 = vmax.f32 %v788_v28, 0.0  ;;  %v4608_v26 = vmul.f32 0.0078125, %v964_v23  ;;  %v1590_v44 = vld [vmem:[%s5508_s4 + $0x90] sm:$0xff] }
 0x183   :  { %3744 = vrsqrt.f32 %v1110_v19  ;;  %v805_v35 = vmax.f32 %v789_v47, 0.0  ;;  %v1187_v59 = vadd.f32 %v4359_v7, %v1171_v30  ;;  %v866_v12 = vmul.f32 %v3743_v3, %v850_v22  ;;  %1711 = vperm.xlu0 %3598, %v1593_v49  }
 0x184   :  { %3746 = vrsqrt.f32 %v1109_v50  ;;  %v820_v17 = vadd.f32 1e-05, %v804_v52  ;;  %v4602_v51 = vmul.f32 0.0078125, %v966_v34  ;;  %v883_v42 = vmul.f32 %v4333_v11, %v867_v9  ;;  %v3836_v50 = vld [vmem:[#allocation3 + $0x158] sm:$0xff]  ;;  %v3838_v9 = vld [vmem:[#allocation3 + $0x150] sm:$0xff] }
 0x185   :  { %v821_v39 = vadd.f32 1e-05, %v805_v35  ;;  %v1199_v18 = vpack.c.bf16 %v1188_v1, %v1187_v59  ;;  %v882_v21 = vmul.f32 %v4333_v11, %v866_v12  ;;  %v675_v56 = vpop.xlane.xlu0 %674  ;;  %v1063_v32 = vmul.f32 %v4608_v26, %v4608_v26  ;;  %v4652_v35 = vld [vmem:[%s5505_s1] ss:$0 sm:$0xff] }
 0x186   :  { %v677_v48 = vpop.xlane.xlu1 %676  ;;  %1666 = vperm.xlu1 %3599, %v1584_v27   ;;  %1983 = vmatmul.mubr.bf16.gmra.mrb[36].mxu0 %v4596_v16  ;;  %v899_v40 = vadd.f32 %v4359_v7, %v883_v42  ;;  %v1064_v61 = vmul.f32 %v4602_v51, %v4602_v51  ;;  %v4627_v41 = vmul.f32 0.0078125, %v675_v56  ;;  %v853_v28 = vsub.f32 %v3836_v50, %v4556_v55 }
 0x187   :  { %3748 = vrsqrt.f32 %v821_v39  ;;  %2061 = vmatprep.subr.bf16.mxu1 %v1199_v18  ;;  %v898_v10 = vadd.f32 %v4359_v7, %v882_v21  ;;  %1721 = vperm.xlu0 %3598, %v1595_v45   ;;  %v4619_v24 = vmul.f32 0.0078125, %v677_v48  ;;  %v852_v27 = vsub.f32 %v3838_v9, %v4564_v53  ;;  %v1592_v21 = vld [vmem:[%s5508_s4 + $0xa0] sm:$0xff]  ;;  %v4667_v53 = vld [vmem:[%s5507_s3 + $0x58] sm:$0xff]  }
 0x188   :  { %3750 = vrsqrt.f32 %v820_v17  ;;  %1992 = vmatprep.mubr.bf16.mxu0 %v3926_v15  ;;  %v774_v30 = vmul.f32 %v4627_v41, %v4627_v41 }
 0x189   :  { %v1028_v38 = vpop.xlane.xlu0 %1027  ;;  %v910_v58 = vpack.c.bf16 %v899_v40, %v898_v10  ;;  %v775_v13 = vmul.f32 %v4619_v24, %v4619_v24  ;;  %v1603_v40 = vld [vmem:[%s5508_s4 + $0xf8] sm:$0xff] }
 0x18a   :  { %v1030_v60 = vpop.xlane.xlu1 %1029  ;;  %1676 = vperm.xlu1 %3599, %v1586_v57   ;;  %v1047_v36 = vmul.f32 0.0078125, %v1028_v38 }
 0x18b   :  { %v1048_v62 = vmul.f32 0.0078125, %v1030_v60  ;;  %1731 = vperm.xlu0 %3598, %v1597_v37   ;;  %2062 = vmatpush1.bf16.msra.mxu1 %v910_v58 }
 0x18c   :  { %v1079_v31 = vsub.f32 %v1047_v36, %v1063_v32  ;;  %v2664_v36 = vld [vmem:[%s5510_s6 + $0x8] sm:$0xff] }
 0x18d   :  { %v3745_v5 = vpop.eup %3744  ;;  %v1080_v25 = vsub.f32 %v1048_v62, %v1064_v61  ;;  %v739_v19 = vpop.xlane.xlu0 %738 }
 0x18e   :  { %v3747_v46 = vpop.eup %3746  ;;  %v741_v0 = vpop.xlane.xlu1 %740  ;;  %v1158_v6 = vmul.f32 %v3745_v5, %v1142_v2  ;;  %1686 = vperm.xlu1 %3599, %v1588_v8   ;;  %v1095_v49 = vmax.f32 %v1079_v31, 0.0  ;;  %1993 = vmatmul.mubr.bf16.gmra.mrb[40].mxu0 %v4632_v54  ;;  %v758_v3 = vmul.f32 0.0078125, %v739_v19  ;;  %v1594_v8 = vld [vmem:[%s5508_s4 + $0xb0] sm:$0xff]  ;;  %v3839_v31 = vld [vmem:[#allocation3 + $0x1e8] sm:$0xff] }
 0x18f   :  { %v1096_v14 = vmax.f32 %v1080_v25, 0.0  ;;  %v759_v43 = vmul.f32 0.0078125, %v741_v0  ;;  %v1157_v47 = vmul.f32 %v3747_v46, %v1141_v20  ;;  %1741 = vperm.xlu0 %3598, %v1599_v29   ;;  %2002 = vmatprep.mubr.bf16.mxu0 %v3926_v15  ;;  %v1144_v0 = vsub.f32 %v3839_v31, %v4602_v51  ;;  %v2666_v51 = vld [vmem:[%s5510_s6 + $0x18] sm:$0xff] }
 0x190   :  { %v1174_v4 = vmul.f32 %v4333_v11, %v1158_v6  ;;  %v1601_v11 = vld [vmem:[%s5508_s4 + $0xe8] sm:$0xff]  ;;  %v1111_v55 = vadd.f32 1e-05, %v1095_v49  ;;  %v790_v52 = vsub.f32 %v758_v3, %v774_v30 }
 0x191   :  { %v3749_v22 = vpop.eup %3748  ;;  %v1112_v34 = vadd.f32 1e-05, %v1096_v14  ;;  %v791_v1 = vsub.f32 %v759_v43, %v775_v13  ;;  %v1173_v23 = vmul.f32 %v4652_v35, %v1157_v47  ;;  %v968_v45 = vpop.xlane.xlu0 %967  ;;  %v4703_v43 = vld [vmem:[%s5507_s3 + $0x60] sm:$0xff]   ;;  %v3841_v3 = vld [vmem:[#allocation3 + $0x168] sm:$0xff] }
 0x192   :  { %v3751_v59 = vpop.eup %3750  ;;  %v970_v12 = vpop.xlane.xlu1 %969  ;;  %v1190_v39 = vadd.f32 %v4359_v7, %v1174_v4  ;;  %1696 = vperm.xlu1 %3599, %v1590_v44   ;;  %v869_v48 = vmul.f32 %v3749_v22, %v853_v28  ;;  %v806_v56 = vmax.f32 %v790_v52, 0.0  ;;  %v4679_v63 = vmul.f32 0.0078125, %v968_v45  ;;  %v3840_v47 = vld [vmem:[#allocation3 + $0x1e0] sm:$0xff] }
 0x193   :  { %3752 = vrsqrt.f32 %v1112_v34  ;;  %v807_v18 = vmax.f32 %v791_v1, 0.0  ;;  %v1189_v17 = vadd.f32 %v4359_v7, %v1173_v23  ;;  %v868_v42 = vmul.f32 %v3751_v59, %v852_v27  ;;  %1751 = vperm.xlu0 %3598, %v1601_v11   ;;  %v1598_v59 = vld [vmem:[%s5508_s4 + $0xd0] sm:$0xff] }
 0x194   :  { %3754 = vrsqrt.f32 %v1111_v55  ;;  %v822_v37 = vadd.f32 1e-05, %v806_v56  ;;  %v4673_v62 = vmul.f32 0.0078125, %v970_v12  ;;  %v885_v58 = vmul.f32 %v4652_v35, %v869_v48  ;;  %v3842_v12 = vld [vmem:[#allocation3 + $0x160] sm:$0xff]  ;;  %v2668_v48 = vld [vmem:[%s5510_s6 + $0x28] sm:$0xff] }
 0x195   :  { %v823_v57 = vadd.f32 1e-05, %v807_v18  ;;  %v1200_v10 = vpack.c.bf16 %v1190_v39, %v1189_v17  ;;  %v884_v61 = vmul.f32 %v4652_v35, %v868_v42  ;;  %v679_v38 = vpop.xlane.xlu0 %678  ;;  %v1065_v6 = vmul.f32 %v4679_v63, %v4679_v63 }
 0x196   :  { %v681_v60 = vpop.xlane.xlu1 %680  ;;  %1706 = vperm.xlu1 %3599, %v1592_v21   ;;  %2003 = vmatmul.mubr.bf16.gmra.mrb[44].mxu0 %v4667_v53  ;;  %v901_v32 = vadd.f32 %v4359_v7, %v885_v58  ;;  %v1066_v33 = vmul.f32 %v4673_v62, %v4673_v62  ;;  %v4698_v13 = vmul.f32 0.0078125, %v679_v38  ;;  %v1143_v44 = vsub.f32 %v3840_v47, %v4608_v26  ;;  %v1600_v58 = vld [vmem:[%s5508_s4 + $0xe0] sm:$0xff] }
 0x197   :  { %3756 = vrsqrt.f32 %v823_v57  ;;  %2063 = vmatprep.subr.bf16.mxu1 %v1200_v10  ;;  %v900_v2 = vadd.f32 %v4359_v7, %v884_v61  ;;  %1761 = vperm.xlu0 %3598, %v1603_v40   ;;  %v4690_v20 = vmul.f32 0.0078125, %v681_v60  ;;  %v1596_v7 = vld [vmem:[%s5508_s4 + $0xc0] sm:$0xff]  ;;  %v855_v4 = vsub.f32 %v3841_v3, %v4619_v24  ;;  %v2672_v3 = vld [vmem:[%s5510_s6 + $0x48] sm:$0xff] }
 0x198   :  { %3758 = vrsqrt.f32 %v822_v37  ;;  %2012 = vmatprep.mubr.bf16.mxu0 %v3926_v15  ;;  %v776_v9 = vmul.f32 %v4698_v13, %v4698_v13  ;;  %v854_v39 = vsub.f32 %v3842_v12, %v4627_v41  ;;  %v4728_v10 = vld [vmem:[%s5506_s2] ss:$0 sm:$0xff] }
 0x199   :  { %v1032_v29 = vpop.xlane.xlu0 %1031  ;;  %v911_v46 = vpack.c.bf16 %v901_v32, %v900_v2  ;;  %v777_v34 = vmul.f32 %v4690_v20, %v4690_v20  ;;  %v4742_v32 = vld [vmem:[%s5507_s3 + $0x68] sm:$0xff]  }
 0x19a   :  { %v1034_v5 = vpop.xlane.xlu1 %1033  ;;  %1716 = vperm.xlu1 %3599, %v1594_v8   ;;  %v1049_v14 = vmul.f32 0.0078125, %v1032_v29 }
 0x19b   :  { %v1050_v25 = vmul.f32 0.0078125, %v1034_v5  ;;  %2686 = vperm.xlu0 %3598, %v2664_v36   ;;  %2064 = vmatpush1.bf16.msra.mxu1 %v911_v46 }
 0x19c   :  { %v1081_v22 = vsub.f32 %v1049_v14, %v1065_v6 }
 0x19d   :  { %v3753_v19 = vpop.eup %3752  ;;  %v1082_v30 = vsub.f32 %v1050_v25, %v1066_v33  ;;  %v743_v26 = vpop.xlane.xlu0 %742  ;;  %v2670_v25 = vld [vmem:[%s5510_s6 + $0x38] sm:$0xff] }
 0x19e   :  { %v3755_v49 = vpop.eup %3754  ;;  %v745_v50 = vpop.xlane.xlu1 %744  ;;  %v1160_v28 = vmul.f32 %v3753_v19, %v1144_v0  ;;  %1726 = vperm.xlu1 %3599, %v1596_v7   ;;  %v1097_v27 = vmax.f32 %v1081_v22, 0.0  ;;  %2013 = vmatmul.mubr.bf16.gmra.mrb[48].mxu0 %v4703_v43  ;;  %v760_v24 = vmul.f32 0.0078125, %v743_v26  ;;  %v1602_v19 = vld [vmem:[%s5508_s4 + $0xf0] sm:$0xff]  ;;  %v3844_v26 = vld [vmem:[#allocation3 + $0x1f8] sm:$0xff] }
 0x19f   :  { %v1098_v1 = vmax.f32 %v1082_v30, 0.0  ;;  %v761_v23 = vmul.f32 0.0078125, %v745_v50  ;;  %v1159_v11 = vmul.f32 %v3755_v49, %v1143_v44  ;;  %2696 = vperm.xlu0 %3598, %v2666_v51   ;;  %2022 = vmatprep.mubr.bf16.mxu0 %v3926_v15 }
 0x1a0   :  { %v1176_v55 = vmul.f32 %v4652_v35, %v1160_v28  ;;  %v1113_v56 = vadd.f32 1e-05, %v1097_v27  ;;  %v792_v42 = vsub.f32 %v760_v24, %v776_v9  ;;  %v4774_v27 = vld [vmem:[%s5507_s3 + $0x70] sm:$0xff]  }
 0x1a1   :  { %v3757_v52 = vpop.eup %3756  ;;  %v1114_v18 = vadd.f32 1e-05, %v1098_v1  ;;  %v793_v45 = vsub.f32 %v761_v23, %v777_v34  ;;  %v1175_v17 = vmul.f32 %v4652_v35, %v1159_v11  ;;  %v1229_v61 = vpop.xlane.xlu0 %1228  ;;  %v2663_v23 = vld [vmem:[%s5510_s6] sm:$0xff]  ;;  %v1146_v11 = vsub.f32 %v3844_v26, %v4673_v62 }
 0x1a2   :  { %v3759_v21 = vpop.eup %3758  ;;  %v1231_v57 = vpop.xlane.xlu1 %1230  ;;  %v1192_v41 = vadd.f32 %v4728_v10, %v1176_v55  ;;  %v871_v40 = vmul.f32 %v3757_v52, %v855_v4  ;;  %1736 = vperm.xlu1 %3599, %v1598_v59   ;;  %v808_v8 = vmax.f32 %v792_v42, 0.0  ;;  %v4737_v2 = vmul.f32 0.0078125, %v1229_v61  ;;  %v3845_v55 = vld [vmem:[#allocation3 + $0x1f0] sm:$0xff] }
 0x1a3   :  { %3760 = vrsqrt.f32 %v1114_v18  ;;  %v809_v37 = vmax.f32 %v793_v45, 0.0  ;;  %v4731_v60 = vmul.f32 0.0078125, %v1231_v57  ;;  %v1191_v38 = vadd.f32 %v4728_v10, %v1175_v17  ;;  %2706 = vperm.xlu0 %3598, %v2668_v48   ;;  %v3846_v18 = vld [vmem:[#allocation3 + $0x178] sm:$0xff] }
 0x1a4   :  { %3762 = vrsqrt.f32 %v1113_v56  ;;  %v870_v36 = vmul.f32 %v3759_v21, %v854_v39  ;;  %v824_v29 = vadd.f32 1e-05, %v808_v8  ;;  %v887_v14 = vmul.f32 %v4652_v35, %v871_v40  ;;  %v2674_v39 = vld [vmem:[%s5510_s6 + $0x58] sm:$0xff] }
 0x1a5   :  { %v825_v5 = vadd.f32 1e-05, %v809_v37  ;;  %v1201_v33 = vpack.c.bf16 %v1192_v41, %v1191_v38  ;;  %v1341_v31 = vmul.f32 %v4731_v60, %v4731_v60  ;;  %v1293_v6 = vpop.xlane.xlu0 %1292  ;;  %v1340_v47 = vmul.f32 %v4737_v2, %v4737_v2  ;;  %v2665_v41 = vld [vmem:[%s5510_s6 + $0x10] sm:$0xff] }
 0x1a6   :  { %v1295_v46 = vpop.xlane.xlu1 %1294  ;;  %v886_v7 = vmul.f32 %v4652_v35, %v870_v36  ;;  %1746 = vperm.xlu1 %3599, %v1600_v58   ;;  %2023 = vmatmul.mubr.bf16.gmra.mrb[52].mxu0 %v4742_v32  ;;  %v1324_v44 = vmul.f32 0.0078125, %v1293_v6  ;;  %v903_v49 = vadd.f32 %v4728_v10, %v887_v14  ;;  %v1145_v52 = vsub.f32 %v3845_v55, %v4679_v63  ;;  %v3847_v38 = vld [vmem:[#allocation3 + $0x170] sm:$0xff] }
 0x1a7   :  { %3764 = vrsqrt.f32 %v825_v5  ;;  %v1325_v0 = vmul.f32 0.0078125, %v1295_v46  ;;  %2065 = vmatprep.subr.bf16.mxu1 %v1201_v33  ;;  %2716 = vperm.xlu0 %3598, %v2670_v25   ;;  %v857_v45 = vsub.f32 %v3846_v18, %v4690_v20  ;;  %v856_v58 = vsub.f32 %v3847_v38, %v4698_v13  ;;  %v2676_v5 = vld [vmem:[%s5510_s6 + $0x68] sm:$0xff]  ;;  %v2669_v55 = vld [vmem:[%s5510_s6 + $0x30] sm:$0xff] }
 0x1a8   :  { %3766 = vrsqrt.f32 %v824_v29  ;;  %v902_v30 = vadd.f32 %v4728_v10, %v886_v7  ;;  %2032 = vmatprep.mubr.bf16.mxu0 %v3926_v15  ;;  %v1356_v4 = vsub.f32 %v1324_v44, %v1340_v47 }
 0x1a9   :  { %v1357_v51 = vsub.f32 %v1325_v0, %v1341_v31  ;;  %v1233_v34 = vpop.xlane.xlu0 %1232 }
 0x1aa   :  { %v1235_v22 = vpop.xlane.xlu1 %1234  ;;  %1756 = vperm.xlu1 %3599, %v1602_v19   ;;  %v912_v1 = vpack.c.bf16 %v903_v49, %v902_v30  ;;  %v1372_v59 = vmax.f32 %v1356_v4, 0.0  ;;  %v4769_v9 = vmul.f32 0.0078125, %v1233_v34  ;;  %v2667_v19 = vld [vmem:[%s5510_s6 + $0x20] sm:$0xff]  ;;  %v4808_v30 = vld [vmem:[%s5507_s3 + $0x78] sm:$0xff]  }
 0x1ab   :  { %v1373_v50 = vmax.f32 %v1357_v51, 0.0  ;;  %v4763_v28 = vmul.f32 0.0078125, %v1235_v22  ;;  %2726 = vperm.xlu0 %3598, %v2672_v3   ;;  %v2678_v4 = vld [vmem:[%s5510_s6 + $0x78] sm:$0xff]  ;;  %v3848_v22 = vld [vmem:[#allocation3 + $0x208] sm:$0xff] }
 0x1ac   :  { %2066 = vmatpush1.bf16.msra.mxu1 %v912_v1  ;;  %v1388_v17 = vadd.f32 1e-05, %v1372_v59  ;;  %v1342_v40 = vmul.f32 %v4769_v9, %v4769_v9 }
 0x1ad   :  { %v3761_v24 = vpop.eup %3760  ;;  %v1389_v12 = vadd.f32 1e-05, %v1373_v50  ;;  %v1343_v56 = vmul.f32 %v4763_v28, %v4763_v28  ;;  %v1297_v63 = vpop.xlane.xlu0 %1296  ;;  %v1421_v50 = vsub.f32 %v3848_v22, %v4731_v60 }
 0x1ae   :  { %v3763_v62 = vpop.eup %3762  ;;  %v1299_v48 = vpop.xlane.xlu1 %1298  ;;  %v1162_v21 = vmul.f32 %v3761_v24, %v1146_v11  ;;  %2681 = vperm.xlu1 %3599, %v2663_v23   ;;  %2033 = vmatmul.mubr.bf16.gmra.mrb[56].mxu0 %v4774_v27  ;;  %v1326_v20 = vmul.f32 0.0078125, %v1297_v63 }
 0x1af   :  { %3768 = vrsqrt.f32 %v1389_v12  ;;  %v1327_v42 = vmul.f32 0.0078125, %v1299_v48  ;;  %v1161_v57 = vmul.f32 %v3763_v62, %v1145_v52  ;;  %2736 = vperm.xlu0 %3598, %v2674_v39   ;;  %2042 = vmatprep.mubr.bf16.mxu0 %v3926_v15  ;;  %v3849_v62 = vld [vmem:[#allocation3 + $0x200] sm:$0xff] }
 0x1b0   :  { %3770 = vrsqrt.f32 %v1388_v17  ;;  %v1178_v37 = vmul.f32 %v4652_v35, %v1162_v21  ;;  %v1358_v25 = vsub.f32 %v1326_v20, %v1342_v40  ;;  %v1420_v18 = vsub.f32 %v3849_v62, %v4737_v2  ;;  %v3850_v17 = vld [vmem:[%s5507_s3] sm:$0xff]  }
 0x1b1   :  { %v3765_v61 = vpop.eup %3764  ;;  %v1359_v8 = vsub.f32 %v1327_v42, %v1343_v56  ;;  %v1177_v36 = vmul.f32 %v4652_v35, %v1161_v57  ;;  %v1237_v13 = vpop.xlane.xlu0 %1236  ;;  %v2671_v2 = vld [vmem:[%s5510_s6 + $0x40] sm:$0xff] }
 0x1b2   :  { %v3767_v33 = vpop.eup %3766  ;;  %v1239_v29 = vpop.xlane.xlu1 %1238  ;;  %v1194_v46 = vadd.f32 %v4728_v10, %v1178_v37  ;;  %v873_v7 = vmul.f32 %v3765_v61, %v857_v45  ;;  %2691 = vperm.xlu1 %3599, %v2665_v41   ;;  %v1374_v47 = vmax.f32 %v1358_v25, 0.0  ;;  %v4803_v44 = vmul.f32 0.0078125, %v1237_v13  ;;  %v3851_v13 = vld [vmem:[#allocation3 + $0x218] sm:$0xff] }
 0x1b3   :  { %v1375_v31 = vmax.f32 %v1359_v8, 0.0  ;;  %v4797_v0 = vmul.f32 0.0078125, %v1239_v29  ;;  %v1193_v6 = vadd.f32 %v4728_v10, %v1177_v36  ;;  %v872_v14 = vmul.f32 %v3767_v33, %v856_v58  ;;  %2746 = vperm.xlu0 %3598, %v2676_v5  }
 0x1b4   :  { %v889_v51 = vmul.f32 %v4652_v35, %v873_v7  ;;  %v1390_v34 = vadd.f32 1e-05, %v1374_v47  ;;  %v1344_v60 = vmul.f32 %v4803_v44, %v4803_v44 }
 0x1b5   :  { %v1391_v49 = vadd.f32 1e-05, %v1375_v31  ;;  %v1202_v3 = vpack.c.bf16 %v1194_v46, %v1193_v6  ;;  %v888_v23 = vmul.f32 %v4652_v35, %v872_v14  ;;  %v1345_v26 = vmul.f32 %v4797_v0, %v4797_v0  ;;  %v1301_v59 = vpop.xlane.xlu0 %1300  ;;  %v2673_v31 = vld [vmem:[%s5510_s6 + $0x50] sm:$0xff] }
 0x1b6   :  { %v1303_v1 = vpop.xlane.xlu1 %1302  ;;  %2701 = vperm.xlu1 %3599, %v2667_v19   ;;  %v905_v24 = vadd.f32 %v4728_v10, %v889_v51  ;;  %2043 = vmatmul.mubr.bf16.gmra.mrb[60].mxu0 %v4808_v30  ;;  %v1328_v52 = vmul.f32 0.0078125, %v1301_v59  ;;  %v1423_v6 = vsub.f32 %v3851_v13, %v4763_v28  ;;  %v3852_v51 = vld [vmem:[#allocation3 + $0x210] sm:$0xff]  ;;  %v2675_v59 = vld [vmem:[%s5510_s6 + $0x60] sm:$0xff] }
 0x1b7   :  { %3772 = vrsqrt.f32 %v1391_v49  ;;  %v1329_v11 = vmul.f32 0.0078125, %v1303_v1  ;;  %2067 = vmatprep.subr.bf16.mxu1 %v1202_v3  ;;  %v904_v12 = vadd.f32 %v4728_v10, %v888_v23  ;;  %2756 = vperm.xlu0 %3598, %v2678_v4   ;;  %v1422_v49 = vsub.f32 %v3852_v51, %v4769_v9 }
 0x1b8   :  { %3774 = vrsqrt.f32 %v1390_v34  ;;  %3561 = vmatprep.mubr.bf16.mxu0 %v3850_v17  ;;  %v1360_v21 = vsub.f32 %v1328_v52, %v1344_v60 }
 0x1b9   :  { %v3769_v39 = vpop.eup %3768  ;;  %v1361_v45 = vsub.f32 %v1329_v11, %v1345_v26  ;;  %v913_v42 = vpack.c.bf16 %v905_v24, %v904_v12  ;;  %v1241_v40 = vpop.xlane.xlu0 %1240 }
 0x1ba   :  { %v3771_v48 = vpop.eup %3770  ;;  %v1243_v56 = vpop.xlane.xlu1 %1242  ;;  %v1437_v63 = vmul.f32 %v3769_v39, %v1421_v50  ;;  %2711 = vperm.xlu1 %3599, %v2669_v55   ;;  %v1376_v37 = vmax.f32 %v1360_v21, 0.0  ;;  %v4835_v61 = vmul.f32 0.0078125, %v1241_v40 }
 0x1bb   :  { %v1377_v57 = vmax.f32 %v1361_v45, 0.0  ;;  %v4830_v41 = vmul.f32 0.0078125, %v1243_v56  ;;  %v1436_v20 = vmul.f32 %v3771_v48, %v1420_v18  ;;  %2068 = vmatpush1.bf16.msra.mxu1 %v913_v42  ;;  %v4866_v45 = vld [vmem:[%s5507_s3 + $0x8] sm:$0xff]   ;;  %v2677_v56 = vld [vmem:[%s5510_s6 + $0x70] sm:$0xff] }
 0x1bc   :  { %v1453_v38 = vmul.f32 %v4652_v35, %v1437_v63  ;;  %v1392_v36 = vadd.f32 1e-05, %v1376_v37  ;;  %v1346_v14 = vmul.f32 %v4835_v61, %v4835_v61  ;;  %v3854_v42 = vld [vmem:[#allocation3 + $0x228] sm:$0xff] }
 0x1bd   :  { %v1393_v58 = vadd.f32 1e-05, %v1377_v57  ;;  %v1452_v8 = vmul.f32 %v4652_v35, %v1436_v20  ;;  %v1347_v25 = vmul.f32 %v4830_v41, %v4830_v41  ;;  %v1305_v46 = vpop.xlane.xlu0 %1304  ;;  %v1425_v63 = vsub.f32 %v3854_v42, %v4797_v0 }
 0x1be   :  { %v1307_v5 = vpop.xlane.xlu1 %1306  ;;  %v1469_v33 = vadd.f32 %v4728_v10, %v1453_v38  ;;  %2721 = vperm.xlu1 %3599, %v2671_v2   ;;  %2086 = vmatmul.mubr.bf16.vlgmr.msra.gmra.mrb[0].mxu1 %v3850_v17  ;;  %v1330_v19 = vmul.f32 0.0078125, %v1305_v46  ;;  %v3855_v2 = vld [vmem:[#allocation3 + $0x220] sm:$0xff] }
 0x1bf   :  { %3776 = vrsqrt.f32 %v1393_v58  ;;  %v1331_v29 = vmul.f32 0.0078125, %v1307_v5  ;;  %v1468_v7 = vadd.f32 %v4728_v10, %v1452_v8  ;;  %2095 = vmatprep.mubr.bf16.mxu1 %v3926_v15  ;;  %v1424_v37 = vsub.f32 %v3855_v2, %v4803_v44  ;;  %v4911_v2 = vld [vmem:[%s5507_s3 + $0x18] sm:$0xff]  }
 0x1c0   :  { %3778 = vrsqrt.f32 %v1392_v36  ;;  %v1362_v50 = vsub.f32 %v1330_v19, %v1346_v14 }
 0x1c1   :  { %v3773_v47 = vpop.eup %3772  ;;  %v1363_v3 = vsub.f32 %v1331_v29, %v1347_v25  ;;  %v1484_v4 = vpack.c.bf16 %v1469_v33, %v1468_v7  ;;  %v1245_v26 = vpop.xlane.xlu0 %1244 }
 0x1c2   :  { %v3775_v22 = vpop.eup %3774  ;;  %v1247_v34 = vpop.xlane.xlu1 %1246  ;;  %v1439_v1 = vmul.f32 %v3773_v47, %v1423_v6  ;;  %2731 = vperm.xlu1 %3599, %v2673_v31   ;;  %v1378_v24 = vmax.f32 %v1362_v50, 0.0  ;;  %v4856_v55 = vmul.f32 0.0078125, %v1245_v26  ;;  %v3857_v50 = vld [vmem:[#allocation3 + $0x238] sm:$0xff] }
 0x1c3   :  { %v1379_v23 = vmax.f32 %v1363_v3, 0.0  ;;  %v4851_v28 = vmul.f32 0.0078125, %v1247_v34  ;;  %3545 = vmatprep.subr.bf16.mxu0 %v1484_v4  ;;  %v1438_v11 = vmul.f32 %v3775_v22, %v1422_v49  ;;  %v4890_v49 = vld [vmem:[%s5507_s3 + $0x10] sm:$0xff]   ;;  %v1427_v34 = vsub.f32 %v3857_v50, %v4830_v41 }
 0x1c4   :  { %3546 = vmatpush3.bf16.msra.mxu0 %v1484_v4  ;;  %v1455_v9 = vmul.f32 %v4652_v35, %v1439_v1  ;;  %v1394_v12 = vadd.f32 1e-05, %v1378_v24  ;;  %v1348_v57 = vmul.f32 %v4856_v55, %v4856_v55 }
 0x1c5   :  { %v1395_v60 = vadd.f32 1e-05, %v1379_v23  ;;  %v1454_v52 = vmul.f32 %v4652_v35, %v1438_v11  ;;  %v1349_v18 = vmul.f32 %v4851_v28, %v4851_v28  ;;  %v1309_v48 = vpop.xlane.xlu0 %1308  ;;  %v3858_v11 = vld [vmem:[#allocation3 + $0x230] sm:$0xff] }
 0x1c6   :  { %v1311_v39 = vpop.xlane.xlu1 %1310  ;;  %v1471_v62 = vadd.f32 %v4728_v10, %v1455_v9  ;;  %2741 = vperm.xlu1 %3599, %v2675_v59   ;;  %2096 = vmatmul.mubr.bf16.gmra.mrb[4].mxu1 %v4866_v45  ;;  %v1332_v40 = vmul.f32 0.0078125, %v1309_v48  ;;  %v1426_v59 = vsub.f32 %v3858_v11, %v4835_v61 }
 0x1c7   :  { %3780 = vrsqrt.f32 %v1395_v60  ;;  %v1333_v17 = vmul.f32 0.0078125, %v1311_v39  ;;  %v1470_v21 = vadd.f32 %v4728_v10, %v1454_v52  ;;  %2105 = vmatprep.mubr.bf16.mxu1 %v3926_v15 }
 0x1c8   :  { %3782 = vrsqrt.f32 %v1394_v12  ;;  %v1364_v36 = vsub.f32 %v1332_v40, %v1348_v57 }
 0x1c9   :  { %v3777_v20 = vpop.eup %3776  ;;  %v1365_v38 = vsub.f32 %v1333_v17, %v1349_v18  ;;  %v1485_v58 = vpack.c.bf16 %v1471_v62, %v1470_v21  ;;  %v1249_v29 = vpop.xlane.xlu0 %1248 }
 0x1ca   :  { %v3779_v8 = vpop.eup %3778  ;;  %v1251_v5 = vpop.xlane.xlu1 %1250  ;;  %v1441_v33 = vmul.f32 %v3777_v20, %v1425_v63  ;;  %2751 = vperm.xlu1 %3599, %v2677_v56   ;;  %v1380_v7 = vmax.f32 %v1364_v36, 0.0  ;;  %v4880_v31 = vmul.f32 0.0078125, %v1249_v29  ;;  %v3861_v29 = vld [vmem:[#allocation3 + $0x240] sm:$0xff] }
 0x1cb   :  { %v1381_v25 = vmax.f32 %v1365_v38, 0.0  ;;  %v4878_v0 = vmul.f32 0.0078125, %v1251_v5  ;;  %3547 = vmatprep.subr.bf16.mxu0 %v1485_v58  ;;  %v1440_v46 = vmul.f32 %v3779_v8, %v1424_v37  ;;  %v3860_v8 = vld [vmem:[#allocation3 + $0x248] sm:$0xff] }
 0x1cc   :  { %3548 = vmatpush3.bf16.msra.mxu0 %v1485_v58  ;;  %v1457_v13 = vmul.f32 %v4652_v35, %v1441_v33  ;;  %v1396_v14 = vadd.f32 1e-05, %v1380_v7  ;;  %v1350_v1 = vmul.f32 %v4880_v31, %v4880_v31  ;;  %v1429_v36 = vsub.f32 %v3860_v8, %v4851_v28 }
 0x1cd   :  { %v1397_v44 = vadd.f32 1e-05, %v1381_v25  ;;  %v1456_v6 = vmul.f32 %v4652_v35, %v1440_v46  ;;  %v1351_v51 = vmul.f32 %v4878_v0, %v4878_v0  ;;  %v1313_v4 = vpop.xlane.xlu0 %1312  ;;  %v1428_v46 = vsub.f32 %v3861_v29, %v4856_v55 }
 0x1ce   :  { %v1315_v19 = vpop.xlane.xlu1 %1314  ;;  %v1473_v47 = vadd.f32 %v4728_v10, %v1457_v13  ;;  %2106 = vmatmul.mubr.bf16.gmra.mrb[8].mxu1 %v4890_v49  ;;  %v1334_v23 = vmul.f32 0.0078125, %v1313_v4 }
 0x1cf   :  { %3784 = vrsqrt.f32 %v1397_v44  ;;  %v1335_v3 = vmul.f32 0.0078125, %v1315_v19  ;;  %v1472_v22 = vadd.f32 %v4728_v10, %v1456_v6  ;;  %2115 = vmatprep.mubr.bf16.mxu1 %v3926_v15 }
 0x1d0   :  { %3786 = vrsqrt.f32 %v1396_v14  ;;  %v1366_v52 = vsub.f32 %v1334_v23, %v1350_v1 }
 0x1d1   :  { %v3781_v26 = vpop.eup %3780  ;;  %v1367_v24 = vsub.f32 %v1335_v3, %v1351_v51  ;;  %v1486_v9 = vpack.c.bf16 %v1473_v47, %v1472_v22  ;;  %v1253_v41 = vpop.xlane.xlu0 %1252 }
 0x1d2   :  { %v3783_v60 = vpop.eup %3782  ;;  %v1255_v12 = vpop.xlane.xlu1 %1254  ;;  %v1443_v39 = vmul.f32 %v3781_v26, %v1427_v34  ;;  %v1382_v48 = vmax.f32 %v1366_v52, 0.0  ;;  %v4901_v21 = vmul.f32 0.0078125, %v1253_v41  ;;  %v3863_v52 = vld [vmem:[#allocation3 + $0x258] sm:$0xff] }
 0x1d3   :  { %v1383_v62 = vmax.f32 %v1367_v24, 0.0  ;;  %v4899_v18 = vmul.f32 0.0078125, %v1255_v12  ;;  %3549 = vmatprep.subr.bf16.mxu0 %v1486_v9  ;;  %v1442_v17 = vmul.f32 %v3783_v60, %v1426_v59  ;;  %v4932_v59 = vld [vmem:[%s5507_s3 + $0x20] sm:$0xff]   ;;  %v1431_v12 = vsub.f32 %v3863_v52, %v4878_v0 }
 0x1d4   :  { %3550 = vmatpush3.bf16.msra.mxu0 %v1486_v9  ;;  %v1459_v56 = vmul.f32 %v4652_v35, %v1443_v39  ;;  %v1398_v63 = vadd.f32 1e-05, %v1382_v48  ;;  %v1352_v5 = vmul.f32 %v4901_v21, %v4901_v21 }
 0x1d5   :  { %v1399_v42 = vadd.f32 1e-05, %v1383_v62  ;;  %v1458_v61 = vmul.f32 %v4652_v35, %v1442_v17  ;;  %v1353_v20 = vmul.f32 %v4899_v18, %v4899_v18  ;;  %v1317_v38 = vpop.xlane.xlu0 %1316  ;;  %v3864_v17 = vld [vmem:[#allocation3 + $0x250] sm:$0xff] }
 0x1d6   :  { %v1319_v57 = vpop.xlane.xlu1 %1318  ;;  %v1475_v40 = vadd.f32 %v4728_v10, %v1459_v56  ;;  %2116 = vmatmul.mubr.bf16.gmra.mrb[12].mxu1 %v4911_v2  ;;  %v1336_v33 = vmul.f32 0.0078125, %v1317_v38  ;;  %v1430_v48 = vsub.f32 %v3864_v17, %v4880_v31  ;;  %v3865_v31 = vld [vmem:[%s5507_s3 + $0x28] sm:$0xff]  }
 0x1d7   :  { %3788 = vrsqrt.f32 %v1399_v42  ;;  %v1337_v37 = vmul.f32 0.0078125, %v1319_v57  ;;  %v1474_v58 = vadd.f32 %v4728_v10, %v1458_v61  ;;  %2125 = vmatprep.mubr.bf16.mxu1 %v3926_v15 }
 0x1d8   :  { %3790 = vrsqrt.f32 %v1398_v63  ;;  %v1368_v6 = vsub.f32 %v1336_v33, %v1352_v5  ;;  %v3866_v33 = vld [vmem:[#allocation3 + $0x268] sm:$0xff] }
 0x1d9   :  { %v3785_v25 = vpop.eup %3784  ;;  %v1369_v7 = vsub.f32 %v1337_v37, %v1353_v20  ;;  %v1487_v13 = vpack.c.bf16 %v1475_v40, %v1474_v58  ;;  %v1257_v28 = vpop.xlane.xlu0 %1256 }
 0x1da   :  { %v3787_v44 = vpop.eup %3786  ;;  %v1259_v14 = vpop.xlane.xlu1 %1258  ;;  %v1445_v19 = vmul.f32 %v3785_v25, %v1429_v36  ;;  %v1384_v4 = vmax.f32 %v1368_v6, 0.0  ;;  %v4922_v22 = vmul.f32 0.0078125, %v1257_v28  ;;  %v1433_v25 = vsub.f32 %v3866_v33, %v4899_v18  ;;  %v3868_v18 = vld [vmem:[%s5507_s3 + $0x30] sm:$0xff]  }
 0x1db   :  { %v1385_v47 = vmax.f32 %v1369_v7, 0.0  ;;  %v4920_v51 = vmul.f32 0.0078125, %v1259_v14  ;;  %3551 = vmatprep.subr.bf16.mxu0 %v1487_v13  ;;  %v1444_v3 = vmul.f32 %v3787_v44, %v1428_v46  ;;  %v3867_v46 = vld [vmem:[#allocation3 + $0x260] sm:$0xff] }
 0x1dc   :  { %3552 = vmatpush3.bf16.msra.mxu0 %v1487_v13  ;;  %v1461_v50 = vmul.f32 %v4652_v35, %v1445_v19  ;;  %v1400_v1 = vadd.f32 1e-05, %v1384_v4  ;;  %v1354_v39 = vmul.f32 %v4922_v22, %v4922_v22  ;;  %v1432_v7 = vsub.f32 %v3867_v46, %v4901_v21  ;;  %v3869_v21 = vld [vmem:[#allocation3 + $0x278] sm:$0xff] }
 0x1dd   :  { %v1401_v34 = vadd.f32 1e-05, %v1385_v47  ;;  %v1460_v55 = vmul.f32 %v4652_v35, %v1444_v3  ;;  %v1355_v11 = vmul.f32 %v4920_v51, %v4920_v51  ;;  %v1321_v9 = vpop.xlane.xlu0 %1320  ;;  %v1435_v4 = vsub.f32 %v3869_v21, %v4920_v51  ;;  %v3871_v51 = vld [vmem:[%s5507_s3 + $0x38] sm:$0xff]  }
 0x1de   :  { %v1323_v23 = vpop.xlane.xlu1 %1322  ;;  %v1477_v26 = vadd.f32 %v4728_v10, %v1461_v50  ;;  %2126 = vmatmul.mubr.bf16.gmra.mrb[16].mxu1 %v4932_v59  ;;  %v1338_v62 = vmul.f32 0.0078125, %v1321_v9 }
 0x1df   :  { %3792 = vrsqrt.f32 %v1401_v34  ;;  %v1339_v24 = vmul.f32 0.0078125, %v1323_v23  ;;  %v1476_v60 = vadd.f32 %v4728_v10, %v1460_v55  ;;  %2135 = vmatprep.mubr.bf16.mxu1 %v3926_v15  ;;  %v3870_v34 = vld [vmem:[#allocation3 + $0x270] sm:$0xff] }
 0x1e0   :  { %3794 = vrsqrt.f32 %v1400_v1  ;;  %v1370_v63 = vsub.f32 %v1338_v62, %v1354_v39  ;;  %v1434_v55 = vsub.f32 %v3870_v34, %v4922_v22 }
 0x1e1   :  { %v3789_v41 = vpop.eup %3788  ;;  %v1371_v56 = vsub.f32 %v1339_v24, %v1355_v11  ;;  %v1488_v42 = vpack.c.bf16 %v1477_v26, %v1476_v60 }
 0x1e2   :  { %v3791_v61 = vpop.eup %3790  ;;  %v1447_v57 = vmul.f32 %v3789_v41, %v1431_v12  ;;  %v1386_v0 = vmax.f32 %v1370_v63, 0.0  ;;  %v3872_v12 = vld [vmem:[%s5507_s3 + $0x40] sm:$0xff]  }
 0x1e3   :  { %v1387_v40 = vmax.f32 %v1371_v56, 0.0  ;;  %3553 = vmatprep.subr.bf16.mxu0 %v1488_v42  ;;  %v1446_v20 = vmul.f32 %v3791_v61, %v1430_v48 }
 0x1e4   :  { %3554 = vmatpush3.bf16.msra.mxu0 %v1488_v42  ;;  %v1463_v37 = vmul.f32 %v4652_v35, %v1447_v57  ;;  %v1402_v8 = vadd.f32 1e-05, %v1386_v0 }
 0x1e5   :  { %v1403_v38 = vadd.f32 1e-05, %v1387_v40  ;;  %v1462_v58 = vmul.f32 %v4652_v35, %v1446_v20 }
 0x1e6   :  { %v1479_v36 = vadd.f32 %v4728_v10, %v1463_v37  ;;  %2136 = vmatmul.mubr.bf16.gmra.mrb[20].mxu1 %v3865_v31 }
 0x1e7   :  { %3796 = vrsqrt.f32 %v1403_v38  ;;  %v1478_v5 = vadd.f32 %v4728_v10, %v1462_v58  ;;  %2145 = vmatprep.mubr.bf16.mxu1 %v3926_v15 }
 0x1e8   :  { %3798 = vrsqrt.f32 %v1402_v8 }
 0x1e9   :  { %v3793_v29 = vpop.eup %3792  ;;  %v1489_v13 = vpack.c.bf16 %v1479_v36, %v1478_v5  ;;  %v3873_v5 = vld [vmem:[%s5507_s3 + $0x48] sm:$0xff]  }
 0x1ea   :  { %v3795_v44 = vpop.eup %3794  ;;  %v1449_v6 = vmul.f32 %v3793_v29, %v1433_v25  ;;  %v3874_v29 = vld [vmem:[%s5507_s3 + $0x50] sm:$0xff]  }
 0x1eb   :  { %3555 = vmatprep.subr.bf16.mxu0 %v1489_v13  ;;  %v1448_v14 = vmul.f32 %v3795_v44, %v1432_v7 }
 0x1ec   :  { %3556 = vmatpush3.bf16.msra.mxu0 %v1489_v13  ;;  %v1465_v19 = vmul.f32 %v4652_v35, %v1449_v6 }
 0x1ed   :  { %v1464_v47 = vmul.f32 %v4652_v35, %v1448_v14 }
 0x1ee   :  { %v1481_v28 = vadd.f32 %v4728_v10, %v1465_v19  ;;  %2146 = vmatmul.mubr.bf16.gmra.mrb[24].mxu1 %v3868_v18 }
 0x1ef   :  { %v1480_v3 = vadd.f32 %v4728_v10, %v1464_v47  ;;  %2155 = vmatprep.mubr.bf16.mxu1 %v3926_v15 }
 0x1f1   :  { %v3797_v50 = vpop.eup %3796  ;;  %v1490_v1 = vpack.c.bf16 %v1481_v28, %v1480_v3 }
 0x1f2   :  { %v3799_v23 = vpop.eup %3798  ;;  %v1451_v26 = vmul.f32 %v3797_v50, %v1435_v4 }
 0x1f3   :  { %3557 = vmatprep.subr.bf16.mxu0 %v1490_v1  ;;  %v1450_v11 = vmul.f32 %v3799_v23, %v1434_v55 }
 0x1f4   :  { %3558 = vmatpush3.bf16.msra.mxu0 %v1490_v1  ;;  %v1467_v24 = vmul.f32 %v4652_v35, %v1451_v26 }
 0x1f5   :  { %v1466_v9 = vmul.f32 %v4652_v35, %v1450_v11  ;;  %v4979_v35 = vpop.permute.xlu1 %1611 }
 0x1f6   :  { %v1483_v60 = vadd.f32 %v4728_v10, %v1467_v24  ;;  %2156 = vmatmul.mubr.bf16.gmra.mrb[28].mxu1 %v3871_v51 }
 0x1f7   :  { %v1482_v52 = vadd.f32 %v4728_v10, %v1466_v9  ;;  %2165 = vmatprep.mubr.bf16.mxu1 %v3926_v15 }
 0x1f9   :  { %v1491_v22 = vpack.c.bf16 %v1483_v60, %v1482_v52  ;;  %v4982_v10 = vpop.permute.xlu1 %1616 }
 0x1fb   :  { %3559 = vmatprep.subr.bf16.mxu0 %v1491_v22 }
 0x1fc   :  { %3560 = vmatpush3.bf16.msra.mxu0 %v1491_v22 }
 0x1fd   :  { %v4988_v39 = vpop.permute.xlu1 %1621 }
 0x1fe   :  { %2166 = vmatmul.mubr.bf16.gmra.mrb[32].mxu1 %v3872_v12 }
 0x1ff   :  { %3562 = vmatmul.mubr.bf16.vlgmr.msra.gmra.mrb[64].mxu0 %v4866_v45  ;;  %2175 = vmatprep.mubr.bf16.mxu1 %v3926_v15  ;;  %v4985_v45 = vpop.permute.xlu0 %1606 }
 0x200   :  { %3565 = vmatprep.mubr.bf16.mxu0 %v4890_v49 }
 0x201   :  { %v4995_v57 = vpop.permute.xlu1 %1626 }
 0x205   :  { %v5009_v7 = vpop.permute.xlu1 %1631 }
 0x206   :  { %2176 = vmatmul.mubr.bf16.gmra.mrb[36].mxu1 %v4596_v16 }
 0x207   :  { %3566 = vmatmul.mubr.bf16.gmra.mrb[68].mxu0 %v4911_v2  ;;  %2185 = vmatprep.mubr.bf16.mxu1 %v3926_v15 }
 0x208   :  { %3569 = vmatprep.mubr.bf16.mxu0 %v4932_v59 }
 0x209   :  { %v5016_v50 = vpop.permute.xlu1 %1636 }
 0x20e   :  { %2186 = vmatmul.mubr.bf16.gmra.mrb[40].mxu1 %v4632_v54 }
 0x20f   :  { %3570 = vmatmul.mubr.bf16.gmra.mrb[72].mxu0 %v3865_v31  ;;  %2195 = vmatprep.mubr.bf16.mxu1 %v3926_v15 }
 0x210   :  { %3573 = vmatprep.mubr.bf16.mxu0 %v3868_v18 }
 0x211   :  { %v1894_v49 = vpop.f32.mrb[0].mxu0 }
 0x212   :  { %v1895_v16 = vadd.f32 %v1894_v49, %v4985_v45  ;;  %v1896_v2 = vpop.f32.mrb[1].mxu0 }
 0x213   :  { %v1897_v59 = vadd.f32 %v1896_v2, %v4985_v45  ;;  %v1898_v62 = vpop.f32.mrb[2].mxu0 }
 0x214   :  { %v2407_v41 = vmax.f32 %v1895_v16, 0.0  ;;  %v1899_v54 = vadd.f32 %v1898_v62, %v4979_v35  ;;  %v1900_v17 = vpop.f32.mrb[3].mxu0 }
 0x215   :  { %v2408_v48 = vmax.f32 %v1897_v59, 0.0  ;;  %v1901_v56 = vadd.f32 %v1900_v17, %v4979_v35 }
 0x216   :  { %2196 = vmatmul.mubr.bf16.gmra.mrb[44].mxu1 %v4667_v53  ;;  %v2412_v42 = vmax.f32 %v1899_v54, 0.0 }
 0x217   :  { %3574 = vmatmul.mubr.bf16.gmra.mrb[76].mxu0 %v3871_v51  ;;  %2205 = vmatprep.mubr.bf16.mxu1 %v3926_v15  ;;  %v2413_v61 = vmax.f32 %v1901_v56, 0.0  ;;  %v5022_v51 = vpop.permute.xlu1 %1641 }
 0x218   :  { %3577 = vmatprep.mubr.bf16.mxu0 %v3872_v12  ;;  %v2567_v63 = vpack.c.bf16 %v2412_v42, %v2407_v41  ;;  %v5039_v42 = vpop.permute.xlu0 %1651 }
 0x219   :  { %v2568_v40 = vpack.c.bf16 %v2413_v61, %v2408_v48  ;;  %v1904_v20 = vpop.f32.mrb[4].mxu0 }
 0x21a   :  { %v1905_v0 = vadd.f32 %v1904_v20, %v4982_v10  ;;  %v1906_v37 = vpop.f32.mrb[5].mxu0 }
 0x21b   :  { %v1907_v38 = vadd.f32 %v1906_v37, %v4982_v10  ;;  %v1908_v58 = vpop.f32.mrb[6].mxu0  ;;  %2839 = vmatprep.subr.bf16.mxu1 %v2568_v40  ;;  %v5031_v41 = vpop.permute.xlu1 %1646 }
 0x21c   :  { %v2417_v8 = vmax.f32 %v1905_v0, 0.0  ;;  %v1909_v36 = vadd.f32 %v1908_v58, %v4988_v39  ;;  %v1910_v31 = vpop.f32.mrb[7].mxu0  ;;  %2840 = vmatpush1.bf16.msra.mxu1 %v2567_v63 }
 0x21d   :  { %v2418_v33 = vmax.f32 %v1907_v38, 0.0  ;;  %v1911_v25 = vadd.f32 %v1910_v31, %v4988_v39 }
 0x21e   :  { %2206 = vmatmul.mubr.bf16.gmra.mrb[48].mxu1 %v4703_v43  ;;  %v2422_v46 = vmax.f32 %v1909_v36, 0.0 }
 0x21f   :  { %3578 = vmatmul.mubr.bf16.gmra.mrb[80].mxu0 %v3873_v5  ;;  %2215 = vmatprep.mubr.bf16.mxu1 %v3926_v15  ;;  %v2423_v13 = vmax.f32 %v1911_v25, 0.0  ;;  %v5051_v25 = vpop.permute.xlu0 %1661 }
 0x220   :  { %3581 = vmatprep.mubr.bf16.mxu0 %v3874_v29  ;;  %v2572_v44 = vpack.c.bf16 %v2422_v46, %v2417_v8  ;;  %v5048_v8 = vpop.permute.xlu1 %1656 }
 0x221   :  { %v2573_v6 = vpack.c.bf16 %v2423_v13, %v2418_v33  ;;  %v1914_v14 = vpop.f32.mrb[8].mxu0 }
 0x222   :  { %v1915_v19 = vadd.f32 %v1914_v14, %v4995_v57  ;;  %v1916_v47 = vpop.f32.mrb[9].mxu0 }
 0x223   :  { %v1917_v28 = vadd.f32 %v1916_v47, %v4995_v57  ;;  %v1918_v18 = vpop.f32.mrb[10].mxu0  ;;  %2841 = vmatprep.subr.bf16.mxu1 %v2573_v6 }
 0x224   :  { %v2427_v3 = vmax.f32 %v1915_v19, 0.0  ;;  %v1919_v21 = vadd.f32 %v1918_v18, %v5009_v7  ;;  %v1920_v4 = vpop.f32.mrb[11].mxu0  ;;  %2842 = vmatpush1.bf16.msra.mxu1 %v2572_v44  ;;  %v5056_v18 = vpop.permute.xlu1 %1666 }
 0x225   :  { %v2428_v34 = vmax.f32 %v1917_v28, 0.0  ;;  %v1921_v55 = vadd.f32 %v1920_v4, %v5009_v7 }
 0x226   :  { %2216 = vmatmul.mubr.bf16.gmra.mrb[52].mxu1 %v4742_v32  ;;  %v2432_v1 = vmax.f32 %v1919_v21, 0.0 }
 0x227   :  { %3582 = vmatmul.mubr.bf16.gmra.mrb[84].mxu0 %v4667_v53  ;;  %2225 = vmatprep.mubr.bf16.mxu1 %v3926_v15  ;;  %v2433_v23 = vmax.f32 %v1921_v55, 0.0  ;;  %v5059_v55 = vpop.permute.xlu0 %1671 }
 0x228   :  { %3585 = vmatprep.mubr.bf16.mxu0 %v4703_v43  ;;  %v2577_v26 = vpack.c.bf16 %v2432_v1, %v2427_v3 }
 0x229   :  { %v2578_v11 = vpack.c.bf16 %v2433_v23, %v2428_v34  ;;  %v1924_v24 = vpop.f32.mrb[12].mxu0 }
 0x22a   :  { %v1925_v9 = vadd.f32 %v1924_v24, %v5016_v50  ;;  %v1926_v60 = vpop.f32.mrb[13].mxu0 }
 0x22b   :  { %v1927_v53 = vadd.f32 %v1926_v60, %v5016_v50  ;;  %v1928_v52 = vpop.f32.mrb[14].mxu0  ;;  %2843 = vmatprep.subr.bf16.mxu1 %v2578_v11 }
 0x22c   :  { %v2437_v22 = vmax.f32 %v1925_v9, 0.0  ;;  %v1929_v12 = vadd.f32 %v1928_v52, %v5022_v51  ;;  %v1930_v49 = vpop.f32.mrb[15].mxu0  ;;  %2844 = vmatpush1.bf16.msra.mxu1 %v2577_v26 }
 0x22d   :  { %v2438_v43 = vmax.f32 %v1927_v53, 0.0  ;;  %v1931_v16 = vadd.f32 %v1930_v49, %v5022_v51 }
 0x22e   :  { %2226 = vmatmul.mubr.bf16.gmra.mrb[56].mxu1 %v4774_v27  ;;  %v2442_v2 = vmax.f32 %v1929_v12, 0.0  ;;  %v5064_v12 = vpop.permute.xlu1 %1676 }
 0x22f   :  { %3586 = vmatmul.mubr.bf16.gmra.mrb[88].mxu0 %v4742_v32  ;;  %2235 = vmatprep.mubr.bf16.mxu1 %v3926_v15  ;;  %v2443_v59 = vmax.f32 %v1931_v16, 0.0  ;;  %v5037_v32 = vld [vmem:[%s5509_s5 + $0x4] ss:$8 sps:$4 sm:$0xff]  }
 0x230   :  { %3589 = vmatprep.mubr.bf16.mxu0 %v4774_v27  ;;  %v2582_v62 = vpack.c.bf16 %v2442_v2, %v2437_v22 }
 0x231   :  { %v2583_v54 = vpack.c.bf16 %v2443_v59, %v2438_v43  ;;  %v1934_v17 = vpop.f32.mrb[16].mxu0  ;;  %v5067_v59 = vpop.permute.xlu0 %1681 }
 0x232   :  { %v1935_v48 = vadd.f32 %v1934_v17, %v5031_v41  ;;  %v1936_v56 = vpop.f32.mrb[17].mxu0 }
 0x233   :  { %v1937_v15 = vadd.f32 %v1936_v56, %v5031_v41  ;;  %v1938_v27 = vpop.f32.mrb[18].mxu0  ;;  %2845 = vmatprep.subr.bf16.mxu1 %v2583_v54 }
 0x234   :  { %v2447_v61 = vmax.f32 %v1935_v48, 0.0  ;;  %v1939_v63 = vadd.f32 %v1938_v27, %v5039_v42  ;;  %v1940_v40 = vpop.f32.mrb[19].mxu0  ;;  %2846 = vmatpush1.bf16.msra.mxu1 %v2582_v62 }
 0x235   :  { %v2448_v20 = vmax.f32 %v1937_v15, 0.0  ;;  %v1941_v0 = vadd.f32 %v1940_v40, %v5039_v42 }
 0x236   :  { %2236 = vmatmul.mubr.bf16.gmra.mrb[60].mxu1 %v4808_v30  ;;  %v2452_v37 = vmax.f32 %v1939_v63, 0.0 }
 0x237   :  { %3590 = vmatmul.mubr.bf16.gmra.mrb[92].mxu0 %v4808_v30  ;;  %2871 = vmatprep.mubr.bf16.mxu1 %v5037_v32  ;;  %v2453_v38 = vmax.f32 %v1941_v0, 0.0 }
 0x238   :  { %2984 = vmatprep.mubr.bf16.mxu0 %v5037_v32  ;;  %v2587_v58 = vpack.c.bf16 %v2452_v37, %v2447_v61 }
 0x239   :  { %v2588_v36 = vpack.c.bf16 %v2453_v38, %v2448_v20  ;;  %v1944_v31 = vpop.f32.mrb[20].mxu0  ;;  %v5072_v20 = vpop.permute.xlu1 %1686 }
 0x23a   :  { %v1945_v5 = vadd.f32 %v1944_v31, %v5048_v8  ;;  %v1946_v33 = vpop.f32.mrb[21].mxu0 }
 0x23b   :  { %v1947_v30 = vadd.f32 %v1946_v33, %v5048_v8  ;;  %v1948_v29 = vpop.f32.mrb[22].mxu0  ;;  %2847 = vmatprep.subr.bf16.mxu1 %v2588_v36  ;;  %v5075_v36 = vpop.permute.xlu0 %1691 }
 0x23c   :  { %v2457_v46 = vmax.f32 %v1945_v5, 0.0  ;;  %v1949_v13 = vadd.f32 %v1948_v29, %v5051_v25  ;;  %v1950_v44 = vpop.f32.mrb[23].mxu0  ;;  %2848 = vmatpush1.bf16.msra.mxu1 %v2587_v58 }
 0x23d   :  { %v2458_v6 = vmax.f32 %v1947_v30, 0.0  ;;  %v1951_v14 = vadd.f32 %v1950_v44, %v5051_v25 }
 0x23e   :  { %v2462_v19 = vmax.f32 %v1949_v13, 0.0 }
 0x23f   :  { %v2463_v47 = vmax.f32 %v1951_v14, 0.0 }
 0x240   :  { %v2592_v28 = vpack.c.bf16 %v2462_v19, %v2457_v46  ;;  %v5080_v19 = vpop.permute.xlu1 %1696 }
 0x241   :  { %v2593_v3 = vpack.c.bf16 %v2463_v47, %v2458_v6  ;;  %v1954_v21 = vpop.f32.mrb[24].mxu0 }
 0x242   :  { %v1955_v4 = vadd.f32 %v1954_v21, %v5056_v18  ;;  %v1956_v34 = vpop.f32.mrb[25].mxu0 }
 0x243   :  { %v1957_v1 = vadd.f32 %v1956_v34, %v5056_v18  ;;  %v1958_v23 = vpop.f32.mrb[26].mxu0  ;;  %2849 = vmatprep.subr.bf16.mxu1 %v2593_v3 }
 0x244   :  { %v2467_v26 = vmax.f32 %v1955_v4, 0.0  ;;  %v1959_v11 = vadd.f32 %v1958_v23, %v5059_v55  ;;  %v1960_v24 = vpop.f32.mrb[27].mxu0  ;;  %2850 = vmatpush1.bf16.msra.mxu1 %v2592_v28  ;;  %v5083_v4 = vpop.permute.xlu0 %1701 }
 0x245   :  { %v2468_v9 = vmax.f32 %v1957_v1, 0.0  ;;  %v1961_v60 = vadd.f32 %v1960_v24, %v5059_v55 }
 0x246   :  { %v2472_v53 = vmax.f32 %v1959_v11, 0.0 }
 0x247   :  { %v2473_v52 = vmax.f32 %v1961_v60, 0.0 }
 0x248   :  { %v2597_v22 = vpack.c.bf16 %v2472_v53, %v2467_v26 }
 0x249   :  { %v2598_v49 = vpack.c.bf16 %v2473_v52, %v2468_v9  ;;  %v1964_v43 = vpop.f32.mrb[28].mxu0 }
 0x24a   :  { %v1965_v16 = vadd.f32 %v1964_v43, %v5064_v12  ;;  %v1966_v2 = vpop.f32.mrb[29].mxu0 }
 0x24b   :  { %v1967_v62 = vadd.f32 %v1966_v2, %v5064_v12  ;;  %v1968_v54 = vpop.f32.mrb[30].mxu0  ;;  %2851 = vmatprep.subr.bf16.mxu1 %v2598_v49 }
 0x24c   :  { %v2477_v17 = vmax.f32 %v1965_v16, 0.0  ;;  %v1969_v48 = vadd.f32 %v1968_v54, %v5067_v59  ;;  %v1970_v56 = vpop.f32.mrb[31].mxu0  ;;  %2852 = vmatpush1.bf16.msra.mxu1 %v2597_v22  ;;  %v5088_v22 = vpop.permute.xlu1 %1706 }
 0x24d   :  { %v2478_v15 = vmax.f32 %v1967_v62, 0.0  ;;  %v1971_v27 = vadd.f32 %v1970_v56, %v5067_v59  ;;  %v5091_v62 = vpop.permute.xlu0 %1711 }
 0x24e   :  { %v2482_v61 = vmax.f32 %v1969_v48, 0.0 }
 0x24f   :  { %v2483_v63 = vmax.f32 %v1971_v27, 0.0 }
 0x250   :  { %v2602_v40 = vpack.c.bf16 %v2482_v61, %v2477_v17 }
 0x251   :  { %v2603_v0 = vpack.c.bf16 %v2483_v63, %v2478_v15  ;;  %v1974_v37 = vpop.f32.mrb[32].mxu0 }
 0x252   :  { %v1975_v38 = vadd.f32 %v1974_v37, %v5072_v20  ;;  %v1976_v58 = vpop.f32.mrb[33].mxu0  ;;  %v5096_v37 = vpop.permute.xlu1 %1716 }
 0x253   :  { %v1977_v31 = vadd.f32 %v1976_v58, %v5072_v20  ;;  %v1978_v5 = vpop.f32.mrb[34].mxu0  ;;  %2853 = vmatprep.subr.bf16.mxu1 %v2603_v0 }
 0x254   :  { %v2487_v33 = vmax.f32 %v1975_v38, 0.0  ;;  %v1979_v30 = vadd.f32 %v1978_v5, %v5075_v36  ;;  %v1980_v29 = vpop.f32.mrb[35].mxu0  ;;  %2854 = vmatpush1.bf16.msra.mxu1 %v2602_v40 }
 0x255   :  { %v2488_v46 = vmax.f32 %v1977_v31, 0.0  ;;  %v1981_v13 = vadd.f32 %v1980_v29, %v5075_v36 }
 0x256   :  { %v2492_v44 = vmax.f32 %v1979_v30, 0.0 }
 0x257   :  { %v2493_v6 = vmax.f32 %v1981_v13, 0.0 }
 0x258   :  { %v2607_v14 = vpack.c.bf16 %v2492_v44, %v2487_v33  ;;  %v5099_v33 = vpop.permute.xlu0 %1721 }
 0x259   :  { %v2608_v47 = vpack.c.bf16 %v2493_v6, %v2488_v46  ;;  %v1984_v28 = vpop.f32.mrb[36].mxu0 }
 0x25a   :  { %v1985_v3 = vadd.f32 %v1984_v28, %v5080_v19  ;;  %v1986_v21 = vpop.f32.mrb[37].mxu0 }
 0x25b   :  { %v1987_v34 = vadd.f32 %v1986_v21, %v5080_v19  ;;  %v1988_v1 = vpop.f32.mrb[38].mxu0  ;;  %2855 = vmatprep.subr.bf16.mxu1 %v2608_v47  ;;  %v5104_v21 = vpop.permute.xlu1 %1726 }
 0x25c   :  { %v2497_v23 = vmax.f32 %v1985_v3, 0.0  ;;  %v1989_v26 = vadd.f32 %v1988_v1, %v5083_v4  ;;  %v1990_v11 = vpop.f32.mrb[39].mxu0  ;;  %2856 = vmatpush1.bf16.msra.mxu1 %v2607_v14 }
 0x25d   :  { %v2498_v24 = vmax.f32 %v1987_v34, 0.0  ;;  %v1991_v9 = vadd.f32 %v1990_v11, %v5083_v4  ;;  %v5107_v11 = vpop.permute.xlu0 %1731 }
 0x25e   :  { %v2502_v60 = vmax.f32 %v1989_v26, 0.0 }
 0x25f   :  { %v2503_v53 = vmax.f32 %v1991_v9, 0.0 }
 0x260   :  { %v2612_v52 = vpack.c.bf16 %v2502_v60, %v2497_v23 }
 0x261   :  { %v2613_v49 = vpack.c.bf16 %v2503_v53, %v2498_v24  ;;  %v1994_v43 = vpop.f32.mrb[40].mxu0 }
 0x262   :  { %v1995_v16 = vadd.f32 %v1994_v43, %v5088_v22  ;;  %v1996_v2 = vpop.f32.mrb[41].mxu0 }
 0x263   :  { %v1997_v54 = vadd.f32 %v1996_v2, %v5088_v22  ;;  %v1998_v17 = vpop.f32.mrb[42].mxu0  ;;  %2857 = vmatprep.subr.bf16.mxu1 %v2613_v49 }
 0x264   :  { %v2507_v48 = vmax.f32 %v1995_v16, 0.0  ;;  %v1999_v56 = vadd.f32 %v1998_v17, %v5091_v62  ;;  %v2000_v15 = vpop.f32.mrb[43].mxu0  ;;  %2858 = vmatpush1.bf16.msra.mxu1 %v2612_v52  ;;  %v5112_v17 = vpop.permute.xlu1 %1736 }
 0x265   :  { %v2508_v27 = vmax.f32 %v1997_v54, 0.0  ;;  %v2001_v61 = vadd.f32 %v2000_v15, %v5091_v62 }
 0x266   :  { %v2512_v63 = vmax.f32 %v1999_v56, 0.0 }
 0x267   :  { %v2513_v40 = vmax.f32 %v2001_v61, 0.0  ;;  %v5115_v61 = vpop.permute.xlu0 %1741 }
 0x268   :  { %v2617_v0 = vpack.c.bf16 %v2512_v63, %v2507_v48 }
 0x269   :  { %v2618_v38 = vpack.c.bf16 %v2513_v40, %v2508_v27  ;;  %v2004_v58 = vpop.f32.mrb[44].mxu0 }
 0x26a   :  { %v2005_v31 = vadd.f32 %v2004_v58, %v5096_v37  ;;  %v2006_v5 = vpop.f32.mrb[45].mxu0 }
 0x26b   :  { %v2007_v30 = vadd.f32 %v2006_v5, %v5096_v37  ;;  %v2008_v29 = vpop.f32.mrb[46].mxu0  ;;  %2859 = vmatprep.subr.bf16.mxu1 %v2618_v38 }
 0x26c   :  { %v2517_v46 = vmax.f32 %v2005_v31, 0.0  ;;  %v2009_v13 = vadd.f32 %v2008_v29, %v5099_v33  ;;  %v2010_v44 = vpop.f32.mrb[47].mxu0  ;;  %2860 = vmatpush1.bf16.msra.mxu1 %v2617_v0 }
 0x26d   :  { %v2518_v6 = vmax.f32 %v2007_v30, 0.0  ;;  %v2011_v14 = vadd.f32 %v2010_v44, %v5099_v33 }
 0x26e   :  { %v2522_v47 = vmax.f32 %v2009_v13, 0.0  ;;  %v5120_v13 = vpop.permute.xlu1 %1746 }
 0x26f   :  { %v2523_v28 = vmax.f32 %v2011_v14, 0.0 }
 0x270   :  { %v2622_v3 = vpack.c.bf16 %v2522_v47, %v2517_v46 }
 0x271   :  { %v2623_v34 = vpack.c.bf16 %v2523_v28, %v2518_v6  ;;  %v2014_v1 = vpop.f32.mrb[48].mxu0  ;;  %v5123_v28 = vpop.permute.xlu0 %1751 }
 0x272   :  { %v2015_v23 = vadd.f32 %v2014_v1, %v5104_v21  ;;  %v2016_v26 = vpop.f32.mrb[49].mxu0 }
 0x273   :  { %v2017_v24 = vadd.f32 %v2016_v26, %v5104_v21  ;;  %v2018_v9 = vpop.f32.mrb[50].mxu0  ;;  %2861 = vmatprep.subr.bf16.mxu1 %v2623_v34 }
 0x274   :  { %v2527_v60 = vmax.f32 %v2015_v23, 0.0  ;;  %v2019_v53 = vadd.f32 %v2018_v9, %v5107_v11  ;;  %v2020_v52 = vpop.f32.mrb[51].mxu0  ;;  %2862 = vmatpush1.bf16.msra.mxu1 %v2622_v3 }
 0x275   :  { %v2528_v49 = vmax.f32 %v2017_v24, 0.0  ;;  %v2021_v43 = vadd.f32 %v2020_v52, %v5107_v11 }
 0x276   :  { %v2532_v16 = vmax.f32 %v2019_v53, 0.0 }
 0x277   :  { %v2533_v2 = vmax.f32 %v2021_v43, 0.0 }
 0x278   :  { %v2627_v54 = vpack.c.bf16 %v2532_v16, %v2527_v60 }
 0x279   :  { %v2628_v48 = vpack.c.bf16 %v2533_v2, %v2528_v49  ;;  %v2024_v56 = vpop.f32.mrb[52].mxu0  ;;  %v5128_v49 = vpop.permute.xlu1 %1756 }
 0x27a   :  { %v2025_v15 = vadd.f32 %v2024_v56, %v5112_v17  ;;  %v2026_v27 = vpop.f32.mrb[53].mxu0 }
 0x27b   :  { %v2027_v63 = vadd.f32 %v2026_v27, %v5112_v17  ;;  %v2028_v40 = vpop.f32.mrb[54].mxu0  ;;  %2863 = vmatprep.subr.bf16.mxu1 %v2628_v48  ;;  %v5131_v48 = vpop.permute.xlu0 %1761 }
 0x27c   :  { %v2537_v0 = vmax.f32 %v2025_v15, 0.0  ;;  %v2029_v38 = vadd.f32 %v2028_v40, %v5115_v61  ;;  %v2030_v58 = vpop.f32.mrb[55].mxu0  ;;  %2864 = vmatpush1.bf16.msra.mxu1 %v2627_v54 }
 0x27d   :  { %v2538_v31 = vmax.f32 %v2027_v63, 0.0  ;;  %v2031_v5 = vadd.f32 %v2030_v58, %v5115_v61 }
 0x27e   :  { %v2542_v30 = vmax.f32 %v2029_v38, 0.0 }
 0x27f   :  { %v2543_v29 = vmax.f32 %v2031_v5, 0.0 }
 0x280   :  { %v2632_v46 = vpack.c.bf16 %v2542_v30, %v2537_v0 }
 0x281   :  { %v2633_v44 = vpack.c.bf16 %v2543_v29, %v2538_v31  ;;  %v2034_v6 = vpop.f32.mrb[56].mxu0 }
 0x282   :  { %v2035_v14 = vadd.f32 %v2034_v6, %v5120_v13  ;;  %v2036_v47 = vpop.f32.mrb[57].mxu0 }
 0x283   :  { %v2037_v3 = vadd.f32 %v2036_v47, %v5120_v13  ;;  %v2038_v34 = vpop.f32.mrb[58].mxu0  ;;  %2865 = vmatprep.subr.bf16.mxu1 %v2633_v44 }
 0x284   :  { %v2547_v1 = vmax.f32 %v2035_v14, 0.0  ;;  %v2039_v23 = vadd.f32 %v2038_v34, %v5123_v28  ;;  %v2040_v26 = vpop.f32.mrb[59].mxu0  ;;  %2866 = vmatpush1.bf16.msra.mxu1 %v2632_v46 }
 0x285   :  { %v2548_v24 = vmax.f32 %v2037_v3, 0.0  ;;  %v2041_v9 = vadd.f32 %v2040_v26, %v5123_v28  ;;  %v5141_v3 = vld [vmem:[%s5509_s5] ss:$8 sps:$4 sm:$0xff]  }
 0x286   :  { %v2552_v60 = vmax.f32 %v2039_v23, 0.0 }
 0x287   :  { %v2553_v53 = vmax.f32 %v2041_v9, 0.0 }
 0x288   :  { %v2637_v52 = vpack.c.bf16 %v2552_v60, %v2547_v1 }
 0x289   :  { %v2638_v43 = vpack.c.bf16 %v2553_v53, %v2548_v24  ;;  %v2044_v16 = vpop.f32.mrb[60].mxu0  ;;  %v5148_v24 = vld [vmem:[%s5509_s5 + $0x14] ss:$8 sps:$4 sm:$0xff]  }
 0x28a   :  { %v2045_v2 = vadd.f32 %v2044_v16, %v5128_v49  ;;  %v2046_v54 = vpop.f32.mrb[61].mxu0 }
 0x28b   :  { %v2047_v56 = vadd.f32 %v2046_v54, %v5128_v49  ;;  %v2048_v15 = vpop.f32.mrb[62].mxu0  ;;  %2867 = vmatprep.subr.bf16.mxu1 %v2638_v43 }
 0x28c   :  { %v2049_v27 = vadd.f32 %v2048_v15, %v5131_v48  ;;  %v2050_v63 = vpop.f32.mrb[63].mxu0  ;;  %2868 = vmatpush1.bf16.msra.mxu1 %v2637_v52  ;;  %v2557_v0 = vmax.f32 %v2045_v2, 0.0 }
 0x28d   :  { %v2051_v40 = vadd.f32 %v2050_v63, %v5131_v48  ;;  %v2558_v58 = vmax.f32 %v2047_v56, 0.0  ;;  %v5158_v63 = vld [vmem:[%s5509_s5 + $0x10] ss:$8 sps:$4 sm:$0xff]  }
 0x28e   :  { %v2562_v38 = vmax.f32 %v2049_v27, 0.0 }
 0x28f   :  { %v2563_v31 = vmax.f32 %v2051_v40, 0.0 }
 0x290   :  { %v2642_v5 = vpack.c.bf16 %v2562_v38, %v2557_v0  ;;  %v5164_v0 = vld [vmem:[%s5509_s5 + $0x24] ss:$8 sps:$4 sm:$0xff]  }
 0x291   :  { %v2087_v30 = vpop.f32.mrb[0].mxu1  ;;  %v2643_v29 = vpack.c.bf16 %v2563_v31, %v2558_v58 }
 0x292   :  { %v2088_v46 = vadd.f32 %v2087_v30, %v4985_v45  ;;  %v2089_v44 = vpop.f32.mrb[1].mxu1 }
 0x293   :  { %v2090_v6 = vadd.f32 %v2089_v44, %v4985_v45  ;;  %v2091_v14 = vpop.f32.mrb[2].mxu1  ;;  %2869 = vmatprep.subr.bf16.mxu1 %v2643_v29 }
 0x294   :  { %v2409_v47 = vmax.f32 %v2088_v46, 0.0  ;;  %v2092_v34 = vadd.f32 %v2091_v14, %v4979_v35  ;;  %v2093_v1 = vpop.f32.mrb[3].mxu1  ;;  %2870 = vmatpush1.bf16.msra.mxu1 %v2642_v5 }
 0x295   :  { %v2410_v23 = vmax.f32 %v2090_v6, 0.0  ;;  %v2094_v26 = vadd.f32 %v2093_v1, %v4979_v35 }
 0x296   :  { %v2414_v9 = vmax.f32 %v2092_v34, 0.0 }
 0x297   :  { %v2415_v60 = vmax.f32 %v2094_v26, 0.0  ;;  %2872 = vmatmul.mubr.bf16.vlgmr.msra.gmra.mrb[64].mxu1 %v5141_v3 }
 0x298   :  { %v2569_v53 = vpack.c.bf16 %v2414_v9, %v2409_v47  ;;  %2881 = vmatprep.mubr.bf16.mxu1 %v5148_v24  ;;  %v5180_v9 = vld [vmem:[%s5509_s5 + $0x34] ss:$8 sps:$4 sm:$0xff]  }
 0x299   :  { %v2570_v52 = vpack.c.bf16 %v2415_v60, %v2410_v23  ;;  %v2097_v43 = vpop.f32.mrb[4].mxu1  ;;  %v5174_v23 = vld [vmem:[%s5509_s5 + $0x20] ss:$8 sps:$4 sm:$0xff]  }
 0x29a   :  { %v2098_v16 = vadd.f32 %v2097_v43, %v4982_v10  ;;  %v2099_v2 = vpop.f32.mrb[5].mxu1 }
 0x29b   :  { %v2100_v54 = vadd.f32 %v2099_v2, %v4982_v10  ;;  %v2101_v56 = vpop.f32.mrb[6].mxu1  ;;  %2952 = vmatprep.subr.bf16.mxu0 %v2570_v52 }
 0x29c   :  { %v2102_v15 = vadd.f32 %v2101_v56, %v4988_v39  ;;  %v2103_v27 = vpop.f32.mrb[7].mxu1  ;;  %2953 = vmatpush1.bf16.msra.mxu0 %v2569_v53  ;;  %v2419_v38 = vmax.f32 %v2098_v16, 0.0 }
 0x29d   :  { %v2104_v40 = vadd.f32 %v2103_v27, %v4988_v39  ;;  %v2420_v31 = vmax.f32 %v2100_v54, 0.0 }
 0x29e   :  { %v2424_v58 = vmax.f32 %v2102_v15, 0.0 }
 0x29f   :  { %v2425_v5 = vmax.f32 %v2104_v40, 0.0  ;;  %2882 = vmatmul.mubr.bf16.gmra.mrb[68].mxu1 %v5158_v63 }
 0x2a0   :  { %v2574_v30 = vpack.c.bf16 %v2424_v58, %v2419_v38  ;;  %2891 = vmatprep.mubr.bf16.mxu1 %v5164_v0 }
 0x2a1   :  { %v2575_v29 = vpack.c.bf16 %v2425_v5, %v2420_v31  ;;  %v2107_v46 = vpop.f32.mrb[8].mxu1  ;;  %v5190_v31 = vld [vmem:[%s5509_s5 + $0x30] ss:$8 sps:$4 sm:$0xff]  }
 0x2a2   :  { %v2108_v44 = vadd.f32 %v2107_v46, %v4995_v57  ;;  %v2109_v6 = vpop.f32.mrb[9].mxu1 }
 0x2a3   :  { %v2110_v14 = vadd.f32 %v2109_v6, %v4995_v57  ;;  %v2111_v47 = vpop.f32.mrb[10].mxu1  ;;  %2954 = vmatprep.subr.bf16.mxu0 %v2575_v29 }
 0x2a4   :  { %v2112_v34 = vadd.f32 %v2111_v47, %v5009_v7  ;;  %v2113_v1 = vpop.f32.mrb[11].mxu1  ;;  %2955 = vmatpush1.bf16.msra.mxu0 %v2574_v30  ;;  %v2429_v60 = vmax.f32 %v2108_v44, 0.0  ;;  %v5196_v30 = vld [vmem:[%s5509_s5 + $0x44] ss:$8 sps:$4 sm:$0xff]  }
 0x2a5   :  { %v2114_v26 = vadd.f32 %v2113_v1, %v5009_v7  ;;  %v2430_v52 = vmax.f32 %v2110_v14, 0.0 }
 0x2a6   :  { %v2434_v53 = vmax.f32 %v2112_v34, 0.0 }
 0x2a7   :  { %v2435_v43 = vmax.f32 %v2114_v26, 0.0  ;;  %2892 = vmatmul.mubr.bf16.gmra.mrb[72].mxu1 %v5174_v23 }
 0x2a8   :  { %v2579_v16 = vpack.c.bf16 %v2434_v53, %v2429_v60  ;;  %2901 = vmatprep.mubr.bf16.mxu1 %v5180_v9 }
 0x2a9   :  { %v2580_v2 = vpack.c.bf16 %v2435_v43, %v2430_v52  ;;  %v2117_v54 = vpop.f32.mrb[12].mxu1 }
 0x2aa   :  { %v2118_v56 = vadd.f32 %v2117_v54, %v5016_v50  ;;  %v2119_v15 = vpop.f32.mrb[13].mxu1  ;;  %v5212_v54 = vld [vmem:[%s5509_s5 + $0x54] ss:$8 sps:$4 sm:$0xff]  }
 0x2ab   :  { %v2120_v27 = vadd.f32 %v2119_v15, %v5016_v50  ;;  %v2121_v40 = vpop.f32.mrb[14].mxu1  ;;  %2956 = vmatprep.subr.bf16.mxu0 %v2580_v2 }
 0x2ac   :  { %v2122_v38 = vadd.f32 %v2121_v40, %v5022_v51  ;;  %v2123_v58 = vpop.f32.mrb[15].mxu1  ;;  %2957 = vmatpush1.bf16.msra.mxu0 %v2579_v16  ;;  %v2439_v29 = vmax.f32 %v2118_v56, 0.0  ;;  %v5206_v16 = vld [vmem:[%s5509_s5 + $0x40] ss:$8 sps:$4 sm:$0xff]  }
 0x2ad   :  { %v2124_v5 = vadd.f32 %v2123_v58, %v5022_v51  ;;  %v2440_v44 = vmax.f32 %v2120_v27, 0.0 }
 0x2ae   :  { %v2444_v46 = vmax.f32 %v2122_v38, 0.0 }
 0x2af   :  { %v2445_v6 = vmax.f32 %v2124_v5, 0.0  ;;  %2902 = vmatmul.mubr.bf16.gmra.mrb[76].mxu1 %v5190_v31 }
 0x2b0   :  { %v2584_v14 = vpack.c.bf16 %v2444_v46, %v2439_v29  ;;  %2911 = vmatprep.mubr.bf16.mxu1 %v5196_v30 }
 0x2b1   :  { %v2585_v47 = vpack.c.bf16 %v2445_v6, %v2440_v44  ;;  %v2127_v34 = vpop.f32.mrb[16].mxu1 }
 0x2b2   :  { %v2128_v1 = vadd.f32 %v2127_v34, %v5031_v41  ;;  %v2129_v26 = vpop.f32.mrb[17].mxu1  ;;  %v5222_v34 = vld [vmem:[%s5509_s5 + $0x50] ss:$8 sps:$4 sm:$0xff]  }
 0x2b3   :  { %v2130_v60 = vadd.f32 %v2129_v26, %v5031_v41  ;;  %v2131_v53 = vpop.f32.mrb[18].mxu1  ;;  %2958 = vmatprep.subr.bf16.mxu0 %v2585_v47  ;;  %5522 = vst [vmem:[#allocation9_spill] sm:$0xff] %v5222_v34  ;;  %v5228_v26 = vld [vmem:[%s5509_s5 + $0x64] ss:$8 sps:$4 sm:$0xff]  }
 0x2b4   :  { %v2132_v52 = vadd.f32 %v2131_v53, %v5039_v42  ;;  %v2133_v43 = vpop.f32.mrb[19].mxu1  ;;  %2959 = vmatpush1.bf16.msra.mxu0 %v2584_v14  ;;  %v2449_v56 = vmax.f32 %v2128_v1, 0.0  ;;  %5523 = vst [vmem:[#allocation10_spill] sm:$0xff] %v5228_v26 }
 0x2b5   :  { %v2134_v2 = vadd.f32 %v2133_v43, %v5039_v42  ;;  %v2450_v27 = vmax.f32 %v2130_v60, 0.0 }
 0x2b6   :  { %v2454_v15 = vmax.f32 %v2132_v52, 0.0 }
 0x2b7   :  { %v2455_v40 = vmax.f32 %v2134_v2, 0.0  ;;  %2912 = vmatmul.mubr.bf16.gmra.mrb[80].mxu1 %v5206_v16 }
 0x2b8   :  { %v2589_v38 = vpack.c.bf16 %v2454_v15, %v2449_v56  ;;  %2921 = vmatprep.mubr.bf16.mxu1 %v5212_v54 }
 0x2b9   :  { %v2590_v58 = vpack.c.bf16 %v2455_v40, %v2450_v27  ;;  %v2137_v5 = vpop.f32.mrb[20].mxu1 }
 0x2ba   :  { %v2138_v29 = vadd.f32 %v2137_v5, %v5048_v8  ;;  %v2139_v46 = vpop.f32.mrb[21].mxu1 }
 0x2bb   :  { %v2140_v44 = vadd.f32 %v2139_v46, %v5048_v8  ;;  %v2141_v6 = vpop.f32.mrb[22].mxu1  ;;  %2960 = vmatprep.subr.bf16.mxu0 %v2590_v58  ;;  %v5238_v46 = vld [vmem:[%s5509_s5 + $0x60] ss:$8 sps:$4 sm:$0xff]  }
 0x2bc   :  { %v2142_v14 = vadd.f32 %v2141_v6, %v5051_v25  ;;  %v2143_v47 = vpop.f32.mrb[23].mxu1  ;;  %2961 = vmatpush1.bf16.msra.mxu0 %v2589_v38  ;;  %v2459_v60 = vmax.f32 %v2138_v29, 0.0  ;;  %5524 = vst [vmem:[#allocation11_spill] sm:$0xff] %v5238_v46  ;;  %v5244_v6 = vld [vmem:[%s5509_s5 + $0x74] ss:$8 sps:$4 sm:$0xff]  }
 0x2bd   :  { %v2144_v1 = vadd.f32 %v2143_v47, %v5051_v25  ;;  %v2460_v52 = vmax.f32 %v2140_v44, 0.0  ;;  %5525 = vst [vmem:[#allocation12_spill] sm:$0xff] %v5244_v6 }
 0x2be   :  { %v2464_v53 = vmax.f32 %v2142_v14, 0.0 }
 0x2bf   :  { %v2465_v43 = vmax.f32 %v2144_v1, 0.0  ;;  %2922 = vmatmul.mubr.bf16.gmra.mrb[84].mxu1 %v5222_v34 }
 0x2c0   :  { %v2594_v2 = vpack.c.bf16 %v2464_v53, %v2459_v60  ;;  %2931 = vmatprep.mubr.bf16.mxu1 %v5228_v26 }
 0x2c1   :  { %v2595_v56 = vpack.c.bf16 %v2465_v43, %v2460_v52  ;;  %v2147_v15 = vpop.f32.mrb[24].mxu1 }
 0x2c2   :  { %v2148_v27 = vadd.f32 %v2147_v15, %v5056_v18  ;;  %v2149_v40 = vpop.f32.mrb[25].mxu1 }
 0x2c3   :  { %v2150_v38 = vadd.f32 %v2149_v40, %v5056_v18  ;;  %v2151_v58 = vpop.f32.mrb[26].mxu1  ;;  %2962 = vmatprep.subr.bf16.mxu0 %v2595_v56 }
 0x2c4   :  { %v2152_v5 = vadd.f32 %v2151_v58, %v5059_v55  ;;  %v2153_v29 = vpop.f32.mrb[27].mxu1  ;;  %2963 = vmatpush1.bf16.msra.mxu0 %v2594_v2  ;;  %v2469_v14 = vmax.f32 %v2148_v27, 0.0 }
 0x2c5   :  { %v2154_v44 = vadd.f32 %v2153_v29, %v5059_v55  ;;  %v2470_v1 = vmax.f32 %v2150_v38, 0.0  ;;  %v5254_v38 = vld [vmem:[%s5509_s5 + $0x70] ss:$8 sps:$4 sm:$0xff]   ;;  %s3927_s5 = smov [#allocation6]  }
 0x2c6   :  { %v2474_v47 = vmax.f32 %v2152_v5, 0.0  ;;  %5526 = vst [vmem:[#allocation13_spill] sm:$0xff] %v5254_v38  ;;  %s3411_s15 = sshll.u32 %s3927_s5, 4  ;;  %s3412_s15 = int_to_ptr.vmem [resolvable:$true] %s3411_s15 }
 0x2c7   :  { %v2475_v60 = vmax.f32 %v2154_v44, 0.0  ;;  %2932 = vmatmul.mubr.bf16.gmra.mrb[88].mxu1 %v5238_v46  ;;  %s3897_s16 = scalar_lea.vmem %s3412_s15, 10240  ;;  %p3902_p9 = scmp.lt.s32.totalorder %s3412_s15, %s3412_s15 }
 0x2c8   :  { %v2599_v53 = vpack.c.bf16 %v2474_v47, %v2469_v14  ;;  %2941 = vmatprep.mubr.bf16.mxu1 %v5244_v6  ;;  %p3898_p8 = scmp.ne.s32.totalorder %s3412_s15, %s3897_s16  ;;  %p3903_p10 = scmp.lt.s32.totalorder %s3897_s16, %s3897_s16 }
 0x2c9   :  { %v2600_v52 = vpack.c.bf16 %v2475_v60, %v2470_v1  ;;  %v2157_v43 = vpop.f32.mrb[28].mxu1 }
 0x2ca   :  { %v2158_v2 = vadd.f32 %v2157_v43, %v5064_v12  ;;  %v2159_v56 = vpop.f32.mrb[29].mxu1  ;;  %p3904_p11 = por %p3903_p10, %p3902_p9 }
 0x2cb   :  { %v2160_v15 = vadd.f32 %v2159_v56, %v5064_v12  ;;  %v2161_v40 = vpop.f32.mrb[30].mxu1  ;;  %2964 = vmatprep.subr.bf16.mxu0 %v2600_v52 }
 0x2cc   :  { %v2162_v58 = vadd.f32 %v2161_v40, %v5067_v59  ;;  %v2163_v27 = vpop.f32.mrb[31].mxu1  ;;  %2965 = vmatpush1.bf16.msra.mxu0 %v2599_v53  ;;  %v2479_v29 = vmax.f32 %v2158_v2, 0.0  ;;  %p3905_p12 = pnand %p3904_p11, %p3898_p8 }
 0x2cd   :  { %v2164_v5 = vadd.f32 %v2163_v27, %v5067_v59  ;;  %v2480_v14 = vmax.f32 %v2160_v15, 0.0 }
 0x2ce   :  { %v2484_v44 = vmax.f32 %v2162_v58, 0.0 }
 0x2cf   :  { %v2485_v47 = vmax.f32 %v2164_v5, 0.0  ;;  %2942 = vmatmul.mubr.bf16.gmra.mrb[92].mxu1 %v5254_v38 }
 0x2d0   :  { %v2604_v1 = vpack.c.bf16 %v2484_v44, %v2479_v29  ;;  %3097 = vmatprep.mubr.bf16.mxu1 %v5037_v32 }
 0x2d1   :  { %v2605_v60 = vpack.c.bf16 %v2485_v47, %v2480_v14  ;;  %v2167_v52 = vpop.f32.mrb[32].mxu1 }
 0x2d2   :  { %v3563_v43 = vpop.f32.mrb[64].mxu0  ;;  %v2168_v53 = vadd.f32 %v2167_v52, %v5072_v20  ;;  %v2169_v56 = vpop.f32.mrb[33].mxu1 }
 0x2d3   :  { %v2289_v40 = vadd.f32 %v3563_v43, %v4982_v10  ;;  %v2280_v6 = vpop.f32.mrb[65].mxu0  ;;  %v2170_v27 = vadd.f32 %v2169_v56, %v5072_v20  ;;  %v2171_v2 = vpop.f32.mrb[34].mxu1  ;;  %2966 = vmatprep.subr.bf16.mxu0 %v2605_v60 }
 0x2d4   :  { %v2281_v15 = vadd.f32 %v2280_v6, %v4985_v45  ;;  %v3564_v58 = vpop.f32.mrb[66].mxu0  ;;  %v2172_v5 = vadd.f32 %v2171_v2, %v5075_v36  ;;  %v2173_v29 = vpop.f32.mrb[35].mxu1  ;;  %2967 = vmatpush1.bf16.msra.mxu0 %v2604_v1  ;;  %v2489_v10 = vmax.f32 %v2168_v53, 0.0 }
 0x2d5   :  { %v2292_v44 = vadd.f32 %v3564_v58, %v4988_v39  ;;  %v2283_v32 = vpop.f32.mrb[67].mxu0  ;;  %v2174_v14 = vadd.f32 %v2173_v29, %v5075_v36  ;;  %v2421_v52 = vmax.f32 %v2289_v40, 0.0  ;;  %v2490_v38 = vmax.f32 %v2170_v27, 0.0 }
 0x2d6   :  { %v2284_v47 = vadd.f32 %v2283_v32, %v4979_v35  ;;  %v2494_v43 = vmax.f32 %v2172_v5, 0.0  ;;  %v2411_v46 = vmax.f32 %v2281_v15, 0.0 }
 0x2d7   :  { %v2426_v56 = vmax.f32 %v2292_v44, 0.0  ;;  %v2495_v45 = vmax.f32 %v2174_v14, 0.0 }
 0x2d8   :  { %v2416_v6 = vmax.f32 %v2284_v47, 0.0  ;;  %v2609_v60 = vpack.c.bf16 %v2494_v43, %v2489_v10 }
 0x2d9   :  { %v5267_v26 = vpack.c.bf16 %v2426_v56, %v2421_v52  ;;  %v2610_v2 = vpack.c.bf16 %v2495_v45, %v2490_v38  ;;  %v2177_v39 = vpop.f32.mrb[36].mxu1 }
 0x2da   :  { %v5269_v34 = vpack.c.bf16 %v2416_v6, %v2411_v46  ;;  %v3567_v1 = vpop.f32.mrb[68].mxu0  ;;  %v2178_v58 = vadd.f32 %v2177_v39, %v5080_v19  ;;  %v2179_v29 = vpop.f32.mrb[37].mxu1 }
 0x2db   :  { %v2305_v35 = vadd.f32 %v3567_v1, %v5016_v50  ;;  %v2296_v53 = vpop.f32.mrb[69].mxu0  ;;  %v2180_v40 = vadd.f32 %v2179_v29, %v5080_v19  ;;  %v2181_v27 = vpop.f32.mrb[38].mxu1  ;;  %2968 = vmatprep.subr.bf16.mxu0 %v2610_v2 }
 0x2dc   :  { %v2297_v15 = vadd.f32 %v2296_v53, %v4995_v57  ;;  %v3568_v5 = vpop.f32.mrb[70].mxu0  ;;  %v2182_v44 = vadd.f32 %v2181_v27, %v5083_v4  ;;  %v2183_v38 = vpop.f32.mrb[39].mxu1  ;;  %2969 = vmatpush1.bf16.msra.mxu0 %v2609_v60  ;;  %v2499_v50 = vmax.f32 %v2178_v58, 0.0 }
 0x2dd   :  { %v2308_v46 = vadd.f32 %v3568_v5, %v5022_v51  ;;  %v2299_v32 = vpop.f32.mrb[71].mxu0  ;;  %v2184_v14 = vadd.f32 %v2183_v38, %v5083_v4  ;;  %v2441_v10 = vmax.f32 %v2305_v35, 0.0  ;;  %v2500_v56 = vmax.f32 %v2180_v40, 0.0 }
 0x2de   :  { %v2300_v47 = vadd.f32 %v2299_v32, %v5009_v7  ;;  %v2504_v52 = vmax.f32 %v2182_v44, 0.0  ;;  %v2431_v45 = vmax.f32 %v2297_v15, 0.0 }
 0x2df   :  { %v2446_v43 = vmax.f32 %v2308_v46, 0.0  ;;  %v2505_v57 = vmax.f32 %v2184_v14, 0.0 }
 0x2e0   :  { %v2436_v6 = vmax.f32 %v2300_v47, 0.0  ;;  %v2614_v2 = vpack.c.bf16 %v2504_v52, %v2499_v50 }
 0x2e1   :  { %v5279_v39 = vpack.c.bf16 %v2446_v43, %v2441_v10  ;;  %v2615_v1 = vpack.c.bf16 %v2505_v57, %v2500_v56  ;;  %v2187_v51 = vpop.f32.mrb[40].mxu1 }
 0x2e2   :  { %v5281_v29 = vpack.c.bf16 %v2436_v6, %v2431_v45  ;;  %v3571_v60 = vpop.f32.mrb[72].mxu0  ;;  %v2188_v53 = vadd.f32 %v2187_v51, %v5088_v22  ;;  %v2189_v27 = vpop.f32.mrb[41].mxu1 }
 0x2e3   :  { %v2321_v7 = vadd.f32 %v3571_v60, %v5048_v8  ;;  %v2312_v58 = vpop.f32.mrb[73].mxu0  ;;  %v2190_v35 = vadd.f32 %v2189_v27, %v5088_v22  ;;  %v2191_v40 = vpop.f32.mrb[42].mxu1  ;;  %2970 = vmatprep.subr.bf16.mxu0 %v2615_v1 }
 0x2e4   :  { %v2313_v15 = vadd.f32 %v2312_v58, %v5031_v41  ;;  %v3572_v5 = vpop.f32.mrb[74].mxu0  ;;  %v2192_v44 = vadd.f32 %v2191_v40, %v5091_v62  ;;  %v2193_v38 = vpop.f32.mrb[43].mxu1  ;;  %2971 = vmatpush1.bf16.msra.mxu0 %v2614_v2  ;;  %v2509_v8 = vmax.f32 %v2188_v53, 0.0 }
 0x2e5   :  { %v2324_v46 = vadd.f32 %v3572_v5, %v5051_v25  ;;  %v2315_v32 = vpop.f32.mrb[75].mxu0  ;;  %v2194_v14 = vadd.f32 %v2193_v38, %v5091_v62  ;;  %v2461_v50 = vmax.f32 %v2321_v7, 0.0  ;;  %v2510_v43 = vmax.f32 %v2190_v35, 0.0 }
 0x2e6   :  { %v2316_v47 = vadd.f32 %v2315_v32, %v5039_v42  ;;  %v2514_v10 = vmax.f32 %v2192_v44, 0.0  ;;  %v2451_v56 = vmax.f32 %v2313_v15, 0.0 }
 0x2e7   :  { %v2466_v52 = vmax.f32 %v2324_v46, 0.0  ;;  %v2515_v41 = vmax.f32 %v2194_v14, 0.0 }
 0x2e8   :  { %v2456_v45 = vmax.f32 %v2316_v47, 0.0  ;;  %v2619_v57 = vpack.c.bf16 %v2514_v10, %v2509_v8 }
 0x2e9   :  { %v5291_v6 = vpack.c.bf16 %v2466_v52, %v2461_v50  ;;  %v2620_v1 = vpack.c.bf16 %v2515_v41, %v2510_v43  ;;  %v2197_v25 = vpop.f32.mrb[44].mxu1 }
 0x2ea   :  { %v5293_v51 = vpack.c.bf16 %v2456_v45, %v2451_v56  ;;  %v3575_v2 = vpop.f32.mrb[76].mxu0  ;;  %v2198_v60 = vadd.f32 %v2197_v25, %v5096_v37  ;;  %v2199_v27 = vpop.f32.mrb[45].mxu1 }
 0x2eb   :  { %v2337_v42 = vadd.f32 %v3575_v2, %v5064_v12  ;;  %v2328_v53 = vpop.f32.mrb[77].mxu0  ;;  %v2200_v7 = vadd.f32 %v2199_v27, %v5096_v37  ;;  %v2201_v58 = vpop.f32.mrb[46].mxu1  ;;  %2972 = vmatprep.subr.bf16.mxu0 %v2620_v1 }
 0x2ec   :  { %v2329_v35 = vadd.f32 %v2328_v53, %v5056_v18  ;;  %v3576_v40 = vpop.f32.mrb[78].mxu0  ;;  %v2202_v15 = vadd.f32 %v2201_v58, %v5099_v33  ;;  %v2203_v5 = vpop.f32.mrb[47].mxu1  ;;  %2973 = vmatpush1.bf16.msra.mxu0 %v2619_v57  ;;  %v2519_v12 = vmax.f32 %v2198_v60, 0.0 }
 0x2ed   :  { %v2340_v44 = vadd.f32 %v3576_v40, %v5067_v59  ;;  %v2331_v38 = vpop.f32.mrb[79].mxu0  ;;  %v2204_v46 = vadd.f32 %v2203_v5, %v5099_v33  ;;  %v2481_v14 = vmax.f32 %v2337_v42, 0.0  ;;  %v2520_v50 = vmax.f32 %v2200_v7, 0.0 }
 0x2ee   :  { %v2332_v32 = vadd.f32 %v2331_v38, %v5059_v55  ;;  %v2524_v47 = vmax.f32 %v2202_v15, 0.0  ;;  %v2471_v10 = vmax.f32 %v2329_v35, 0.0 }
 0x2ef   :  { %v2486_v8 = vmax.f32 %v2340_v44, 0.0  ;;  %v2525_v18 = vmax.f32 %v2204_v46, 0.0 }
 0x2f0   :  { %v2476_v52 = vmax.f32 %v2332_v32, 0.0  ;;  %v2624_v43 = vpack.c.bf16 %v2524_v47, %v2519_v12 }
 0x2f1   :  { %v5303_v56 = vpack.c.bf16 %v2486_v8, %v2481_v14  ;;  %v2625_v41 = vpack.c.bf16 %v2525_v18, %v2520_v50  ;;  %v2207_v59 = vpop.f32.mrb[48].mxu1 }
 0x2f2   :  { %v5305_v45 = vpack.c.bf16 %v2476_v52, %v2471_v10  ;;  %v3579_v57 = vpop.f32.mrb[80].mxu0  ;;  %v2208_v1 = vadd.f32 %v2207_v59, %v5104_v21  ;;  %v2209_v25 = vpop.f32.mrb[49].mxu1 }
 0x2f3   :  { %v2353_v55 = vadd.f32 %v3579_v57, %v5080_v19  ;;  %v2344_v2 = vpop.f32.mrb[81].mxu0  ;;  %v2210_v60 = vadd.f32 %v2209_v25, %v5104_v21  ;;  %v2211_v27 = vpop.f32.mrb[50].mxu1  ;;  %2974 = vmatprep.subr.bf16.mxu0 %v2625_v41 }
 0x2f4   :  { %v2345_v42 = vadd.f32 %v2344_v2, %v5072_v20  ;;  %v3580_v53 = vpop.f32.mrb[82].mxu0  ;;  %v2212_v7 = vadd.f32 %v2211_v27, %v5107_v11  ;;  %v2213_v58 = vpop.f32.mrb[51].mxu1  ;;  %2975 = vmatpush1.bf16.msra.mxu0 %v2624_v43  ;;  %v2529_v19 = vmax.f32 %v2208_v1, 0.0 }
 0x2f5   :  { %v2356_v35 = vadd.f32 %v3580_v53, %v5083_v4  ;;  %v2347_v40 = vpop.f32.mrb[83].mxu0  ;;  %v2214_v15 = vadd.f32 %v2213_v58, %v5107_v11  ;;  %v2501_v44 = vmax.f32 %v2353_v55, 0.0  ;;  %v2530_v32 = vmax.f32 %v2210_v60, 0.0 }
 0x2f6   :  { %v2348_v5 = vadd.f32 %v2347_v40, %v5075_v36  ;;  %v2534_v38 = vmax.f32 %v2212_v7, 0.0  ;;  %v2491_v12 = vmax.f32 %v2345_v42, 0.0 }
 0x2f7   :  { %v2506_v46 = vmax.f32 %v2356_v35, 0.0  ;;  %v2535_v20 = vmax.f32 %v2214_v15, 0.0 }
 0x2f8   :  { %v2496_v14 = vmax.f32 %v2348_v5, 0.0  ;;  %v2629_v47 = vpack.c.bf16 %v2534_v38, %v2529_v19 }
 0x2f9   :  { %v2616_v8 = vpack.c.bf16 %v2506_v46, %v2501_v44  ;;  %v2630_v50 = vpack.c.bf16 %v2535_v20, %v2530_v32  ;;  %v2217_v18 = vpop.f32.mrb[52].mxu1 }
 0x2fa   :  { %v2611_v10 = vpack.c.bf16 %v2496_v14, %v2491_v12  ;;  %v3583_v4 = vpop.f32.mrb[84].mxu0  ;;  %v2218_v52 = vadd.f32 %v2217_v18, %v5112_v17  ;;  %v2219_v43 = vpop.f32.mrb[53].mxu1 }
 0x2fb   :  { %v2369_v41 = vadd.f32 %v3583_v4, %v5096_v37  ;;  %v2360_v36 = vpop.f32.mrb[85].mxu0  ;;  %v2220_v59 = vadd.f32 %v2219_v43, %v5112_v17  ;;  %v2221_v57 = vpop.f32.mrb[54].mxu1  ;;  %2976 = vmatprep.subr.bf16.mxu0 %v2630_v50 }
 0x2fc   :  { %v2361_v1 = vadd.f32 %v2360_v36, %v5088_v22  ;;  %v3584_v25 = vpop.f32.mrb[86].mxu0  ;;  %3481 = vmatprep.subr.bf16.mxu1 %v2611_v10  ;;  %v2222_v55 = vadd.f32 %v2221_v57, %v5115_v61  ;;  %v2223_v2 = vpop.f32.mrb[55].mxu1  ;;  %2977 = vmatpush1.bf16.msra.mxu0 %v2629_v47  ;;  %v2539_v53 = vmax.f32 %v2218_v52, 0.0 }
 0x2fd   :  { %v2372_v60 = vadd.f32 %v3584_v25, %v5099_v33  ;;  %v2363_v27 = vpop.f32.mrb[87].mxu0  ;;  %3482 = vmatpush3.bf16.msra.mxu1 %v5269_v34  ;;  %v2224_v37 = vadd.f32 %v2223_v2, %v5115_v61  ;;  %v2521_v7 = vmax.f32 %v2369_v41, 0.0  ;;  %v2540_v35 = vmax.f32 %v2220_v59, 0.0 }
 0x2fe   :  { %v2364_v42 = vadd.f32 %v2363_v27, %v5091_v62  ;;  %3483 = vmatprep.subr.bf16.mxu1 %v2616_v8  ;;  %v2544_v22 = vmax.f32 %v2222_v55, 0.0  ;;  %v2511_v40 = vmax.f32 %v2361_v1, 0.0 }
 0x2ff   :  { %v2526_v58 = vmax.f32 %v2372_v60, 0.0  ;;  %v2545_v15 = vmax.f32 %v2224_v37, 0.0 }
 0x300   :  { %v2516_v5 = vmax.f32 %v2364_v42, 0.0  ;;  %v2634_v19 = vpack.c.bf16 %v2544_v22, %v2539_v53 }
 0x301   :  { %v2626_v44 = vpack.c.bf16 %v2526_v58, %v2521_v7  ;;  %3484 = vmatpush3.bf16.msra.mxu1 %v5267_v26  ;;  %v2635_v33 = vpack.c.bf16 %v2545_v15, %v2540_v35  ;;  %v2227_v34 = vpop.f32.mrb[56].mxu1 }
 0x302   :  { %v2621_v38 = vpack.c.bf16 %v2516_v5, %v2511_v40  ;;  %v3587_v46 = vpop.f32.mrb[88].mxu0  ;;  %v2228_v32 = vadd.f32 %v2227_v34, %v5120_v13  ;;  %v2229_v62 = vpop.f32.mrb[57].mxu1 }
 0x303   :  { %v2385_v12 = vadd.f32 %v3587_v46, %v5112_v17  ;;  %v2376_v20 = vpop.f32.mrb[89].mxu0  ;;  %v2230_v14 = vadd.f32 %v2229_v62, %v5120_v13  ;;  %v2231_v47 = vpop.f32.mrb[58].mxu1  ;;  %2978 = vmatprep.subr.bf16.mxu0 %v2635_v33 }
 0x304   :  { %v2377_v8 = vadd.f32 %v2376_v20, %v5104_v21  ;;  %v3588_v50 = vpop.f32.mrb[90].mxu0  ;;  %3485 = vmatprep.subr.bf16.mxu1 %v2621_v38  ;;  %v2232_v26 = vadd.f32 %v2231_v47, %v5123_v28  ;;  %v2233_v10 = vpop.f32.mrb[59].mxu1  ;;  %2979 = vmatpush1.bf16.msra.mxu0 %v2634_v19  ;;  %v2549_v43 = vmax.f32 %v2228_v32, 0.0 }
 0x305   :  { %v2388_v18 = vadd.f32 %v3588_v50, %v5115_v61  ;;  %v2379_v4 = vpop.f32.mrb[91].mxu0  ;;  %3486 = vmatpush3.bf16.msra.mxu1 %v5281_v29  ;;  %v2234_v17 = vadd.f32 %v2233_v10, %v5123_v28  ;;  %v2541_v41 = vmax.f32 %v2385_v12, 0.0  ;;  %v2550_v59 = vmax.f32 %v2230_v14, 0.0 }
 0x306   :  { %v2380_v52 = vadd.f32 %v2379_v4, %v5107_v11  ;;  %3487 = vmatprep.subr.bf16.mxu1 %v2626_v44  ;;  %v2554_v21 = vmax.f32 %v2232_v26, 0.0  ;;  %v2531_v57 = vmax.f32 %v2377_v8, 0.0  ;;  %v3211_v26 = vld [vmem:[#allocation3 + $0x88] sm:$0xff] }
 0x307   :  { %v2546_v36 = vmax.f32 %v2388_v18, 0.0  ;;  %v2555_v1 = vmax.f32 %v2234_v17, 0.0 }
 0x308   :  { %v2536_v25 = vmax.f32 %v2380_v52, 0.0  ;;  %v2639_v55 = vpack.c.bf16 %v2554_v21, %v2549_v43 }
 0x309   :  { %v2636_v2 = vpack.c.bf16 %v2546_v36, %v2541_v41  ;;  %3488 = vmatpush3.bf16.msra.mxu1 %v5279_v39  ;;  %v2640_v61 = vpack.c.bf16 %v2555_v1, %v2550_v59  ;;  %v2237_v29 = vpop.f32.mrb[60].mxu1  ;;  %v3164_v41 = vld [vmem:[#allocation3 + $0x10] sm:$0xff] }
 0x30a   :  { %v2631_v60 = vpack.c.bf16 %v2536_v25, %v2531_v57  ;;  %v3591_v27 = vpop.f32.mrb[92].mxu0  ;;  %v2238_v37 = vadd.f32 %v2237_v29, %v5128_v49  ;;  %v2239_v11 = vpop.f32.mrb[61].mxu1  ;;  %v3212_v59 = vld [vmem:[#allocation3 + $0x90] sm:$0xff]  ;;  %v3213_v29 = vld [vmem:[#allocation3 + $0x98] sm:$0xff] }
 0x30b   :  { %v2401_v42 = vadd.f32 %v3591_v27, %v5128_v49  ;;  %v2392_v53 = vpop.f32.mrb[93].mxu0  ;;  %v2240_v7 = vadd.f32 %v2239_v11, %v5128_v49  ;;  %v2241_v22 = vpop.f32.mrb[62].mxu1  ;;  %2980 = vmatprep.subr.bf16.mxu0 %v2640_v61 }
 0x30c   :  { %v2393_v58 = vadd.f32 %v2392_v53, %v5120_v13  ;;  %v3592_v35 = vpop.f32.mrb[94].mxu0  ;;  %3489 = vmatprep.subr.bf16.mxu1 %v2631_v60  ;;  %v2242_v39 = vadd.f32 %v2241_v22, %v5131_v48  ;;  %v2243_v40 = vpop.f32.mrb[63].mxu1  ;;  %2981 = vmatpush1.bf16.msra.mxu0 %v2639_v55  ;;  %v2559_v49 = vmax.f32 %v2238_v37, 0.0  ;;  %v3165_v55 = vld [vmem:[#allocation3 + $0x18] sm:$0xff]  ;;  %v3166_v22 = vld [vmem:[#allocation3 + $0x20] sm:$0xff] }
 0x30d   :  { %v2404_v15 = vadd.f32 %v3592_v35, %v5131_v48  ;;  %v2395_v5 = vpop.f32.mrb[95].mxu0  ;;  %3490 = vmatpush3.bf16.msra.mxu1 %v5293_v51  ;;  %v2244_v19 = vadd.f32 %v2243_v40, %v5131_v48  ;;  %v2561_v33 = vmax.f32 %v2401_v42, 0.0  ;;  %v2560_v34 = vmax.f32 %v2240_v7, 0.0  ;;  %v5528_v48 = vld [vmem:[#allocation10_spill] sm:$0xff] }
 0x30e   :  { %v2396_v44 = vadd.f32 %v2395_v5, %v5123_v28  ;;  %3491 = vmatprep.subr.bf16.mxu1 %v2636_v2  ;;  %v2564_v13 = vmax.f32 %v2242_v39, 0.0  ;;  %v2551_v46 = vmax.f32 %v2393_v58, 0.0  ;;  %v5527_v28 = vld [vmem:[#allocation9_spill] sm:$0xff] }
 0x30f   :  { %v2566_v38 = vmax.f32 %v2404_v15, 0.0  ;;  %v2565_v32 = vmax.f32 %v2244_v19, 0.0  ;;  %v3214_v39 = vld [vmem:[#allocation3 + $0xa0] sm:$0xff]  ;;  %v3167_v19 = vld [vmem:[#allocation3 + $0x28] sm:$0xff] }
 0x310   :  { %v2556_v62 = vmax.f32 %v2396_v44, 0.0  ;;  %v2644_v12 = vpack.c.bf16 %v2564_v13, %v2559_v49  ;;  %v3215_v13 = vld [vmem:[#allocation3 + $0xa8] sm:$0xff] }
 0x311   :  { %v2646_v20 = vpack.c.bf16 %v2566_v38, %v2561_v33  ;;  %3492 = vmatpush3.bf16.msra.mxu1 %v5291_v6  ;;  %v2645_v14 = vpack.c.bf16 %v2565_v32, %v2560_v34 }
 0x312   :  { %v2641_v47 = vpack.c.bf16 %v2556_v62, %v2551_v46 }
 0x313   :  { %2982 = vmatprep.subr.bf16.mxu0 %v2645_v14 }
 0x314   :  { %3493 = vmatprep.subr.bf16.mxu1 %v2641_v47  ;;  %2983 = vmatpush1.bf16.msra.mxu0 %v2644_v12 }
 0x315   :  { %3494 = vmatpush3.bf16.msra.mxu1 %v5305_v45 }
 0x316   :  { %3495 = vmatprep.subr.bf16.mxu1 %v2646_v20  ;;  %v3168_v20 = vld [vmem:[#allocation3 + $0x30] sm:$0xff] }
 0x317   :  { %2985 = vmatmul.mubr.bf16.vlgmr.msra.gmra.mrb[96].mxu0 %v5141_v3 }
 0x318   :  { %2994 = vmatprep.mubr.bf16.mxu0 %v5148_v24 }
 0x319   :  { %3496 = vmatpush3.bf16.msra.mxu1 %v5303_v56  ;;  %v3163_v56 = vld [vmem:[#allocation3 + $0x8] sm:$0xff] }
 0x31c   :  { %3098 = vmatmul.mubr.bf16.vlgmr.msra.gmra.mrb[96].mxu1 %v5141_v3  ;;  %v5529_v3 = vld [vmem:[#allocation11_spill] sm:$0xff] }
 0x31d   :  { %3105 = vmatprep.mubr.bf16.mxu1 %v5148_v24  ;;  %v5530_v24 = vld [vmem:[#allocation12_spill] sm:$0xff] }
 0x31f   :  { %2995 = vmatmul.mubr.bf16.gmra.mrb[100].mxu0 %v5158_v63 }
 0x320   :  { %3004 = vmatprep.mubr.bf16.mxu0 %v5164_v0 }
 0x324   :  { %3106 = vmatmul.mubr.bf16.gmra.mrb[100].mxu1 %v5158_v63  ;;  %v5531_v63 = vld [vmem:[#allocation13_spill] sm:$0xff] }
 0x325   :  { %3113 = vmatprep.mubr.bf16.mxu1 %v5164_v0  ;;  %v5377_v0 = vpop.permute.xlu1 %2681 }
 0x327   :  { %3005 = vmatmul.mubr.bf16.gmra.mrb[104].mxu0 %v5174_v23 }
 0x328   :  { %3014 = vmatprep.mubr.bf16.mxu0 %v5180_v9 }
 0x329   :  { %v5385_v52 = vpop.permute.xlu1 %2691 }
 0x32c   :  { %3114 = vmatmul.mubr.bf16.gmra.mrb[104].mxu1 %v5174_v23 }
 0x32d   :  { %3121 = vmatprep.mubr.bf16.mxu1 %v5180_v9  ;;  %v3162_v9 = vld [vmem:[#allocation3] sm:$0xff]  ;;  %v5393_v53 = vpop.permute.xlu1 %2701 }
 0x32f   :  { %3015 = vmatmul.mubr.bf16.gmra.mrb[108].mxu0 %v5190_v31 }
 0x330   :  { %3024 = vmatprep.mubr.bf16.mxu0 %v5196_v30 }
 0x331   :  { %v5401_v62 = vpop.permute.xlu1 %2711 }
 0x334   :  { %3122 = vmatmul.mubr.bf16.gmra.mrb[108].mxu1 %v5190_v31 }
 0x335   :  { %3129 = vmatprep.mubr.bf16.mxu1 %v5196_v30 }
 0x337   :  { %3025 = vmatmul.mubr.bf16.gmra.mrb[112].mxu0 %v5206_v16 }
 0x338   :  { %3034 = vmatprep.mubr.bf16.mxu0 %v5212_v54 }
 0x33c   :  { %3130 = vmatmul.mubr.bf16.gmra.mrb[112].mxu1 %v5206_v16  ;;  %v3210_v16 = vld [vmem:[#allocation3 + $0x80] sm:$0xff] }
 0x33d   :  { %3137 = vmatprep.mubr.bf16.mxu1 %v5212_v54  ;;  %v5380_v54 = vpop.permute.xlu0 %2686 }
 0x33f   :  { %3035 = vmatmul.mubr.bf16.gmra.mrb[116].mxu0 %v5527_v28 }
 0x340   :  { %3044 = vmatprep.mubr.bf16.mxu0 %v5528_v48 }
 0x341   :  { %v5388_v57 = vpop.permute.xlu0 %2696 }
 0x344   :  { %3138 = vmatmul.mubr.bf16.gmra.mrb[116].mxu1 %v5527_v28  ;;  %v3216_v28 = vld [vmem:[#allocation3 + $0xb0] sm:$0xff] }
 0x345   :  { %3145 = vmatprep.mubr.bf16.mxu1 %v5528_v48  ;;  %v5396_v40 = vpop.permute.xlu0 %2706 }
 0x347   :  { %3045 = vmatmul.mubr.bf16.gmra.mrb[120].mxu0 %v5529_v3 }
 0x348   :  { %3054 = vmatprep.mubr.bf16.mxu0 %v5530_v24 }
 0x349   :  { %v5404_v48 = vpop.permute.xlu0 %2716 }
 0x34c   :  { %3146 = vmatmul.mubr.bf16.gmra.mrb[120].mxu1 %v5529_v3 }
 0x34d   :  { %3153 = vmatprep.mubr.bf16.mxu1 %v5530_v24 }
 0x34f   :  { %3055 = vmatmul.mubr.bf16.gmra.mrb[124].mxu0 %v5531_v63 }
 0x354   :  { %3154 = vmatmul.mubr.bf16.gmra.mrb[124].mxu1 %v5531_v63  ;;  %v3169_v63 = vld [vmem:[#allocation3 + $0x38] sm:$0xff] }
 0x36a   :  { %v2873_v23 = vpop.f32.mrb[64].mxu1 }
 0x36b   :  { %v2874_v31 = vadd.f32 %v2873_v23, %v5377_v0  ;;  %v2875_v30 = vpop.f32.mrb[65].mxu1 }
 0x36c   :  { %v2876_v6 = vadd.f32 %v2875_v30, %v5377_v0  ;;  %v2877_v51 = vpop.f32.mrb[66].mxu1  ;;  %v3217_v30 = vld [vmem:[#allocation3 + $0xb8] sm:$0xff] }
 0x36d   :  { %v3178_v45 = vadd.f32 %v3162_v9, %v2874_v31  ;;  %v2878_v8 = vadd.f32 %v2877_v51, %v5380_v54  ;;  %v2879_v50 = vpop.f32.mrb[67].mxu1 }
 0x36e   :  { %v3226_v10 = vadd.f32 %v3210_v16, %v2876_v6  ;;  %v2880_v18 = vadd.f32 %v2879_v50, %v5380_v54  ;;  %v3170_v50 = vld [vmem:[#allocation3 + $0x40] sm:$0xff] }
 0x36f   :  { %3194 = vst [vmem:[#allocation6] sm:$0xff] %v3178_v45  ;;  %v3179_v4 = vadd.f32 %v3163_v56, %v2878_v8  ;;  %v5409_v45 = vpop.permute.xlu1 %2721 }
 0x370   :  { %3243 = vst [vmem:[#allocation6 + $0x80] sm:$0xff] %v3226_v10  ;;  %v3227_v17 = vadd.f32 %v3211_v26, %v2880_v18  ;;  %v3218_v18 = vld [vmem:[#allocation3 + $0xc0] sm:$0xff] }
 0x371   :  { %3195 = vst [vmem:[#allocation6 + $0x8] sm:$0xff] %v3179_v4  ;;  %v5412_v4 = vpop.permute.xlu0 %2726 }
 0x372   :  { %3244 = vst [vmem:[#allocation6 + $0x88] sm:$0xff] %v3227_v17  ;;  %v2883_v43 = vpop.f32.mrb[68].mxu1 }
 0x373   :  { %v2884_v21 = vadd.f32 %v2883_v43, %v5385_v52  ;;  %v2885_v36 = vpop.f32.mrb[69].mxu1 }
 0x374   :  { %v2886_v1 = vadd.f32 %v2885_v36, %v5385_v52  ;;  %v2887_v25 = vpop.f32.mrb[70].mxu1 }
 0x375   :  { %v3180_v2 = vadd.f32 %v3164_v41, %v2884_v21  ;;  %v2888_v61 = vadd.f32 %v2887_v25, %v5388_v57  ;;  %v2889_v60 = vpop.f32.mrb[71].mxu1  ;;  %v3171_v41 = vld [vmem:[#allocation3 + $0x48] sm:$0xff] }
 0x376   :  { %v3228_v27 = vadd.f32 %v3212_v59, %v2886_v1  ;;  %v2890_v37 = vadd.f32 %v2889_v60, %v5388_v57  ;;  %v3219_v1 = vld [vmem:[#allocation3 + $0xc8] sm:$0xff]  ;;  %v5417_v60 = vpop.permute.xlu1 %2731 }
 0x377   :  { %3196 = vst [vmem:[#allocation6 + $0x10] sm:$0xff] %v3180_v2  ;;  %v3181_v11 = vadd.f32 %v3165_v55, %v2888_v61 }
 0x378   :  { %3245 = vst [vmem:[#allocation6 + $0x90] sm:$0xff] %v3228_v27  ;;  %v3229_v42 = vadd.f32 %v3213_v29, %v2890_v37  ;;  %v3172_v27 = vld [vmem:[#allocation3 + $0x50] sm:$0xff] }
 0x379   :  { %3197 = vst [vmem:[#allocation6 + $0x18] sm:$0xff] %v3181_v11 }
 0x37a   :  { %3246 = vst [vmem:[#allocation6 + $0x98] sm:$0xff] %v3229_v42  ;;  %v2893_v7 = vpop.f32.mrb[72].mxu1  ;;  %v3220_v42 = vld [vmem:[#allocation3 + $0xd0] sm:$0xff] }
 0x37b   :  { %v2894_v58 = vadd.f32 %v2893_v7, %v5393_v53  ;;  %v2895_v35 = vpop.f32.mrb[73].mxu1  ;;  %v5420_v7 = vpop.permute.xlu0 %2736 }
 0x37c   :  { %v2896_v15 = vadd.f32 %v2895_v35, %v5393_v53  ;;  %v2897_v5 = vpop.f32.mrb[74].mxu1  ;;  %v3173_v35 = vld [vmem:[#allocation3 + $0x58] sm:$0xff] }
 0x37d   :  { %v3182_v44 = vadd.f32 %v3166_v22, %v2894_v58  ;;  %v2898_v49 = vadd.f32 %v2897_v5, %v5396_v40  ;;  %v2899_v33 = vpop.f32.mrb[75].mxu1 }
 0x37e   :  { %v3230_v38 = vadd.f32 %v3214_v39, %v2896_v15  ;;  %v2900_v34 = vadd.f32 %v2899_v33, %v5396_v40 }
 0x37f   :  { %3198 = vst [vmem:[#allocation6 + $0x20] sm:$0xff] %v3182_v44  ;;  %v3183_v46 = vadd.f32 %v3167_v19, %v2898_v49  ;;  %v3221_v19 = vld [vmem:[#allocation3 + $0xd8] sm:$0xff] }
 0x380   :  { %3247 = vst [vmem:[#allocation6 + $0xa0] sm:$0xff] %v3230_v38  ;;  %v3231_v32 = vadd.f32 %v3215_v13, %v2900_v34  ;;  %v5425_v38 = vpop.permute.xlu1 %2741 }
 0x381   :  { %3199 = vst [vmem:[#allocation6 + $0x28] sm:$0xff] %v3183_v46  ;;  %v3174_v46 = vld [vmem:[#allocation3 + $0x60] sm:$0xff] }
 0x382   :  { %3248 = vst [vmem:[#allocation6 + $0xa8] sm:$0xff] %v3231_v32  ;;  %v2903_v12 = vpop.f32.mrb[76].mxu1 }
 0x383   :  { %v2904_v14 = vadd.f32 %v2903_v12, %v5401_v62  ;;  %v2905_v47 = vpop.f32.mrb[77].mxu1 }
 0x384   :  { %v2906_v3 = vadd.f32 %v2905_v47, %v5401_v62  ;;  %v2907_v24 = vpop.f32.mrb[78].mxu1 }
 0x385   :  { %v3184_v23 = vadd.f32 %v3168_v20, %v2904_v14  ;;  %v2908_v9 = vadd.f32 %v2907_v24, %v5404_v48  ;;  %v2909_v31 = vpop.f32.mrb[79].mxu1  ;;  %v3222_v20 = vld [vmem:[#allocation3 + $0xe0] sm:$0xff]  ;;  %v5428_v14 = vpop.permute.xlu0 %2746 }
 0x386   :  { %v3232_v16 = vadd.f32 %v3216_v28, %v2906_v3  ;;  %v2910_v6 = vadd.f32 %v2909_v31, %v5404_v48  ;;  %v3175_v3 = vld [vmem:[#allocation3 + $0x68] sm:$0xff] }
 0x387   :  { %3200 = vst [vmem:[#allocation6 + $0x30] sm:$0xff] %v3184_v23  ;;  %v3185_v51 = vadd.f32 %v3169_v63, %v2908_v9  ;;  %v3223_v9 = vld [vmem:[#allocation3 + $0xe8] sm:$0xff] }
 0x388   :  { %3249 = vst [vmem:[#allocation6 + $0xb0] sm:$0xff] %v3232_v16  ;;  %v3233_v56 = vadd.f32 %v3217_v30, %v2910_v6 }
 0x389   :  { %3201 = vst [vmem:[#allocation6 + $0x38] sm:$0xff] %v3185_v51  ;;  %v5433_v51 = vpop.permute.xlu1 %2751 }
 0x38a   :  { %3250 = vst [vmem:[#allocation6 + $0xb8] sm:$0xff] %v3233_v56  ;;  %v2913_v8 = vpop.f32.mrb[80].mxu1 }
 0x38b   :  { %v2914_v26 = vadd.f32 %v2913_v8, %v5409_v45  ;;  %v2915_v10 = vpop.f32.mrb[81].mxu1  ;;  %v3176_v8 = vld [vmem:[#allocation3 + $0x70] sm:$0xff] }
 0x38c   :  { %v2916_v17 = vadd.f32 %v2915_v10, %v5409_v45  ;;  %v2917_v43 = vpop.f32.mrb[82].mxu1  ;;  %v3224_v10 = vld [vmem:[#allocation3 + $0xf0] sm:$0xff] }
 0x38d   :  { %v3186_v21 = vadd.f32 %v3170_v50, %v2914_v26  ;;  %v2918_v36 = vadd.f32 %v2917_v43, %v5412_v4  ;;  %v2919_v59 = vpop.f32.mrb[83].mxu1 }
 0x38e   :  { %v3234_v25 = vadd.f32 %v3218_v18, %v2916_v17  ;;  %v2920_v55 = vadd.f32 %v2919_v59, %v5412_v4  ;;  %v5436_v18 = vpop.permute.xlu0 %2756 }
 0x38f   :  { %3202 = vst [vmem:[#allocation6 + $0x40] sm:$0xff] %v3186_v21  ;;  %v3187_v2 = vadd.f32 %v3171_v41, %v2918_v36  ;;  %v3177_v41 = vld [vmem:[#allocation3 + $0x78] sm:$0xff] }
 0x390   :  { %3251 = vst [vmem:[#allocation6 + $0xc0] sm:$0xff] %v3234_v25  ;;  %v3235_v61 = vadd.f32 %v3219_v1, %v2920_v55  ;;  %v3225_v1 = vld [vmem:[#allocation3 + $0xf8] sm:$0xff] }
 0x391   :  { %3203 = vst [vmem:[#allocation6 + $0x48] sm:$0xff] %v3187_v2 }
 0x392   :  { %3252 = vst [vmem:[#allocation6 + $0xc8] sm:$0xff] %v3235_v61  ;;  %v2923_v29 = vpop.f32.mrb[84].mxu1 }
 0x393   :  { %v2924_v37 = vadd.f32 %v2923_v29, %v5417_v60  ;;  %v2925_v11 = vpop.f32.mrb[85].mxu1 }
 0x394   :  { %v2926_v22 = vadd.f32 %v2925_v11, %v5417_v60  ;;  %v2927_v58 = vpop.f32.mrb[86].mxu1 }
 0x395   :  { %v3188_v39 = vadd.f32 %v3172_v27, %v2924_v37  ;;  %v2928_v15 = vadd.f32 %v2927_v58, %v5420_v7  ;;  %v2929_v5 = vpop.f32.mrb[87].mxu1  ;;  %v3259_v27 = vld [vmem:[#allocation3 + $0x100] sm:$0xff] }
 0x396   :  { %v3236_v44 = vadd.f32 %v3220_v42, %v2926_v22  ;;  %v2930_v49 = vadd.f32 %v2929_v5, %v5420_v7  ;;  %v3308_v42 = vld [vmem:[#allocation3 + $0x180] sm:$0xff] }
 0x397   :  { %3204 = vst [vmem:[#allocation6 + $0x50] sm:$0xff] %v3188_v39  ;;  %v3189_v33 = vadd.f32 %v3173_v35, %v2928_v15  ;;  %v3260_v35 = vld [vmem:[#allocation3 + $0x108] sm:$0xff] }
 0x398   :  { %3253 = vst [vmem:[#allocation6 + $0xd0] sm:$0xff] %v3236_v44  ;;  %v3237_v13 = vadd.f32 %v3221_v19, %v2930_v49  ;;  %v3309_v19 = vld [vmem:[#allocation3 + $0x188] sm:$0xff] }
 0x399   :  { %3205 = vst [vmem:[#allocation6 + $0x58] sm:$0xff] %v3189_v33 }
 0x39a   :  { %3254 = vst [vmem:[#allocation6 + $0xd8] sm:$0xff] %v3237_v13  ;;  %v2933_v34 = vpop.f32.mrb[88].mxu1 }
 0x39b   :  { %v2934_v32 = vadd.f32 %v2933_v34, %v5425_v38  ;;  %v2935_v12 = vpop.f32.mrb[89].mxu1 }
 0x39c   :  { %v2936_v47 = vadd.f32 %v2935_v12, %v5425_v38  ;;  %v2937_v28 = vpop.f32.mrb[90].mxu1 }
 0x39d   :  { %v3190_v24 = vadd.f32 %v3174_v46, %v2934_v32  ;;  %v2938_v63 = vadd.f32 %v2937_v28, %v5428_v14  ;;  %v2939_v23 = vpop.f32.mrb[91].mxu1 }
 0x39e   :  { %v3238_v31 = vadd.f32 %v3222_v20, %v2936_v47  ;;  %v2940_v30 = vadd.f32 %v2939_v23, %v5428_v14  ;;  %v3357_v20 = vld [vmem:[#allocation3 + $0x200] sm:$0xff] }
 0x39f   :  { %3206 = vst [vmem:[#allocation6 + $0x60] sm:$0xff] %v3190_v24  ;;  %v3191_v16 = vadd.f32 %v3175_v3, %v2938_v63  ;;  %v3261_v24 = vld [vmem:[#allocation3 + $0x110] sm:$0xff] }
 0x3a0   :  { %3255 = vst [vmem:[#allocation6 + $0xe0] sm:$0xff] %v3238_v31  ;;  %v3239_v6 = vadd.f32 %v3223_v9, %v2940_v30  ;;  %v3358_v9 = vld [vmem:[#allocation3 + $0x208] sm:$0xff]  ;;  %v3310_v30 = vld [vmem:[#allocation3 + $0x190] sm:$0xff] }
 0x3a1   :  { %3207 = vst [vmem:[#allocation6 + $0x68] sm:$0xff] %v3191_v16 }
 0x3a2   :  { %3256 = vst [vmem:[#allocation6 + $0xe8] sm:$0xff] %v3239_v6  ;;  %v2943_v56 = vpop.f32.mrb[92].mxu1 }
 0x3a3   :  { %v2944_v50 = vadd.f32 %v2943_v56, %v5433_v51  ;;  %v2945_v26 = vpop.f32.mrb[93].mxu1 }
 0x3a4   :  { %v2946_v17 = vadd.f32 %v2945_v26, %v5433_v51  ;;  %v2947_v43 = vpop.f32.mrb[94].mxu1 }
 0x3a5   :  { %v3192_v21 = vadd.f32 %v3176_v8, %v2944_v50  ;;  %v2948_v36 = vadd.f32 %v2947_v43, %v5436_v18  ;;  %v2949_v59 = vpop.f32.mrb[95].mxu1  ;;  %v3262_v50 = vld [vmem:[#allocation3 + $0x118] sm:$0xff] }
 0x3a6   :  { %v3240_v25 = vadd.f32 %v3224_v10, %v2946_v17  ;;  %v2950_v55 = vadd.f32 %v2949_v59, %v5436_v18 }
 0x3a7   :  { %3208 = vst [vmem:[#allocation6 + $0x70] sm:$0xff] %v3192_v21  ;;  %v3193_v2 = vadd.f32 %v3177_v41, %v2948_v36 }
 0x3a8   :  { %3257 = vst [vmem:[#allocation6 + $0xf0] sm:$0xff] %v3240_v25  ;;  %v3241_v61 = vadd.f32 %v3225_v1, %v2950_v55 }
 0x3a9   :  { %3209 = vst [vmem:[#allocation6 + $0x78] sm:$0xff] %v3193_v2  ;;  %v3359_v2 = vld [vmem:[#allocation3 + $0x210] sm:$0xff] }
 0x3aa   :  { %3258 = vst [vmem:[#allocation6 + $0xf8] sm:$0xff] %v3241_v61 }
 0x3ea   :  { %v2986_v29 = vpop.f32.mrb[96].mxu0 }
 0x3eb   :  { %v2987_v37 = vadd.f32 %v2986_v29, %v5377_v0  ;;  %v2988_v11 = vpop.f32.mrb[97].mxu0 }
 0x3ec   :  { %v2989_v22 = vadd.f32 %v2988_v11, %v5377_v0  ;;  %v2990_v58 = vpop.f32.mrb[98].mxu0 }
 0x3ed   :  { %v3275_v39 = vadd.f32 %v3259_v27, %v2987_v37  ;;  %v2991_v15 = vadd.f32 %v2990_v58, %v5380_v54  ;;  %v2992_v5 = vpop.f32.mrb[99].mxu0  ;;  %v3263_v37 = vld [vmem:[#allocation3 + $0x120] sm:$0xff] }
 0x3ee   :  { %v3324_v44 = vadd.f32 %v3308_v42, %v2989_v22  ;;  %v2993_v49 = vadd.f32 %v2992_v5, %v5380_v54  ;;  %v3360_v22 = vld [vmem:[#allocation3 + $0x218] sm:$0xff] }
 0x3ef   :  { %v3497_v33 = vpop.f32.mrb[96].mxu1  ;;  %3292 = vst [vmem:[#allocation6 + $0x100] sm:$0xff] %v3275_v39  ;;  %v3276_v13 = vadd.f32 %v3260_v35, %v2991_v15  ;;  %v3312_v35 = vld [vmem:[#allocation3 + $0x1a0] sm:$0xff] }
 0x3f0   :  { %v3498_v34 = vpop.f32.mrb[97].mxu1  ;;  %3341 = vst [vmem:[#allocation6 + $0x180] sm:$0xff] %v3324_v44  ;;  %v3325_v46 = vadd.f32 %v3309_v19, %v2993_v49  ;;  %v3264_v44 = vld [vmem:[#allocation3 + $0x128] sm:$0xff] }
 0x3f1   :  { %v3499_v32 = vadd.f32 %v3498_v34, %v3497_v33  ;;  %v3500_v12 = vpop.f32.mrb[98].mxu1  ;;  %3293 = vst [vmem:[#allocation6 + $0x108] sm:$0xff] %v3276_v13 }
 0x3f2   :  { %v3501_v47 = vpop.f32.mrb[99].mxu1  ;;  %3342 = vst [vmem:[#allocation6 + $0x188] sm:$0xff] %v3325_v46  ;;  %v2996_v3 = vpop.f32.mrb[100].mxu0 }
 0x3f3   :  { %v3100_v28 = vadd.f32 %v3499_v32, %v5377_v0  ;;  %v3502_v63 = vadd.f32 %v3501_v47, %v3500_v12  ;;  %v2997_v23 = vadd.f32 %v2996_v3, %v5385_v52  ;;  %v2998_v31 = vpop.f32.mrb[101].mxu0  ;;  %v3311_v0 = vld [vmem:[#allocation3 + $0x198] sm:$0xff] }
 0x3f4   :  { %v2999_v56 = vadd.f32 %v2998_v31, %v5385_v52  ;;  %v3000_v8 = vpop.f32.mrb[102].mxu0  ;;  %v3265_v31 = vld [vmem:[#allocation3 + $0x130] sm:$0xff] }
 0x3f5   :  { %v3373_v16 = vadd.f32 %v3357_v20, %v3100_v28  ;;  %v3103_v6 = vadd.f32 %v3502_v63, %v5380_v54  ;;  %v3277_v26 = vadd.f32 %v3261_v24, %v2997_v23  ;;  %v3001_v10 = vadd.f32 %v3000_v8, %v5388_v57  ;;  %v3002_v17 = vpop.f32.mrb[103].mxu0  ;;  %v3361_v24 = vld [vmem:[#allocation3 + $0x220] sm:$0xff]  ;;  %v3314_v8 = vld [vmem:[#allocation3 + $0x1b0] sm:$0xff] }
 0x3f6   :  { %v3326_v41 = vadd.f32 %v3310_v30, %v2999_v56  ;;  %v3003_v21 = vadd.f32 %v3002_v17, %v5388_v57 }
 0x3f7   :  { %3390 = vst [vmem:[#allocation6 + $0x200] sm:$0xff] %v3373_v16  ;;  %v3374_v43 = vadd.f32 %v3358_v9, %v3103_v6  ;;  %v3503_v36 = vpop.f32.mrb[100].mxu1  ;;  %3294 = vst [vmem:[#allocation6 + $0x110] sm:$0xff] %v3277_v26  ;;  %v3278_v59 = vadd.f32 %v3262_v50, %v3001_v10  ;;  %v3362_v6 = vld [vmem:[#allocation3 + $0x228] sm:$0xff] }
 0x3f8   :  { %v3504_v1 = vpop.f32.mrb[101].mxu1  ;;  %3343 = vst [vmem:[#allocation6 + $0x190] sm:$0xff] %v3326_v41  ;;  %v3327_v54 = vadd.f32 %v3311_v0, %v3003_v21  ;;  %v3266_v0 = vld [vmem:[#allocation3 + $0x138] sm:$0xff] }
 0x3f9   :  { %3391 = vst [vmem:[#allocation6 + $0x208] sm:$0xff] %v3374_v43  ;;  %v3505_v25 = vadd.f32 %v3504_v1, %v3503_v36  ;;  %v3506_v55 = vpop.f32.mrb[102].mxu1  ;;  %3295 = vst [vmem:[#allocation6 + $0x118] sm:$0xff] %v3278_v59 }
 0x3fa   :  { %v3507_v61 = vpop.f32.mrb[103].mxu1  ;;  %3344 = vst [vmem:[#allocation6 + $0x198] sm:$0xff] %v3327_v54  ;;  %v3006_v27 = vpop.f32.mrb[104].mxu0 }
 0x3fb   :  { %v3108_v29 = vadd.f32 %v3505_v25, %v5385_v52  ;;  %v3508_v11 = vadd.f32 %v3507_v61, %v3506_v55  ;;  %v3007_v42 = vadd.f32 %v3006_v27, %v5393_v53  ;;  %v3008_v58 = vpop.f32.mrb[105].mxu0  ;;  %v3313_v52 = vld [vmem:[#allocation3 + $0x1a8] sm:$0xff] }
 0x3fc   :  { %v3009_v5 = vadd.f32 %v3008_v58, %v5393_v53  ;;  %v3010_v19 = vpop.f32.mrb[106].mxu0 }
 0x3fd   :  { %v3375_v39 = vadd.f32 %v3359_v2, %v3108_v29  ;;  %v3111_v15 = vadd.f32 %v3508_v11, %v5388_v57  ;;  %v3279_v49 = vadd.f32 %v3263_v37, %v3007_v42  ;;  %v3011_v33 = vadd.f32 %v3010_v19, %v5396_v40  ;;  %v3012_v13 = vpop.f32.mrb[107].mxu0  ;;  %v3363_v29 = vld [vmem:[#allocation3 + $0x230] sm:$0xff]  ;;  %v3267_v42 = vld [vmem:[#allocation3 + $0x140] sm:$0xff] }
 0x3fe   :  { %v3328_v46 = vadd.f32 %v3312_v35, %v3009_v5  ;;  %v3013_v32 = vadd.f32 %v3012_v13, %v5396_v40  ;;  %v3364_v35 = vld [vmem:[#allocation3 + $0x238] sm:$0xff] }
 0x3ff   :  { %3392 = vst [vmem:[#allocation6 + $0x210] sm:$0xff] %v3375_v39  ;;  %v3376_v34 = vadd.f32 %v3360_v22, %v3111_v15  ;;  %v3509_v12 = vpop.f32.mrb[104].mxu1  ;;  %3296 = vst [vmem:[#allocation6 + $0x120] sm:$0xff] %v3279_v49  ;;  %v3280_v20 = vadd.f32 %v3264_v44, %v3011_v33  ;;  %v3316_v15 = vld [vmem:[#allocation3 + $0x1c0] sm:$0xff]  ;;  %v3268_v33 = vld [vmem:[#allocation3 + $0x148] sm:$0xff] }
 0x400   :  { %v3510_v47 = vpop.f32.mrb[105].mxu1  ;;  %3345 = vst [vmem:[#allocation6 + $0x1a0] sm:$0xff] %v3328_v46  ;;  %v3329_v57 = vadd.f32 %v3313_v52, %v3013_v32 }
 0x401   :  { %3393 = vst [vmem:[#allocation6 + $0x218] sm:$0xff] %v3376_v34  ;;  %v3511_v28 = vadd.f32 %v3510_v47, %v3509_v12  ;;  %v3512_v3 = vpop.f32.mrb[106].mxu1  ;;  %3297 = vst [vmem:[#allocation6 + $0x128] sm:$0xff] %v3280_v20 }
 0x402   :  { %v3513_v63 = vpop.f32.mrb[107].mxu1  ;;  %3346 = vst [vmem:[#allocation6 + $0x1a8] sm:$0xff] %v3329_v57  ;;  %v3016_v9 = vpop.f32.mrb[108].mxu0 }
 0x403   :  { %v3116_v23 = vadd.f32 %v3511_v28, %v5393_v53  ;;  %v3514_v30 = vadd.f32 %v3513_v63, %v3512_v3  ;;  %v3017_v16 = vadd.f32 %v3016_v9, %v5401_v62  ;;  %v3018_v56 = vpop.f32.mrb[109].mxu0  ;;  %v3315_v53 = vld [vmem:[#allocation3 + $0x1b8] sm:$0xff] }
 0x404   :  { %v3019_v10 = vadd.f32 %v3018_v56, %v5401_v62  ;;  %v3020_v17 = vpop.f32.mrb[110].mxu0 }
 0x405   :  { %v3377_v50 = vadd.f32 %v3361_v24, %v3116_v23  ;;  %v3119_v26 = vadd.f32 %v3514_v30, %v5396_v40  ;;  %v3281_v43 = vadd.f32 %v3265_v31, %v3017_v16  ;;  %v3021_v41 = vadd.f32 %v3020_v17, %v5404_v48  ;;  %v3022_v21 = vpop.f32.mrb[111].mxu0  ;;  %v3365_v24 = vld [vmem:[#allocation3 + $0x240] sm:$0xff]  ;;  %v3269_v31 = vld [vmem:[#allocation3 + $0x150] sm:$0xff] }
 0x406   :  { %v3330_v59 = vadd.f32 %v3314_v8, %v3019_v10  ;;  %v3023_v1 = vadd.f32 %v3022_v21, %v5404_v48  ;;  %v3318_v8 = vld [vmem:[#allocation3 + $0x1d0] sm:$0xff] }
 0x407   :  { %3394 = vst [vmem:[#allocation6 + $0x220] sm:$0xff] %v3377_v50  ;;  %v3378_v36 = vadd.f32 %v3362_v6, %v3119_v26  ;;  %v3515_v54 = vpop.f32.mrb[108].mxu1  ;;  %3298 = vst [vmem:[#allocation6 + $0x130] sm:$0xff] %v3281_v43  ;;  %v3282_v25 = vadd.f32 %v3266_v0, %v3021_v41  ;;  %v3366_v6 = vld [vmem:[#allocation3 + $0x248] sm:$0xff]  ;;  %v3270_v0 = vld [vmem:[#allocation3 + $0x158] sm:$0xff] }
 0x408   :  { %v3516_v55 = vpop.f32.mrb[109].mxu1  ;;  %3347 = vst [vmem:[#allocation6 + $0x1b0] sm:$0xff] %v3330_v59  ;;  %v3331_v40 = vadd.f32 %v3315_v53, %v3023_v1 }
 0x409   :  { %3395 = vst [vmem:[#allocation6 + $0x228] sm:$0xff] %v3378_v36  ;;  %v3517_v2 = vadd.f32 %v3516_v55, %v3515_v54  ;;  %v3518_v61 = vpop.f32.mrb[110].mxu1  ;;  %3299 = vst [vmem:[#allocation6 + $0x138] sm:$0xff] %v3282_v25 }
 0x40a   :  { %v3519_v27 = vpop.f32.mrb[111].mxu1  ;;  %3348 = vst [vmem:[#allocation6 + $0x1b8] sm:$0xff] %v3331_v40  ;;  %v3026_v11 = vpop.f32.mrb[112].mxu0 }
 0x40b   :  { %v3124_v37 = vadd.f32 %v3517_v2, %v5401_v62  ;;  %v3520_v22 = vadd.f32 %v3519_v27, %v3518_v61  ;;  %v3027_v58 = vadd.f32 %v3026_v11, %v5409_v45  ;;  %v3028_v39 = vpop.f32.mrb[113].mxu0  ;;  %v3317_v62 = vld [vmem:[#allocation3 + $0x1c8] sm:$0xff]  ;;  %v3367_v2 = vld [vmem:[#allocation3 + $0x250] sm:$0xff] }
 0x40c   :  { %v3029_v44 = vadd.f32 %v3028_v39, %v5409_v45  ;;  %v3030_v49 = vpop.f32.mrb[114].mxu0 }
 0x40d   :  { %v3379_v5 = vadd.f32 %v3363_v29, %v3124_v37  ;;  %v3127_v19 = vadd.f32 %v3520_v22, %v5404_v48  ;;  %v3283_v13 = vadd.f32 %v3267_v42, %v3027_v58  ;;  %v3031_v52 = vadd.f32 %v3030_v49, %v5412_v4  ;;  %v3032_v34 = vpop.f32.mrb[115].mxu0  ;;  %v3271_v37 = vld [vmem:[#allocation3 + $0x160] sm:$0xff]  ;;  %v3368_v22 = vld [vmem:[#allocation3 + $0x258] sm:$0xff] }
 0x40e   :  { %v3332_v32 = vadd.f32 %v3316_v15, %v3029_v44  ;;  %v3033_v12 = vadd.f32 %v3032_v34, %v5412_v4  ;;  %v3272_v44 = vld [vmem:[#allocation3 + $0x168] sm:$0xff] }
 0x40f   :  { %3396 = vst [vmem:[#allocation6 + $0x230] sm:$0xff] %v3379_v5  ;;  %v3380_v46 = vadd.f32 %v3364_v35, %v3127_v19  ;;  %v3521_v20 = vpop.f32.mrb[112].mxu1  ;;  %3300 = vst [vmem:[#allocation6 + $0x140] sm:$0xff] %v3283_v13  ;;  %v3284_v47 = vadd.f32 %v3268_v33, %v3031_v52  ;;  %v3320_v35 = vld [vmem:[#allocation3 + $0x1e0] sm:$0xff] }
 0x410   :  { %v3522_v57 = vpop.f32.mrb[113].mxu1  ;;  %3349 = vst [vmem:[#allocation6 + $0x1c0] sm:$0xff] %v3332_v32  ;;  %v3333_v48 = vadd.f32 %v3317_v62, %v3033_v12 }
 0x411   :  { %3397 = vst [vmem:[#allocation6 + $0x238] sm:$0xff] %v3380_v46  ;;  %v3523_v28 = vadd.f32 %v3522_v57, %v3521_v20  ;;  %v3524_v3 = vpop.f32.mrb[114].mxu1  ;;  %3301 = vst [vmem:[#allocation6 + $0x148] sm:$0xff] %v3284_v47  ;;  %v3369_v57 = vld [vmem:[#allocation3 + $0x260] sm:$0xff] }
 0x412   :  { %v3525_v63 = vpop.f32.mrb[115].mxu1  ;;  %3350 = vst [vmem:[#allocation6 + $0x1c8] sm:$0xff] %v3333_v48  ;;  %v3036_v9 = vpop.f32.mrb[116].mxu0 }
 0x413   :  { %v3132_v23 = vadd.f32 %v3523_v28, %v5409_v45  ;;  %v3526_v30 = vadd.f32 %v3525_v63, %v3524_v3  ;;  %v3037_v16 = vadd.f32 %v3036_v9, %v5417_v60  ;;  %v3038_v56 = vpop.f32.mrb[117].mxu0  ;;  %v3319_v45 = vld [vmem:[#allocation3 + $0x1d8] sm:$0xff]  ;;  %v3370_v9 = vld [vmem:[#allocation3 + $0x268] sm:$0xff] }
 0x414   :  { %v3039_v10 = vadd.f32 %v3038_v56, %v5417_v60  ;;  %v3040_v17 = vpop.f32.mrb[118].mxu0 }
 0x415   :  { %v3381_v50 = vadd.f32 %v3365_v24, %v3132_v23  ;;  %v3135_v26 = vadd.f32 %v3526_v30, %v5412_v4  ;;  %v3285_v43 = vadd.f32 %v3269_v31, %v3037_v16  ;;  %v3041_v41 = vadd.f32 %v3040_v17, %v5420_v7  ;;  %v3042_v21 = vpop.f32.mrb[119].mxu0  ;;  %v3273_v24 = vld [vmem:[#allocation3 + $0x170] sm:$0xff] }
 0x416   :  { %v3334_v36 = vadd.f32 %v3318_v8, %v3039_v10  ;;  %v3043_v59 = vadd.f32 %v3042_v21, %v5420_v7  ;;  %v3322_v30 = vld [vmem:[#allocation3 + $0x1f0] sm:$0xff] }
 0x417   :  { %3398 = vst [vmem:[#allocation6 + $0x240] sm:$0xff] %v3381_v50  ;;  %v3382_v53 = vadd.f32 %v3366_v6, %v3135_v26  ;;  %v3527_v1 = vpop.f32.mrb[116].mxu1  ;;  %3302 = vst [vmem:[#allocation6 + $0x150] sm:$0xff] %v3285_v43  ;;  %v3286_v54 = vadd.f32 %v3270_v0, %v3041_v41  ;;  %v3274_v50 = vld [vmem:[#allocation3 + $0x178] sm:$0xff] }
 0x418   :  { %v3528_v25 = vpop.f32.mrb[117].mxu1  ;;  %3351 = vst [vmem:[#allocation6 + $0x1d0] sm:$0xff] %v3334_v36  ;;  %v3335_v4 = vadd.f32 %v3319_v45, %v3043_v59 }
 0x419   :  { %3399 = vst [vmem:[#allocation6 + $0x248] sm:$0xff] %v3382_v53  ;;  %v3529_v55 = vadd.f32 %v3528_v25, %v3527_v1  ;;  %v3530_v40 = vpop.f32.mrb[118].mxu1  ;;  %3303 = vst [vmem:[#allocation6 + $0x158] sm:$0xff] %v3286_v54  ;;  %v3371_v1 = vld [vmem:[#allocation3 + $0x270] sm:$0xff] }
 0x41a   :  { %v3531_v61 = vpop.f32.mrb[119].mxu1  ;;  %3352 = vst [vmem:[#allocation6 + $0x1d8] sm:$0xff] %v3335_v4  ;;  %v3046_v27 = vpop.f32.mrb[120].mxu0 }
 0x41b   :  { %v3140_v29 = vadd.f32 %v3529_v55, %v5417_v60  ;;  %v3532_v11 = vadd.f32 %v3531_v61, %v3530_v40  ;;  %v3047_v42 = vadd.f32 %v3046_v27, %v5425_v38  ;;  %v3048_v58 = vpop.f32.mrb[121].mxu0  ;;  %v3321_v60 = vld [vmem:[#allocation3 + $0x1e8] sm:$0xff]  ;;  %v3372_v55 = vld [vmem:[#allocation3 + $0x278] sm:$0xff] }
 0x41c   :  { %v3049_v5 = vadd.f32 %v3048_v58, %v5425_v38  ;;  %v3050_v19 = vpop.f32.mrb[122].mxu0 }
 0x41d   :  { %v3383_v39 = vadd.f32 %v3367_v2, %v3140_v29  ;;  %v3143_v15 = vadd.f32 %v3532_v11, %v5420_v7  ;;  %v3287_v49 = vadd.f32 %v3271_v37, %v3047_v42  ;;  %v3051_v33 = vadd.f32 %v3050_v19, %v5428_v14  ;;  %v3052_v13 = vpop.f32.mrb[123].mxu0 }
 0x41e   :  { %v3336_v34 = vadd.f32 %v3320_v35, %v3049_v5  ;;  %v3053_v62 = vadd.f32 %v3052_v13, %v5428_v14 }
 0x41f   :  { %3400 = vst [vmem:[#allocation6 + $0x250] sm:$0xff] %v3383_v39  ;;  %v3384_v52 = vadd.f32 %v3368_v22, %v3143_v15  ;;  %v3533_v46 = vpop.f32.mrb[120].mxu1  ;;  %3304 = vst [vmem:[#allocation6 + $0x160] sm:$0xff] %v3287_v49  ;;  %v3288_v32 = vadd.f32 %v3272_v44, %v3051_v33 }
 0x420   :  { %v3534_v12 = vpop.f32.mrb[121].mxu1  ;;  %3353 = vst [vmem:[#allocation6 + $0x1e0] sm:$0xff] %v3336_v34  ;;  %v3337_v7 = vadd.f32 %v3321_v60, %v3053_v62 }
 0x421   :  { %3401 = vst [vmem:[#allocation6 + $0x258] sm:$0xff] %v3384_v52  ;;  %v3535_v20 = vadd.f32 %v3534_v12, %v3533_v46  ;;  %v3536_v47 = vpop.f32.mrb[122].mxu1  ;;  %3305 = vst [vmem:[#allocation6 + $0x168] sm:$0xff] %v3288_v32 }
 0x422   :  { %v3537_v48 = vpop.f32.mrb[123].mxu1  ;;  %3354 = vst [vmem:[#allocation6 + $0x1e8] sm:$0xff] %v3337_v7  ;;  %v3056_v3 = vpop.f32.mrb[124].mxu0 }
 0x423   :  { %v3148_v28 = vadd.f32 %v3535_v20, %v5425_v38  ;;  %v3538_v63 = vadd.f32 %v3537_v48, %v3536_v47  ;;  %v3057_v23 = vadd.f32 %v3056_v3, %v5433_v51  ;;  %v3058_v31 = vpop.f32.mrb[125].mxu0  ;;  %v3323_v38 = vld [vmem:[#allocation3 + $0x1f8] sm:$0xff] }
 0x424   :  { %v3059_v56 = vadd.f32 %v3058_v31, %v5433_v51  ;;  %v3060_v8 = vpop.f32.mrb[126].mxu0 }
 0x425   :  { %v3385_v16 = vadd.f32 %v3369_v57, %v3148_v28  ;;  %v3151_v6 = vadd.f32 %v3538_v63, %v5428_v14  ;;  %v3289_v26 = vadd.f32 %v3273_v24, %v3057_v23  ;;  %v3061_v10 = vadd.f32 %v3060_v8, %v5436_v18  ;;  %v3062_v17 = vpop.f32.mrb[127].mxu0 }
 0x426   :  { %v3338_v43 = vadd.f32 %v3322_v30, %v3059_v56  ;;  %v3063_v41 = vadd.f32 %v3062_v17, %v5436_v18 }
 0x427   :  { %3402 = vst [vmem:[#allocation6 + $0x260] sm:$0xff] %v3385_v16  ;;  %v3386_v0 = vadd.f32 %v3370_v9, %v3151_v6  ;;  %v3539_v21 = vpop.f32.mrb[124].mxu1  ;;  %3306 = vst [vmem:[#allocation6 + $0x170] sm:$0xff] %v3289_v26  ;;  %v3290_v45 = vadd.f32 %v3274_v50, %v3061_v10 }
 0x428   :  { %v3540_v53 = vpop.f32.mrb[125].mxu1  ;;  %3355 = vst [vmem:[#allocation6 + $0x1f0] sm:$0xff] %v3338_v43  ;;  %v3339_v14 = vadd.f32 %v3323_v38, %v3063_v41 }
 0x429   :  { %3403 = vst [vmem:[#allocation6 + $0x268] sm:$0xff] %v3386_v0  ;;  %v3541_v36 = vadd.f32 %v3540_v53, %v3539_v21  ;;  %v3542_v59 = vpop.f32.mrb[126].mxu1  ;;  %3307 = vst [vmem:[#allocation6 + $0x178] sm:$0xff] %v3290_v45 }
 0x42a   :  { %v3543_v54 = vpop.f32.mrb[127].mxu1  ;;  %3356 = vst [vmem:[#allocation6 + $0x1f8] sm:$0xff] %v3339_v14 }
 0x42b   :  { %v3156_v25 = vadd.f32 %v3541_v36, %v5433_v51  ;;  %v3544_v4 = vadd.f32 %v3543_v54, %v3542_v59 }
 0x42d   :  { %v3387_v40 = vadd.f32 %v3371_v1, %v3156_v25  ;;  %v3159_v2 = vadd.f32 %v3544_v4, %v5436_v18 }
 0x42f   :  { %3404 = vst [vmem:[#allocation6 + $0x270] sm:$0xff] %v3387_v40  ;;  %v3388_v61 = vadd.f32 %v3372_v55, %v3159_v2 }
 0x431   :  { %3405 = vst [vmem:[#allocation6 + $0x278] sm:$0xff] %v3388_v61 }
 0x432   :  { %3908 = shalt.err (!%p3905_p12)
}
 0x433   :  { %s3909_s6 = scalar_lea.hbm %s5511_s7, 10240 }
 0x434   :  { %p3910_p13 = scmp.ne.s32.totalorder %s5511_s7, %s3909_s6  ;;  %p3913_p0 = scmp.lt.u32.totalorder %s3909_s6, %s5511_s7 }
 0x436   :  { %p3915_p1 = pnand %p3913_p0, %p3910_p13 }
 0x438   :  { %3918 = shalt.err (!%p3915_p1)
}
 0x439   :  { %3417 = dma.vmem_to_hbm [thread:$0]  %s3412_s15, 10240, %s5511_s7, [#allocation5], %s3924_s11, %s3924_s11, %s3925_s12  }
 0x43a   :  { %3921 = dma.done.wait [#allocation5], 10240  }
 0x43b   :  { %3922 = vsyncadd [#allocation5], 4294957056 }
 0x43c   :  { %3421 = vsyncpa [#allocation4], 1 }
 0x43d   :  { %3422 = vsyncpa [#allocation5], 1 }

</bundles_post_ra>
